<compile_context>
chip_gen: v7x
topology: tpu7x:2x2x1
jax: 0.10.0
libtpu: 0.0.40
codegen_flags: <defaults>
</compile_context>

<pallas_src>
import functools

import jax
import jax.numpy as jnp
from jax import lax
from jax.experimental import pallas as pl
from jax.experimental.pallas import tpu as pltpu


def gru2_wavefront_kernel(xg0_ref,                  # (t_blk, Bp, 3Hp) precomputed layer-0 x-side gates
                          w_ref,                    # (2Hp, 9Hp) fused [whh0|wih1|0 ; 0|0|whh1]
                          b1_ref,                   # (1, 3Hp) layer-1 x-side bias (r/z merged)
                          bhh0n_ref, bhh1n_ref,     # (1, Hp) each
                          out_ref,                  # (Bp, Hp)
                          h0_ref, h1_ref,           # VMEM scratch hidden states (Bp, Hp)
                          *, total_steps, t_blk, hp, n_blocks, unroll):
    Hp = hp
    blk = pl.program_id(0)

    @pl.when(blk == 0)
    def _():
        h0_ref[...] = jnp.zeros_like(h0_ref)
        h1_ref[...] = jnp.zeros_like(h1_ref)

    # Hoist constant weight / bias loads out of the time loop.
    w = w_ref[...]
    b1 = b1_ref[...]
    bhh0_n = bhh0n_ref[...]
    bhh1_n = bhh1n_ref[...]
    base = blk * t_blk

    def cell(gi, gh, bhh_n, h_prev):
        # Fused r/z sigmoid: one EUP push over both gate tiles; whole-tile slices.
        rz = jax.nn.sigmoid(gi[:, :2 * Hp] + gh[:, :2 * Hp])
        r, z = rz[:, :Hp], rz[:, Hp:]
        n = jnp.tanh(gi[:, 2 * Hp:] + r * (gh[:, 2 * Hp:] + bhh_n))
        return (1.0 - z) * n + z * h_prev

    def make_step(masked):
        def step(i, carry):
            # Wavefront step t = base + i: carry holds h0(t-1), h1(t-2).
            h0, h1 = carry
            hcat = jnp.concatenate([h0, h1], axis=1)                    # (Bp, 2Hp)
            g = jnp.dot(hcat, w, preferred_element_type=jnp.float32)    # (Bp, 9Hp) one MXU push
            gh0 = g[:, :3 * Hp]
            gi1 = g[:, 3 * Hp:6 * Hp] + b1
            gh1 = g[:, 6 * Hp:]
            gi0 = xg0_ref[i]                                            # (Bp, 3Hp)
            h0n = cell(gi0, gh0, bhh0_n, h0)    # layer 0 at time t
            h1n = cell(gi1, gh1, bhh1_n, h1)    # layer 1 at time t-1
            if masked:
                t = base + i
                v0 = t < total_steps - 1                          # layer-0 exists for t <  S
                v1 = jnp.logical_and(t >= 1, t < total_steps)     # layer-1 exists for 1 <= t <= S
                h0 = jnp.where(v0, h0n, h0)
                h1 = jnp.where(v1, h1n, h1)
            else:
                h0, h1 = h0n, h1n
            return h0, h1
        return step

    def run(masked):
        h0f, h1f = lax.fori_loop(0, t_blk, make_step(masked),
                                 (h0_ref[...], h1_ref[...]), unroll=unroll)
        h0_ref[...] = h0f
        h1_ref[...] = h1f

    if n_blocks <= 2:
        # Every block touches a sequence edge; only the masked variant is needed.
        run(True)
    else:
        is_edge = jnp.logical_or(blk == 0, blk == n_blocks - 1)

        @pl.when(is_edge)
        def _():
            run(True)

        @pl.when(jnp.logical_not(is_edge))
        def _():
            run(False)

    # Unconditional (cheap) write; constant output block index, last block wins.
    out_ref[...] = h1_ref[...].astype(out_ref.dtype)


def pack_params(params, lane=128):
    """PyTorch-style stacked (3, in, H) params -> lane-tile-padded fused layout.

    Gate order r|z|n; each gate block zero-padded to a full 128-lane tile.
    Biases folded host-side: r/z get bih+bhh merged; bih_n folds into the
    x-side bias; bhh_n is kept separate (it is multiplied by r in the cell).
    The recurrent weights of both layers are fused into one block matrix so the
    kernel issues a single MXU push per wavefront step."""
    H = params["whh0"].shape[-1]
    Hp = ((H + lane - 1) // lane) * lane

    def pad_lane(w):                       # (..., H) -> (..., Hp)
        pad = [(0, 0)] * (w.ndim - 1) + [(0, Hp - H)]
        return jnp.pad(w, pad)

    def fuse(w3):                          # (3, R, H) -> (R, 3Hp)
        return jnp.concatenate([pad_lane(w3[0]), pad_lane(w3[1]), pad_lane(w3[2])], axis=1)

    def fuse_bias(bih, bhh):               # (3,1,H) -> (1, 3Hp); r/z merged, n = bih_n
        return jnp.concatenate([pad_lane(bih[0] + bhh[0]),
                                pad_lane(bih[1] + bhh[1]),
                                pad_lane(bih[2])], axis=1)

    whh0 = fuse(params["whh0"])            # (H, 3Hp)
    wih1 = fuse(params["wih1"])            # (H, 3Hp)
    whh1 = fuse(params["whh1"])            # (H, 3Hp)
    z3 = jnp.zeros((H, 3 * Hp), jnp.float32)
    top = jnp.concatenate([whh0, wih1, z3], axis=1)   # rows fed by h0
    bot = jnp.concatenate([z3, z3, whh1], axis=1)     # rows fed by h1
    pad_rows = lambda w: jnp.pad(w, ((0, Hp - H), (0, 0)))
    w_fused = jnp.concatenate([pad_rows(top), pad_rows(bot)], axis=0)   # (2Hp, 9Hp)

    return {
        "wih0": fuse(params["wih0"]),                       # (F, 3Hp) — wrapper-side projection
        "b0": fuse_bias(params["bih0"], params["bhh0"]),    # (1, 3Hp)
        "w_fused": w_fused,                                 # (2Hp, 9Hp)
        "b1": fuse_bias(params["bih1"], params["bhh1"]),    # (1, 3Hp)
        "bhh0_n": pad_lane(params["bhh0"][2]),              # (1, Hp)
        "bhh1_n": pad_lane(params["bhh1"][2]),              # (1, Hp)
    }


def traj_simi_regression_forward(inputs, packed, nhidden, *, t_blk=256, unroll=32):
    """inputs: (seq_len, batch, nfeat) f32; returns (batch, nhidden) f32."""
    S, B, F = inputs.shape
    H = nhidden
    Hp = packed["bhh0_n"].shape[-1]
    Bp = max(8, ((B + 7) // 8) * 8)        # sublane-dense batch

    T = S + 1                              # wavefront steps (layer 1 trails layer 0 by one)
    t_blk = max(1, min(t_blk, T))
    n_blocks = pl.cdiv(T, t_blk)
    t_pad = n_blocks * t_blk
    unroll = max(1, min(unroll, t_blk))

    # Hoist the layer-0 input projection out of the recurrence: one big matmul
    # over the whole sequence (only the h-side matmuls are serially dependent).
    xg0 = (inputs.reshape(S * B, F) @ packed["wih0"] + packed["b0"]).reshape(S, B, 3 * Hp)
    xg0 = jnp.pad(xg0, ((0, t_pad - S), (0, Bp - B), (0, 0)))

    kernel = functools.partial(gru2_wavefront_kernel, total_steps=T, t_blk=t_blk,
                               hp=Hp, n_blocks=n_blocks, unroll=unroll)

    const = lambda shape: pl.BlockSpec(shape, lambda t, _shape=shape: tuple(0 for _ in _shape))

    out = pl.pallas_call(
        kernel,
        out_shape=jax.ShapeDtypeStruct((Bp, Hp), jnp.float32),
        grid_spec=pltpu.PrefetchScalarGridSpec(
            num_scalar_prefetch=0,
            grid=(n_blocks,),
            in_specs=[
                pl.BlockSpec((t_blk, Bp, 3 * Hp), lambda t: (t, 0, 0)),  # precomputed layer-0 gates
                const((2 * Hp, 9 * Hp)),                                  # fused recurrent weights
                const((1, 3 * Hp)),                                       # b1
                const((1, Hp)),                                           # bhh0_n
                const((1, Hp)),                                           # bhh1_n
            ],
            out_specs=pl.BlockSpec((Bp, Hp), lambda t: (0, 0)),
            scratch_shapes=[pltpu.VMEM((Bp, Hp), jnp.float32),            # h layer 0
                            pltpu.VMEM((Bp, Hp), jnp.float32)],           # h layer 1
        ),
        compiler_params=pltpu.CompilerParams(
            dimension_semantics=("arbitrary",)),                          # time is sequential
    )(xg0, packed["w_fused"], packed["b1"], packed["bhh0_n"], packed["bhh1_n"])

    return out[:B, :H]


def init_params(key, nfeat, nhidden):
    """Deterministic init, PyTorch-style uniform(-1/sqrt(H), 1/sqrt(H)).
    Stored gate-stacked (3, in_dim, H) / (3, 1, H), PyTorch gate order r,z,n."""
    k = 1.0 / jnp.sqrt(jnp.float32(nhidden))
    keys = jax.random.split(key, 8)
    u = lambda kk, shape: jax.random.uniform(kk, shape, jnp.float32, -k, k)
    return {
        "wih0": u(keys[0], (3, nfeat, nhidden)),
        "whh0": u(keys[1], (3, nhidden, nhidden)),
        "bih0": u(keys[2], (3, 1, nhidden)),
        "bhh0": u(keys[3], (3, 1, nhidden)),
        "wih1": u(keys[4], (3, nhidden, nhidden)),
        "whh1": u(keys[5], (3, nhidden, nhidden)),
        "bih1": u(keys[6], (3, 1, nhidden)),
        "bhh1": u(keys[7], (3, 1, nhidden)),
    }


def reference_forward(inputs, params):
    """Pure-JAX reference of the stacked GRU (same math as torch.nn.GRU)."""
    def cell(x, h, wih, whh, bih, bhh):
        i_r = x @ wih[0] + bih[0]; i_z = x @ wih[1] + bih[1]; i_n = x @ wih[2] + bih[2]
        h_r = h @ whh[0] + bhh[0]; h_z = h @ whh[1] + bhh[1]; h_n = h @ whh[2] + bhh[2]
        r = jax.nn.sigmoid(i_r + h_r)
        z = jax.nn.sigmoid(i_z + h_z)
        n = jnp.tanh(i_n + r * h_n)
        return (1.0 - z) * n + z * h

    B = inputs.shape[1]
    H = params["wih0"].shape[-1]
    h0 = jnp.zeros((B, H), jnp.float32)
    h1 = jnp.zeros((B, H), jnp.float32)

    def step(carry, x_t):
        h0, h1 = carry
        h0 = cell(x_t, h0, params["wih0"], params["whh0"], params["bih0"], params["bhh0"])
        h1 = cell(h0, h1, params["wih1"], params["whh1"], params["bih1"], params["bhh1"])
        return (h0, h1), None

    (h0, h1), _ = jax.lax.scan(step, (h0, h1), inputs)
    return h1


if __name__ == "__main__":
    SEQ, BATCH, NFEAT, NHIDDEN = 8, 2, 8, 32

    key = jax.random.PRNGKey(0)
    k_x, k_p = jax.random.split(key)
    inputs = jax.random.normal(k_x, (SEQ, BATCH, NFEAT), jnp.float32)
    params = init_params(k_p, NFEAT, NHIDDEN)
    packed = pack_params(params)

    out = traj_simi_regression_forward(inputs, packed, NHIDDEN)
    out = jax.block_until_ready(out)

    ref = jax.block_until_ready(reference_forward(inputs, params))
    assert out.shape == (BATCH, NHIDDEN)
    assert jnp.allclose(out, ref, atol=1e-5, rtol=1e-5), "mismatch vs JAX reference"

    print("KERNEL_OK")
</pallas_src>

<mosaic_0001>
module attributes {stable_mosaic.version = 11 : i64} {
  func.func @gru2_wavefront_kernel(%arg0: i32, %arg1: memref<9x8x384xf32, #tpu.memory_space<vmem>>, %arg2: memref<256x1152xf32, #tpu.memory_space<vmem>>, %arg3: memref<1x384xf32, #tpu.memory_space<vmem>>, %arg4: memref<1x128xf32, #tpu.memory_space<vmem>>, %arg5: memref<1x128xf32, #tpu.memory_space<vmem>>, %arg6: memref<8x128xf32, #tpu.memory_space<vmem>>, %arg7: memref<8x128xf32, #tpu.memory_space<vmem>>, %arg8: memref<8x128xf32, #tpu.memory_space<vmem>>) attributes {dimension_semantics = [#tpu.dimension_semantics<arbitrary>], iteration_bounds = array<i64: 1>, scalar_prefetch = 0 : i64, scratch_operands = 2 : i64, tpu.core_type = #tpu.core_type<tc>, window_params = [{transform_indices = @transform_0, window_bounds = array<i64: 9, 8, 384>}, {pipeline_mode = #tpu.pipeline_mode<synchronous>, transform_indices = @transform_1, window_bounds = array<i64: 256, 1152>}, {pipeline_mode = #tpu.pipeline_mode<synchronous>, transform_indices = @transform_2, window_bounds = array<i64: 1, 384>}, {pipeline_mode = #tpu.pipeline_mode<synchronous>, transform_indices = @transform_3, window_bounds = array<i64: 1, 128>}, {pipeline_mode = #tpu.pipeline_mode<synchronous>, transform_indices = @transform_4, window_bounds = array<i64: 1, 128>}, {pipeline_mode = #tpu.pipeline_mode<synchronous>, transform_indices = @transform_5, window_bounds = array<i64: 8, 128>}]} {
    %c0_i32 = arith.constant 0 : i32
    %0 = arith.cmpi eq, %arg0, %c0_i32 : i32
    %1 = arith.extui %0 : i1 to i32
    %c0_i32_0 = arith.constant 0 : i32
    %2 = arith.cmpi ne, %1, %c0_i32_0 : i32
    scf.if %2 {
      %cst_111 = arith.constant 0.000000e+00 : f32
      %563 = vector.broadcast %cst_111 : f32 to vector<8x128xf32>
      %c0_112 = arith.constant 0 : index
      %c0_113 = arith.constant 0 : index
      %564 = vector.load %arg7[%c0_112, %c0_113] : memref<8x128xf32, #tpu.memory_space<vmem>>, vector<8x128xf32>
      tpu.vector_store %arg7[%c0_112, %c0_113], %563 {strides = array<i32>} : memref<8x128xf32, #tpu.memory_space<vmem>>, vector<8x128xf32>,
      %cst_114 = arith.constant 0.000000e+00 : f32
      %565 = vector.broadcast %cst_114 : f32 to vector<8x128xf32>
      %c0_115 = arith.constant 0 : index
      %c0_116 = arith.constant 0 : index
      %566 = vector.load %arg8[%c0_115, %c0_116] : memref<8x128xf32, #tpu.memory_space<vmem>>, vector<8x128xf32>
      tpu.vector_store %arg8[%c0_115, %c0_116], %565 {strides = array<i32>} : memref<8x128xf32, #tpu.memory_space<vmem>>, vector<8x128xf32>,
    } else {
    }
    %c0 = arith.constant 0 : index
    %c0_1 = arith.constant 0 : index
    %3 = vector.load %arg2[%c0, %c0_1] : memref<256x1152xf32, #tpu.memory_space<vmem>>, vector<256x1152xf32>
    %c0_2 = arith.constant 0 : index
    %c0_3 = arith.constant 0 : index
    %4 = vector.load %arg3[%c0_2, %c0_3] : memref<1x384xf32, #tpu.memory_space<vmem>>, vector<1x384xf32>
    %c0_4 = arith.constant 0 : index
    %c0_5 = arith.constant 0 : index
    %5 = vector.load %arg4[%c0_4, %c0_5] : memref<1x128xf32, #tpu.memory_space<vmem>>, vector<1x128xf32>
    %c0_6 = arith.constant 0 : index
    %c0_7 = arith.constant 0 : index
    %6 = vector.load %arg5[%c0_6, %c0_7] : memref<1x128xf32, #tpu.memory_space<vmem>>, vector<1x128xf32>
    %c9_i32 = arith.constant 9 : i32
    %7 = arith.muli %arg0, %c9_i32 : i32
    %c0_8 = arith.constant 0 : index
    %c0_9 = arith.constant 0 : index
    %8 = vector.load %arg7[%c0_8, %c0_9] : memref<8x128xf32, #tpu.memory_space<vmem>>, vector<8x128xf32>
    %c0_10 = arith.constant 0 : index
    %c0_11 = arith.constant 0 : index
    %9 = vector.load %arg8[%c0_10, %c0_11] : memref<8x128xf32, #tpu.memory_space<vmem>>, vector<8x128xf32>
    %c0_i32_12 = arith.constant 0 : i32
    %10 = tpu.concatenate %8, %9 in 1 : vector<8x128xf32>, vector<8x128xf32> -> vector<8x256xf32>
    %cst = arith.constant dense<0.000000e+00> : vector<8x1152xf32>
    %11 = tpu.matmul %10, %3, %cst {dimension_numbers = #tpu.dot_dimension_numbers<[1], [0], [0], [1], [0, 0, 1, 1], [], []>} : vector<8x256xf32>, vector<256x1152xf32>, vector<8x1152xf32> -> vector<8x1152xf32>
    %12 = vector.extract_strided_slice %11 {offsets = [0, 0], sizes = [8, 384], strides = [1, 1]} : vector<8x1152xf32> to vector<8x384xf32>
    %13 = vector.extract_strided_slice %11 {offsets = [0, 384], sizes = [8, 384], strides = [1, 1]} : vector<8x1152xf32> to vector<8x384xf32>
    %14 = vector.broadcast %4 : vector<1x384xf32> to vector<8x384xf32>
    %15 = arith.addf %13, %14 : vector<8x384xf32>
    %16 = vector.extract_strided_slice %11 {offsets = [0, 768], sizes = [8, 384], strides = [1, 1]} : vector<8x1152xf32> to vector<8x384xf32>
    %17 = arith.index_cast %c0_i32_12 : i32 to index
    %c0_13 = arith.constant 0 : index
    %c0_14 = arith.constant 0 : index
    %18 = vector.load %arg1[%17, %c0_13, %c0_14] : memref<9x8x384xf32, #tpu.memory_space<vmem>>, vector<1x8x384xf32>
    %19 = vector.shape_cast %18 : vector<1x8x384xf32> to vector<8x384xf32>
    %20 = vector.extract_strided_slice %19 {offsets = [0, 0], sizes = [8, 256], strides = [1, 1]} : vector<8x384xf32> to vector<8x256xf32>
    %21 = vector.extract_strided_slice %12 {offsets = [0, 0], sizes = [8, 256], strides = [1, 1]} : vector<8x384xf32> to vector<8x256xf32>
    %22 = arith.addf %20, %21 : vector<8x256xf32>
    %23 = arith.negf %22 : vector<8x256xf32>
    %24 = math.exp %23 : vector<8x256xf32>
    %cst_15 = arith.constant 1.000000e+00 : f32
    %25 = vector.broadcast %cst_15 : f32 to vector<8x256xf32>
    %26 = arith.addf %25, %24 : vector<8x256xf32>
    %27 = arith.divf %25, %26 : vector<8x256xf32>
    %28 = vector.extract_strided_slice %27 {offsets = [0, 0], sizes = [8, 128], strides = [1, 1]} : vector<8x256xf32> to vector<8x128xf32>
    %29 = vector.extract_strided_slice %27 {offsets = [0, 128], sizes = [8, 128], strides = [1, 1]} : vector<8x256xf32> to vector<8x128xf32>
    %30 = vector.extract_strided_slice %19 {offsets = [0, 256], sizes = [8, 128], strides = [1, 1]} : vector<8x384xf32> to vector<8x128xf32>
    %31 = vector.extract_strided_slice %12 {offsets = [0, 256], sizes = [8, 128], strides = [1, 1]} : vector<8x384xf32> to vector<8x128xf32>
    %32 = vector.broadcast %5 : vector<1x128xf32> to vector<8x128xf32>
    %33 = arith.addf %31, %32 : vector<8x128xf32>
    %34 = arith.mulf %28, %33 : vector<8x128xf32>
    %35 = arith.addf %30, %34 : vector<8x128xf32>
    %36 = math.tanh %35 : vector<8x128xf32>
    %cst_16 = arith.constant 1.000000e+00 : f32
    %37 = vector.broadcast %cst_16 : f32 to vector<8x128xf32>
    %38 = arith.subf %37, %29 : vector<8x128xf32>
    %39 = arith.mulf %38, %36 : vector<8x128xf32>
    %40 = arith.mulf %29, %8 : vector<8x128xf32>
    %41 = arith.addf %39, %40 : vector<8x128xf32>
    %42 = vector.extract_strided_slice %15 {offsets = [0, 0], sizes = [8, 256], strides = [1, 1]} : vector<8x384xf32> to vector<8x256xf32>
    %43 = vector.extract_strided_slice %16 {offsets = [0, 0], sizes = [8, 256], strides = [1, 1]} : vector<8x384xf32> to vector<8x256xf32>
    %44 = arith.addf %42, %43 : vector<8x256xf32>
    %45 = arith.negf %44 : vector<8x256xf32>
    %46 = math.exp %45 : vector<8x256xf32>
    %cst_17 = arith.constant 1.000000e+00 : f32
    %47 = vector.broadcast %cst_17 : f32 to vector<8x256xf32>
    %48 = arith.addf %47, %46 : vector<8x256xf32>
    %49 = arith.divf %47, %48 : vector<8x256xf32>
    %50 = vector.extract_strided_slice %49 {offsets = [0, 0], sizes = [8, 128], strides = [1, 1]} : vector<8x256xf32> to vector<8x128xf32>
    %51 = vector.extract_strided_slice %49 {offsets = [0, 128], sizes = [8, 128], strides = [1, 1]} : vector<8x256xf32> to vector<8x128xf32>
    %52 = vector.extract_strided_slice %15 {offsets = [0, 256], sizes = [8, 128], strides = [1, 1]} : vector<8x384xf32> to vector<8x128xf32>
    %53 = vector.extract_strided_slice %16 {offsets = [0, 256], sizes = [8, 128], strides = [1, 1]} : vector<8x384xf32> to vector<8x128xf32>
    %54 = vector.broadcast %6 : vector<1x128xf32> to vector<8x128xf32>
    %55 = arith.addf %53, %54 : vector<8x128xf32>
    %56 = arith.mulf %50, %55 : vector<8x128xf32>
    %57 = arith.addf %52, %56 : vector<8x128xf32>
    %58 = math.tanh %57 : vector<8x128xf32>
    %cst_18 = arith.constant 1.000000e+00 : f32
    %59 = vector.broadcast %cst_18 : f32 to vector<8x128xf32>
    %60 = arith.subf %59, %51 : vector<8x128xf32>
    %61 = arith.mulf %60, %58 : vector<8x128xf32>
    %62 = arith.mulf %51, %9 : vector<8x128xf32>
    %63 = arith.addf %61, %62 : vector<8x128xf32>
    %64 = arith.addi %7, %c0_i32_12 : i32
    %c8_i32 = arith.constant 8 : i32
    %65 = arith.cmpi slt, %64, %c8_i32 : i32
    %c1_i32 = arith.constant 1 : i32
    %66 = arith.cmpi sge, %64, %c1_i32 : i32
    %c9_i32_19 = arith.constant 9 : i32
    %67 = arith.cmpi slt, %64, %c9_i32_19 : i32
    %68 = arith.andi %66, %67 : i1
    %69 = arith.select %65, %41, %8 : vector<8x128xf32>
    %70 = arith.select %68, %63, %9 : vector<8x128xf32>
    %c1_i32_20 = arith.constant 1 : i32
    %71 = tpu.concatenate %69, %70 in 1 : vector<8x128xf32>, vector<8x128xf32> -> vector<8x256xf32>
    %cst_21 = arith.constant dense<0.000000e+00> : vector<8x1152xf32>
    %72 = tpu.matmul %71, %3, %cst_21 {dimension_numbers = #tpu.dot_dimension_numbers<[1], [0], [0], [1], [0, 0, 1, 1], [], []>} : vector<8x256xf32>, vector<256x1152xf32>, vector<8x1152xf32> -> vector<8x1152xf32>
    %73 = vector.extract_strided_slice %72 {offsets = [0, 0], sizes = [8, 384], strides = [1, 1]} : vector<8x1152xf32> to vector<8x384xf32>
    %74 = vector.extract_strided_slice %72 {offsets = [0, 384], sizes = [8, 384], strides = [1, 1]} : vector<8x1152xf32> to vector<8x384xf32>
    %75 = vector.broadcast %4 : vector<1x384xf32> to vector<8x384xf32>
    %76 = arith.addf %74, %75 : vector<8x384xf32>
    %77 = vector.extract_strided_slice %72 {offsets = [0, 768], sizes = [8, 384], strides = [1, 1]} : vector<8x1152xf32> to vector<8x384xf32>
    %78 = arith.index_cast %c1_i32_20 : i32 to index
    %c0_22 = arith.constant 0 : index
    %c0_23 = arith.constant 0 : index
    %79 = vector.load %arg1[%78, %c0_22, %c0_23] : memref<9x8x384xf32, #tpu.memory_space<vmem>>, vector<1x8x384xf32>
    %80 = vector.shape_cast %79 : vector<1x8x384xf32> to vector<8x384xf32>
    %81 = vector.extract_strided_slice %80 {offsets = [0, 0], sizes = [8, 256], strides = [1, 1]} : vector<8x384xf32> to vector<8x256xf32>
    %82 = vector.extract_strided_slice %73 {offsets = [0, 0], sizes = [8, 256], strides = [1, 1]} : vector<8x384xf32> to vector<8x256xf32>
    %83 = arith.addf %81, %82 : vector<8x256xf32>
    %84 = arith.negf %83 : vector<8x256xf32>
    %85 = math.exp %84 : vector<8x256xf32>
    %cst_24 = arith.constant 1.000000e+00 : f32
    %86 = vector.broadcast %cst_24 : f32 to vector<8x256xf32>
    %87 = arith.addf %86, %85 : vector<8x256xf32>
    %88 = arith.divf %86, %87 : vector<8x256xf32>
    %89 = vector.extract_strided_slice %88 {offsets = [0, 0], sizes = [8, 128], strides = [1, 1]} : vector<8x256xf32> to vector<8x128xf32>
    %90 = vector.extract_strided_slice %88 {offsets = [0, 128], sizes = [8, 128], strides = [1, 1]} : vector<8x256xf32> to vector<8x128xf32>
    %91 = vector.extract_strided_slice %80 {offsets = [0, 256], sizes = [8, 128], strides = [1, 1]} : vector<8x384xf32> to vector<8x128xf32>
    %92 = vector.extract_strided_slice %73 {offsets = [0, 256], sizes = [8, 128], strides = [1, 1]} : vector<8x384xf32> to vector<8x128xf32>
    %93 = vector.broadcast %5 : vector<1x128xf32> to vector<8x128xf32>
    %94 = arith.addf %92, %93 : vector<8x128xf32>
    %95 = arith.mulf %89, %94 : vector<8x128xf32>
    %96 = arith.addf %91, %95 : vector<8x128xf32>
    %97 = math.tanh %96 : vector<8x128xf32>
    %cst_25 = arith.constant 1.000000e+00 : f32
    %98 = vector.broadcast %cst_25 : f32 to vector<8x128xf32>
    %99 = arith.subf %98, %90 : vector<8x128xf32>
    %100 = arith.mulf %99, %97 : vector<8x128xf32>
    %101 = arith.mulf %90, %69 : vector<8x128xf32>
    %102 = arith.addf %100, %101 : vector<8x128xf32>
    %103 = vector.extract_strided_slice %76 {offsets = [0, 0], sizes = [8, 256], strides = [1, 1]} : vector<8x384xf32> to vector<8x256xf32>
    %104 = vector.extract_strided_slice %77 {offsets = [0, 0], sizes = [8, 256], strides = [1, 1]} : vector<8x384xf32> to vector<8x256xf32>
    %105 = arith.addf %103, %104 : vector<8x256xf32>
    %106 = arith.negf %105 : vector<8x256xf32>
    %107 = math.exp %106 : vector<8x256xf32>
    %cst_26 = arith.constant 1.000000e+00 : f32
    %108 = vector.broadcast %cst_26 : f32 to vector<8x256xf32>
    %109 = arith.addf %108, %107 : vector<8x256xf32>
    %110 = arith.divf %108, %109 : vector<8x256xf32>
    %111 = vector.extract_strided_slice %110 {offsets = [0, 0], sizes = [8, 128], strides = [1, 1]} : vector<8x256xf32> to vector<8x128xf32>
    %112 = vector.extract_strided_slice %110 {offsets = [0, 128], sizes = [8, 128], strides = [1, 1]} : vector<8x256xf32> to vector<8x128xf32>
    %113 = vector.extract_strided_slice %76 {offsets = [0, 256], sizes = [8, 128], strides = [1, 1]} : vector<8x384xf32> to vector<8x128xf32>
    %114 = vector.extract_strided_slice %77 {offsets = [0, 256], sizes = [8, 128], strides = [1, 1]} : vector<8x384xf32> to vector<8x128xf32>
    %115 = vector.broadcast %6 : vector<1x128xf32> to vector<8x128xf32>
    %116 = arith.addf %114, %115 : vector<8x128xf32>
    %117 = arith.mulf %111, %116 : vector<8x128xf32>
    %118 = arith.addf %113, %117 : vector<8x128xf32>
    %119 = math.tanh %118 : vector<8x128xf32>
    %cst_27 = arith.constant 1.000000e+00 : f32
    %120 = vector.broadcast %cst_27 : f32 to vector<8x128xf32>
    %121 = arith.subf %120, %112 : vector<8x128xf32>
    %122 = arith.mulf %121, %119 : vector<8x128xf32>
    %123 = arith.mulf %112, %70 : vector<8x128xf32>
    %124 = arith.addf %122, %123 : vector<8x128xf32>
    %125 = arith.addi %7, %c1_i32_20 : i32
    %c8_i32_28 = arith.constant 8 : i32
    %126 = arith.cmpi slt, %125, %c8_i32_28 : i32
    %c1_i32_29 = arith.constant 1 : i32
    %127 = arith.cmpi sge, %125, %c1_i32_29 : i32
    %c9_i32_30 = arith.constant 9 : i32
    %128 = arith.cmpi slt, %125, %c9_i32_30 : i32
    %129 = arith.andi %127, %128 : i1
    %130 = arith.select %126, %102, %69 : vector<8x128xf32>
    %131 = arith.select %129, %124, %70 : vector<8x128xf32>
    %c2_i32 = arith.constant 2 : i32
    %132 = tpu.concatenate %130, %131 in 1 : vector<8x128xf32>, vector<8x128xf32> -> vector<8x256xf32>
    %cst_31 = arith.constant dense<0.000000e+00> : vector<8x1152xf32>
    %133 = tpu.matmul %132, %3, %cst_31 {dimension_numbers = #tpu.dot_dimension_numbers<[1], [0], [0], [1], [0, 0, 1, 1], [], []>} : vector<8x256xf32>, vector<256x1152xf32>, vector<8x1152xf32> -> vector<8x1152xf32>
    %134 = vector.extract_strided_slice %133 {offsets = [0, 0], sizes = [8, 384], strides = [1, 1]} : vector<8x1152xf32> to vector<8x384xf32>
    %135 = vector.extract_strided_slice %133 {offsets = [0, 384], sizes = [8, 384], strides = [1, 1]} : vector<8x1152xf32> to vector<8x384xf32>
    %136 = vector.broadcast %4 : vector<1x384xf32> to vector<8x384xf32>
    %137 = arith.addf %135, %136 : vector<8x384xf32>
    %138 = vector.extract_strided_slice %133 {offsets = [0, 768], sizes = [8, 384], strides = [1, 1]} : vector<8x1152xf32> to vector<8x384xf32>
    %139 = arith.index_cast %c2_i32 : i32 to index
    %c0_32 = arith.constant 0 : index
    %c0_33 = arith.constant 0 : index
    %140 = vector.load %arg1[%139, %c0_32, %c0_33] : memref<9x8x384xf32, #tpu.memory_space<vmem>>, vector<1x8x384xf32>
    %141 = vector.shape_cast %140 : vector<1x8x384xf32> to vector<8x384xf32>
    %142 = vector.extract_strided_slice %141 {offsets = [0, 0], sizes = [8, 256], strides = [1, 1]} : vector<8x384xf32> to vector<8x256xf32>
    %143 = vector.extract_strided_slice %134 {offsets = [0, 0], sizes = [8, 256], strides = [1, 1]} : vector<8x384xf32> to vector<8x256xf32>
    %144 = arith.addf %142, %143 : vector<8x256xf32>
    %145 = arith.negf %144 : vector<8x256xf32>
    %146 = math.exp %145 : vector<8x256xf32>
    %cst_34 = arith.constant 1.000000e+00 : f32
    %147 = vector.broadcast %cst_34 : f32 to vector<8x256xf32>
    %148 = arith.addf %147, %146 : vector<8x256xf32>
    %149 = arith.divf %147, %148 : vector<8x256xf32>
    %150 = vector.extract_strided_slice %149 {offsets = [0, 0], sizes = [8, 128], strides = [1, 1]} : vector<8x256xf32> to vector<8x128xf32>
    %151 = vector.extract_strided_slice %149 {offsets = [0, 128], sizes = [8, 128], strides = [1, 1]} : vector<8x256xf32> to vector<8x128xf32>
    %152 = vector.extract_strided_slice %141 {offsets = [0, 256], sizes = [8, 128], strides = [1, 1]} : vector<8x384xf32> to vector<8x128xf32>
    %153 = vector.extract_strided_slice %134 {offsets = [0, 256], sizes = [8, 128], strides = [1, 1]} : vector<8x384xf32> to vector<8x128xf32>
    %154 = vector.broadcast %5 : vector<1x128xf32> to vector<8x128xf32>
    %155 = arith.addf %153, %154 : vector<8x128xf32>
    %156 = arith.mulf %150, %155 : vector<8x128xf32>
    %157 = arith.addf %152, %156 : vector<8x128xf32>
    %158 = math.tanh %157 : vector<8x128xf32>
    %cst_35 = arith.constant 1.000000e+00 : f32
    %159 = vector.broadcast %cst_35 : f32 to vector<8x128xf32>
    %160 = arith.subf %159, %151 : vector<8x128xf32>
    %161 = arith.mulf %160, %158 : vector<8x128xf32>
    %162 = arith.mulf %151, %130 : vector<8x128xf32>
    %163 = arith.addf %161, %162 : vector<8x128xf32>
    %164 = vector.extract_strided_slice %137 {offsets = [0, 0], sizes = [8, 256], strides = [1, 1]} : vector<8x384xf32> to vector<8x256xf32>
    %165 = vector.extract_strided_slice %138 {offsets = [0, 0], sizes = [8, 256], strides = [1, 1]} : vector<8x384xf32> to vector<8x256xf32>
    %166 = arith.addf %164, %165 : vector<8x256xf32>
    %167 = arith.negf %166 : vector<8x256xf32>
    %168 = math.exp %167 : vector<8x256xf32>
    %cst_36 = arith.constant 1.000000e+00 : f32
    %169 = vector.broadcast %cst_36 : f32 to vector<8x256xf32>
    %170 = arith.addf %169, %168 : vector<8x256xf32>
    %171 = arith.divf %169, %170 : vector<8x256xf32>
    %172 = vector.extract_strided_slice %171 {offsets = [0, 0], sizes = [8, 128], strides = [1, 1]} : vector<8x256xf32> to vector<8x128xf32>
    %173 = vector.extract_strided_slice %171 {offsets = [0, 128], sizes = [8, 128], strides = [1, 1]} : vector<8x256xf32> to vector<8x128xf32>
    %174 = vector.extract_strided_slice %137 {offsets = [0, 256], sizes = [8, 128], strides = [1, 1]} : vector<8x384xf32> to vector<8x128xf32>
    %175 = vector.extract_strided_slice %138 {offsets = [0, 256], sizes = [8, 128], strides = [1, 1]} : vector<8x384xf32> to vector<8x128xf32>
    %176 = vector.broadcast %6 : vector<1x128xf32> to vector<8x128xf32>
    %177 = arith.addf %175, %176 : vector<8x128xf32>
    %178 = arith.mulf %172, %177 : vector<8x128xf32>
    %179 = arith.addf %174, %178 : vector<8x128xf32>
    %180 = math.tanh %179 : vector<8x128xf32>
    %cst_37 = arith.constant 1.000000e+00 : f32
    %181 = vector.broadcast %cst_37 : f32 to vector<8x128xf32>
    %182 = arith.subf %181, %173 : vector<8x128xf32>
    %183 = arith.mulf %182, %180 : vector<8x128xf32>
    %184 = arith.mulf %173, %131 : vector<8x128xf32>
    %185 = arith.addf %183, %184 : vector<8x128xf32>
    %186 = arith.addi %7, %c2_i32 : i32
    %c8_i32_38 = arith.constant 8 : i32
    %187 = arith.cmpi slt, %186, %c8_i32_38 : i32
    %c1_i32_39 = arith.constant 1 : i32
    %188 = arith.cmpi sge, %186, %c1_i32_39 : i32
    %c9_i32_40 = arith.constant 9 : i32
    %189 = arith.cmpi slt, %186, %c9_i32_40 : i32
    %190 = arith.andi %188, %189 : i1
    %191 = arith.select %187, %163, %130 : vector<8x128xf32>
    %192 = arith.select %190, %185, %131 : vector<8x128xf32>
    %c3_i32 = arith.constant 3 : i32
    %193 = tpu.concatenate %191, %192 in 1 : vector<8x128xf32>, vector<8x128xf32> -> vector<8x256xf32>
    %cst_41 = arith.constant dense<0.000000e+00> : vector<8x1152xf32>
    %194 = tpu.matmul %193, %3, %cst_41 {dimension_numbers = #tpu.dot_dimension_numbers<[1], [0], [0], [1], [0, 0, 1, 1], [], []>} : vector<8x256xf32>, vector<256x1152xf32>, vector<8x1152xf32> -> vector<8x1152xf32>
    %195 = vector.extract_strided_slice %194 {offsets = [0, 0], sizes = [8, 384], strides = [1, 1]} : vector<8x1152xf32> to vector<8x384xf32>
    %196 = vector.extract_strided_slice %194 {offsets = [0, 384], sizes = [8, 384], strides = [1, 1]} : vector<8x1152xf32> to vector<8x384xf32>
    %197 = vector.broadcast %4 : vector<1x384xf32> to vector<8x384xf32>
    %198 = arith.addf %196, %197 : vector<8x384xf32>
    %199 = vector.extract_strided_slice %194 {offsets = [0, 768], sizes = [8, 384], strides = [1, 1]} : vector<8x1152xf32> to vector<8x384xf32>
    %200 = arith.index_cast %c3_i32 : i32 to index
    %c0_42 = arith.constant 0 : index
    %c0_43 = arith.constant 0 : index
    %201 = vector.load %arg1[%200, %c0_42, %c0_43] : memref<9x8x384xf32, #tpu.memory_space<vmem>>, vector<1x8x384xf32>
    %202 = vector.shape_cast %201 : vector<1x8x384xf32> to vector<8x384xf32>
    %203 = vector.extract_strided_slice %202 {offsets = [0, 0], sizes = [8, 256], strides = [1, 1]} : vector<8x384xf32> to vector<8x256xf32>
    %204 = vector.extract_strided_slice %195 {offsets = [0, 0], sizes = [8, 256], strides = [1, 1]} : vector<8x384xf32> to vector<8x256xf32>
    %205 = arith.addf %203, %204 : vector<8x256xf32>
    %206 = arith.negf %205 : vector<8x256xf32>
    %207 = math.exp %206 : vector<8x256xf32>
    %cst_44 = arith.constant 1.000000e+00 : f32
    %208 = vector.broadcast %cst_44 : f32 to vector<8x256xf32>
    %209 = arith.addf %208, %207 : vector<8x256xf32>
    %210 = arith.divf %208, %209 : vector<8x256xf32>
    %211 = vector.extract_strided_slice %210 {offsets = [0, 0], sizes = [8, 128], strides = [1, 1]} : vector<8x256xf32> to vector<8x128xf32>
    %212 = vector.extract_strided_slice %210 {offsets = [0, 128], sizes = [8, 128], strides = [1, 1]} : vector<8x256xf32> to vector<8x128xf32>
    %213 = vector.extract_strided_slice %202 {offsets = [0, 256], sizes = [8, 128], strides = [1, 1]} : vector<8x384xf32> to vector<8x128xf32>
    %214 = vector.extract_strided_slice %195 {offsets = [0, 256], sizes = [8, 128], strides = [1, 1]} : vector<8x384xf32> to vector<8x128xf32>
    %215 = vector.broadcast %5 : vector<1x128xf32> to vector<8x128xf32>
    %216 = arith.addf %214, %215 : vector<8x128xf32>
    %217 = arith.mulf %211, %216 : vector<8x128xf32>
    %218 = arith.addf %213, %217 : vector<8x128xf32>
    %219 = math.tanh %218 : vector<8x128xf32>
    %cst_45 = arith.constant 1.000000e+00 : f32
    %220 = vector.broadcast %cst_45 : f32 to vector<8x128xf32>
    %221 = arith.subf %220, %212 : vector<8x128xf32>
    %222 = arith.mulf %221, %219 : vector<8x128xf32>
    %223 = arith.mulf %212, %191 : vector<8x128xf32>
    %224 = arith.addf %222, %223 : vector<8x128xf32>
    %225 = vector.extract_strided_slice %198 {offsets = [0, 0], sizes = [8, 256], strides = [1, 1]} : vector<8x384xf32> to vector<8x256xf32>
    %226 = vector.extract_strided_slice %199 {offsets = [0, 0], sizes = [8, 256], strides = [1, 1]} : vector<8x384xf32> to vector<8x256xf32>
    %227 = arith.addf %225, %226 : vector<8x256xf32>
    %228 = arith.negf %227 : vector<8x256xf32>
    %229 = math.exp %228 : vector<8x256xf32>
    %cst_46 = arith.constant 1.000000e+00 : f32
    %230 = vector.broadcast %cst_46 : f32 to vector<8x256xf32>
    %231 = arith.addf %230, %229 : vector<8x256xf32>
    %232 = arith.divf %230, %231 : vector<8x256xf32>
    %233 = vector.extract_strided_slice %232 {offsets = [0, 0], sizes = [8, 128], strides = [1, 1]} : vector<8x256xf32> to vector<8x128xf32>
    %234 = vector.extract_strided_slice %232 {offsets = [0, 128], sizes = [8, 128], strides = [1, 1]} : vector<8x256xf32> to vector<8x128xf32>
    %235 = vector.extract_strided_slice %198 {offsets = [0, 256], sizes = [8, 128], strides = [1, 1]} : vector<8x384xf32> to vector<8x128xf32>
    %236 = vector.extract_strided_slice %199 {offsets = [0, 256], sizes = [8, 128], strides = [1, 1]} : vector<8x384xf32> to vector<8x128xf32>
    %237 = vector.broadcast %6 : vector<1x128xf32> to vector<8x128xf32>
    %238 = arith.addf %236, %237 : vector<8x128xf32>
    %239 = arith.mulf %233, %238 : vector<8x128xf32>
    %240 = arith.addf %235, %239 : vector<8x128xf32>
    %241 = math.tanh %240 : vector<8x128xf32>
    %cst_47 = arith.constant 1.000000e+00 : f32
    %242 = vector.broadcast %cst_47 : f32 to vector<8x128xf32>
    %243 = arith.subf %242, %234 : vector<8x128xf32>
    %244 = arith.mulf %243, %241 : vector<8x128xf32>
    %245 = arith.mulf %234, %192 : vector<8x128xf32>
    %246 = arith.addf %244, %245 : vector<8x128xf32>
    %247 = arith.addi %7, %c3_i32 : i32
    %c8_i32_48 = arith.constant 8 : i32
    %248 = arith.cmpi slt, %247, %c8_i32_48 : i32
    %c1_i32_49 = arith.constant 1 : i32
    %249 = arith.cmpi sge, %247, %c1_i32_49 : i32
    %c9_i32_50 = arith.constant 9 : i32
    %250 = arith.cmpi slt, %247, %c9_i32_50 : i32
    %251 = arith.andi %249, %250 : i1
    %252 = arith.select %248, %224, %191 : vector<8x128xf32>
    %253 = arith.select %251, %246, %192 : vector<8x128xf32>
    %c4_i32 = arith.constant 4 : i32
    %254 = tpu.concatenate %252, %253 in 1 : vector<8x128xf32>, vector<8x128xf32> -> vector<8x256xf32>
    %cst_51 = arith.constant dense<0.000000e+00> : vector<8x1152xf32>
    %255 = tpu.matmul %254, %3, %cst_51 {dimension_numbers = #tpu.dot_dimension_numbers<[1], [0], [0], [1], [0, 0, 1, 1], [], []>} : vector<8x256xf32>, vector<256x1152xf32>, vector<8x1152xf32> -> vector<8x1152xf32>
    %256 = vector.extract_strided_slice %255 {offsets = [0, 0], sizes = [8, 384], strides = [1, 1]} : vector<8x1152xf32> to vector<8x384xf32>
    %257 = vector.extract_strided_slice %255 {offsets = [0, 384], sizes = [8, 384], strides = [1, 1]} : vector<8x1152xf32> to vector<8x384xf32>
    %258 = vector.broadcast %4 : vector<1x384xf32> to vector<8x384xf32>
    %259 = arith.addf %257, %258 : vector<8x384xf32>
    %260 = vector.extract_strided_slice %255 {offsets = [0, 768], sizes = [8, 384], strides = [1, 1]} : vector<8x1152xf32> to vector<8x384xf32>
    %261 = arith.index_cast %c4_i32 : i32 to index
    %c0_52 = arith.constant 0 : index
    %c0_53 = arith.constant 0 : index
    %262 = vector.load %arg1[%261, %c0_52, %c0_53] : memref<9x8x384xf32, #tpu.memory_space<vmem>>, vector<1x8x384xf32>
    %263 = vector.shape_cast %262 : vector<1x8x384xf32> to vector<8x384xf32>
    %264 = vector.extract_strided_slice %263 {offsets = [0, 0], sizes = [8, 256], strides = [1, 1]} : vector<8x384xf32> to vector<8x256xf32>
    %265 = vector.extract_strided_slice %256 {offsets = [0, 0], sizes = [8, 256], strides = [1, 1]} : vector<8x384xf32> to vector<8x256xf32>
    %266 = arith.addf %264, %265 : vector<8x256xf32>
    %267 = arith.negf %266 : vector<8x256xf32>
    %268 = math.exp %267 : vector<8x256xf32>
    %cst_54 = arith.constant 1.000000e+00 : f32
    %269 = vector.broadcast %cst_54 : f32 to vector<8x256xf32>
    %270 = arith.addf %269, %268 : vector<8x256xf32>
    %271 = arith.divf %269, %270 : vector<8x256xf32>
    %272 = vector.extract_strided_slice %271 {offsets = [0, 0], sizes = [8, 128], strides = [1, 1]} : vector<8x256xf32> to vector<8x128xf32>
    %273 = vector.extract_strided_slice %271 {offsets = [0, 128], sizes = [8, 128], strides = [1, 1]} : vector<8x256xf32> to vector<8x128xf32>
    %274 = vector.extract_strided_slice %263 {offsets = [0, 256], sizes = [8, 128], strides = [1, 1]} : vector<8x384xf32> to vector<8x128xf32>
    %275 = vector.extract_strided_slice %256 {offsets = [0, 256], sizes = [8, 128], strides = [1, 1]} : vector<8x384xf32> to vector<8x128xf32>
    %276 = vector.broadcast %5 : vector<1x128xf32> to vector<8x128xf32>
    %277 = arith.addf %275, %276 : vector<8x128xf32>
    %278 = arith.mulf %272, %277 : vector<8x128xf32>
    %279 = arith.addf %274, %278 : vector<8x128xf32>
    %280 = math.tanh %279 : vector<8x128xf32>
    %cst_55 = arith.constant 1.000000e+00 : f32
    %281 = vector.broadcast %cst_55 : f32 to vector<8x128xf32>
    %282 = arith.subf %281, %273 : vector<8x128xf32>
    %283 = arith.mulf %282, %280 : vector<8x128xf32>
    %284 = arith.mulf %273, %252 : vector<8x128xf32>
    %285 = arith.addf %283, %284 : vector<8x128xf32>
    %286 = vector.extract_strided_slice %259 {offsets = [0, 0], sizes = [8, 256], strides = [1, 1]} : vector<8x384xf32> to vector<8x256xf32>
    %287 = vector.extract_strided_slice %260 {offsets = [0, 0], sizes = [8, 256], strides = [1, 1]} : vector<8x384xf32> to vector<8x256xf32>
    %288 = arith.addf %286, %287 : vector<8x256xf32>
    %289 = arith.negf %288 : vector<8x256xf32>
    %290 = math.exp %289 : vector<8x256xf32>
    %cst_56 = arith.constant 1.000000e+00 : f32
    %291 = vector.broadcast %cst_56 : f32 to vector<8x256xf32>
    %292 = arith.addf %291, %290 : vector<8x256xf32>
    %293 = arith.divf %291, %292 : vector<8x256xf32>
    %294 = vector.extract_strided_slice %293 {offsets = [0, 0], sizes = [8, 128], strides = [1, 1]} : vector<8x256xf32> to vector<8x128xf32>
    %295 = vector.extract_strided_slice %293 {offsets = [0, 128], sizes = [8, 128], strides = [1, 1]} : vector<8x256xf32> to vector<8x128xf32>
    %296 = vector.extract_strided_slice %259 {offsets = [0, 256], sizes = [8, 128], strides = [1, 1]} : vector<8x384xf32> to vector<8x128xf32>
    %297 = vector.extract_strided_slice %260 {offsets = [0, 256], sizes = [8, 128], strides = [1, 1]} : vector<8x384xf32> to vector<8x128xf32>
    %298 = vector.broadcast %6 : vector<1x128xf32> to vector<8x128xf32>
    %299 = arith.addf %297, %298 : vector<8x128xf32>
    %300 = arith.mulf %294, %299 : vector<8x128xf32>
    %301 = arith.addf %296, %300 : vector<8x128xf32>
    %302 = math.tanh %301 : vector<8x128xf32>
    %cst_57 = arith.constant 1.000000e+00 : f32
    %303 = vector.broadcast %cst_57 : f32 to vector<8x128xf32>
    %304 = arith.subf %303, %295 : vector<8x128xf32>
    %305 = arith.mulf %304, %302 : vector<8x128xf32>
    %306 = arith.mulf %295, %253 : vector<8x128xf32>
    %307 = arith.addf %305, %306 : vector<8x128xf32>
    %308 = arith.addi %7, %c4_i32 : i32
    %c8_i32_58 = arith.constant 8 : i32
    %309 = arith.cmpi slt, %308, %c8_i32_58 : i32
    %c1_i32_59 = arith.constant 1 : i32
    %310 = arith.cmpi sge, %308, %c1_i32_59 : i32
    %c9_i32_60 = arith.constant 9 : i32
    %311 = arith.cmpi slt, %308, %c9_i32_60 : i32
    %312 = arith.andi %310, %311 : i1
    %313 = arith.select %309, %285, %252 : vector<8x128xf32>
    %314 = arith.select %312, %307, %253 : vector<8x128xf32>
    %c5_i32 = arith.constant 5 : i32
    %315 = tpu.concatenate %313, %314 in 1 : vector<8x128xf32>, vector<8x128xf32> -> vector<8x256xf32>
    %cst_61 = arith.constant dense<0.000000e+00> : vector<8x1152xf32>
    %316 = tpu.matmul %315, %3, %cst_61 {dimension_numbers = #tpu.dot_dimension_numbers<[1], [0], [0], [1], [0, 0, 1, 1], [], []>} : vector<8x256xf32>, vector<256x1152xf32>, vector<8x1152xf32> -> vector<8x1152xf32>
    %317 = vector.extract_strided_slice %316 {offsets = [0, 0], sizes = [8, 384], strides = [1, 1]} : vector<8x1152xf32> to vector<8x384xf32>
    %318 = vector.extract_strided_slice %316 {offsets = [0, 384], sizes = [8, 384], strides = [1, 1]} : vector<8x1152xf32> to vector<8x384xf32>
    %319 = vector.broadcast %4 : vector<1x384xf32> to vector<8x384xf32>
    %320 = arith.addf %318, %319 : vector<8x384xf32>
    %321 = vector.extract_strided_slice %316 {offsets = [0, 768], sizes = [8, 384], strides = [1, 1]} : vector<8x1152xf32> to vector<8x384xf32>
    %322 = arith.index_cast %c5_i32 : i32 to index
    %c0_62 = arith.constant 0 : index
    %c0_63 = arith.constant 0 : index
    %323 = vector.load %arg1[%322, %c0_62, %c0_63] : memref<9x8x384xf32, #tpu.memory_space<vmem>>, vector<1x8x384xf32>
    %324 = vector.shape_cast %323 : vector<1x8x384xf32> to vector<8x384xf32>
    %325 = vector.extract_strided_slice %324 {offsets = [0, 0], sizes = [8, 256], strides = [1, 1]} : vector<8x384xf32> to vector<8x256xf32>
    %326 = vector.extract_strided_slice %317 {offsets = [0, 0], sizes = [8, 256], strides = [1, 1]} : vector<8x384xf32> to vector<8x256xf32>
    %327 = arith.addf %325, %326 : vector<8x256xf32>
    %328 = arith.negf %327 : vector<8x256xf32>
    %329 = math.exp %328 : vector<8x256xf32>
    %cst_64 = arith.constant 1.000000e+00 : f32
    %330 = vector.broadcast %cst_64 : f32 to vector<8x256xf32>
    %331 = arith.addf %330, %329 : vector<8x256xf32>
    %332 = arith.divf %330, %331 : vector<8x256xf32>
    %333 = vector.extract_strided_slice %332 {offsets = [0, 0], sizes = [8, 128], strides = [1, 1]} : vector<8x256xf32> to vector<8x128xf32>
    %334 = vector.extract_strided_slice %332 {offsets = [0, 128], sizes = [8, 128], strides = [1, 1]} : vector<8x256xf32> to vector<8x128xf32>
    %335 = vector.extract_strided_slice %324 {offsets = [0, 256], sizes = [8, 128], strides = [1, 1]} : vector<8x384xf32> to vector<8x128xf32>
    %336 = vector.extract_strided_slice %317 {offsets = [0, 256], sizes = [8, 128], strides = [1, 1]} : vector<8x384xf32> to vector<8x128xf32>
    %337 = vector.broadcast %5 : vector<1x128xf32> to vector<8x128xf32>
    %338 = arith.addf %336, %337 : vector<8x128xf32>
    %339 = arith.mulf %333, %338 : vector<8x128xf32>
    %340 = arith.addf %335, %339 : vector<8x128xf32>
    %341 = math.tanh %340 : vector<8x128xf32>
    %cst_65 = arith.constant 1.000000e+00 : f32
    %342 = vector.broadcast %cst_65 : f32 to vector<8x128xf32>
    %343 = arith.subf %342, %334 : vector<8x128xf32>
    %344 = arith.mulf %343, %341 : vector<8x128xf32>
    %345 = arith.mulf %334, %313 : vector<8x128xf32>
    %346 = arith.addf %344, %345 : vector<8x128xf32>
    %347 = vector.extract_strided_slice %320 {offsets = [0, 0], sizes = [8, 256], strides = [1, 1]} : vector<8x384xf32> to vector<8x256xf32>
    %348 = vector.extract_strided_slice %321 {offsets = [0, 0], sizes = [8, 256], strides = [1, 1]} : vector<8x384xf32> to vector<8x256xf32>
    %349 = arith.addf %347, %348 : vector<8x256xf32>
    %350 = arith.negf %349 : vector<8x256xf32>
    %351 = math.exp %350 : vector<8x256xf32>
    %cst_66 = arith.constant 1.000000e+00 : f32
    %352 = vector.broadcast %cst_66 : f32 to vector<8x256xf32>
    %353 = arith.addf %352, %351 : vector<8x256xf32>
    %354 = arith.divf %352, %353 : vector<8x256xf32>
    %355 = vector.extract_strided_slice %354 {offsets = [0, 0], sizes = [8, 128], strides = [1, 1]} : vector<8x256xf32> to vector<8x128xf32>
    %356 = vector.extract_strided_slice %354 {offsets = [0, 128], sizes = [8, 128], strides = [1, 1]} : vector<8x256xf32> to vector<8x128xf32>
    %357 = vector.extract_strided_slice %320 {offsets = [0, 256], sizes = [8, 128], strides = [1, 1]} : vector<8x384xf32> to vector<8x128xf32>
    %358 = vector.extract_strided_slice %321 {offsets = [0, 256], sizes = [8, 128], strides = [1, 1]} : vector<8x384xf32> to vector<8x128xf32>
    %359 = vector.broadcast %6 : vector<1x128xf32> to vector<8x128xf32>
    %360 = arith.addf %358, %359 : vector<8x128xf32>
    %361 = arith.mulf %355, %360 : vector<8x128xf32>
    %362 = arith.addf %357, %361 : vector<8x128xf32>
    %363 = math.tanh %362 : vector<8x128xf32>
    %cst_67 = arith.constant 1.000000e+00 : f32
    %364 = vector.broadcast %cst_67 : f32 to vector<8x128xf32>
    %365 = arith.subf %364, %356 : vector<8x128xf32>
    %366 = arith.mulf %365, %363 : vector<8x128xf32>
    %367 = arith.mulf %356, %314 : vector<8x128xf32>
    %368 = arith.addf %366, %367 : vector<8x128xf32>
    %369 = arith.addi %7, %c5_i32 : i32
    %c8_i32_68 = arith.constant 8 : i32
    %370 = arith.cmpi slt, %369, %c8_i32_68 : i32
    %c1_i32_69 = arith.constant 1 : i32
    %371 = arith.cmpi sge, %369, %c1_i32_69 : i32
    %c9_i32_70 = arith.constant 9 : i32
    %372 = arith.cmpi slt, %369, %c9_i32_70 : i32
    %373 = arith.andi %371, %372 : i1
    %374 = arith.select %370, %346, %313 : vector<8x128xf32>
    %375 = arith.select %373, %368, %314 : vector<8x128xf32>
    %c6_i32 = arith.constant 6 : i32
    %376 = tpu.concatenate %374, %375 in 1 : vector<8x128xf32>, vector<8x128xf32> -> vector<8x256xf32>
    %cst_71 = arith.constant dense<0.000000e+00> : vector<8x1152xf32>
    %377 = tpu.matmul %376, %3, %cst_71 {dimension_numbers = #tpu.dot_dimension_numbers<[1], [0], [0], [1], [0, 0, 1, 1], [], []>} : vector<8x256xf32>, vector<256x1152xf32>, vector<8x1152xf32> -> vector<8x1152xf32>
    %378 = vector.extract_strided_slice %377 {offsets = [0, 0], sizes = [8, 384], strides = [1, 1]} : vector<8x1152xf32> to vector<8x384xf32>
    %379 = vector.extract_strided_slice %377 {offsets = [0, 384], sizes = [8, 384], strides = [1, 1]} : vector<8x1152xf32> to vector<8x384xf32>
    %380 = vector.broadcast %4 : vector<1x384xf32> to vector<8x384xf32>
    %381 = arith.addf %379, %380 : vector<8x384xf32>
    %382 = vector.extract_strided_slice %377 {offsets = [0, 768], sizes = [8, 384], strides = [1, 1]} : vector<8x1152xf32> to vector<8x384xf32>
    %383 = arith.index_cast %c6_i32 : i32 to index
    %c0_72 = arith.constant 0 : index
    %c0_73 = arith.constant 0 : index
    %384 = vector.load %arg1[%383, %c0_72, %c0_73] : memref<9x8x384xf32, #tpu.memory_space<vmem>>, vector<1x8x384xf32>
    %385 = vector.shape_cast %384 : vector<1x8x384xf32> to vector<8x384xf32>
    %386 = vector.extract_strided_slice %385 {offsets = [0, 0], sizes = [8, 256], strides = [1, 1]} : vector<8x384xf32> to vector<8x256xf32>
    %387 = vector.extract_strided_slice %378 {offsets = [0, 0], sizes = [8, 256], strides = [1, 1]} : vector<8x384xf32> to vector<8x256xf32>
    %388 = arith.addf %386, %387 : vector<8x256xf32>
    %389 = arith.negf %388 : vector<8x256xf32>
    %390 = math.exp %389 : vector<8x256xf32>
    %cst_74 = arith.constant 1.000000e+00 : f32
    %391 = vector.broadcast %cst_74 : f32 to vector<8x256xf32>
    %392 = arith.addf %391, %390 : vector<8x256xf32>
    %393 = arith.divf %391, %392 : vector<8x256xf32>
    %394 = vector.extract_strided_slice %393 {offsets = [0, 0], sizes = [8, 128], strides = [1, 1]} : vector<8x256xf32> to vector<8x128xf32>
    %395 = vector.extract_strided_slice %393 {offsets = [0, 128], sizes = [8, 128], strides = [1, 1]} : vector<8x256xf32> to vector<8x128xf32>
    %396 = vector.extract_strided_slice %385 {offsets = [0, 256], sizes = [8, 128], strides = [1, 1]} : vector<8x384xf32> to vector<8x128xf32>
    %397 = vector.extract_strided_slice %378 {offsets = [0, 256], sizes = [8, 128], strides = [1, 1]} : vector<8x384xf32> to vector<8x128xf32>
    %398 = vector.broadcast %5 : vector<1x128xf32> to vector<8x128xf32>
    %399 = arith.addf %397, %398 : vector<8x128xf32>
    %400 = arith.mulf %394, %399 : vector<8x128xf32>
    %401 = arith.addf %396, %400 : vector<8x128xf32>
    %402 = math.tanh %401 : vector<8x128xf32>
    %cst_75 = arith.constant 1.000000e+00 : f32
    %403 = vector.broadcast %cst_75 : f32 to vector<8x128xf32>
    %404 = arith.subf %403, %395 : vector<8x128xf32>
    %405 = arith.mulf %404, %402 : vector<8x128xf32>
    %406 = arith.mulf %395, %374 : vector<8x128xf32>
    %407 = arith.addf %405, %406 : vector<8x128xf32>
    %408 = vector.extract_strided_slice %381 {offsets = [0, 0], sizes = [8, 256], strides = [1, 1]} : vector<8x384xf32> to vector<8x256xf32>
    %409 = vector.extract_strided_slice %382 {offsets = [0, 0], sizes = [8, 256], strides = [1, 1]} : vector<8x384xf32> to vector<8x256xf32>
    %410 = arith.addf %408, %409 : vector<8x256xf32>
    %411 = arith.negf %410 : vector<8x256xf32>
    %412 = math.exp %411 : vector<8x256xf32>
    %cst_76 = arith.constant 1.000000e+00 : f32
    %413 = vector.broadcast %cst_76 : f32 to vector<8x256xf32>
    %414 = arith.addf %413, %412 : vector<8x256xf32>
    %415 = arith.divf %413, %414 : vector<8x256xf32>
    %416 = vector.extract_strided_slice %415 {offsets = [0, 0], sizes = [8, 128], strides = [1, 1]} : vector<8x256xf32> to vector<8x128xf32>
    %417 = vector.extract_strided_slice %415 {offsets = [0, 128], sizes = [8, 128], strides = [1, 1]} : vector<8x256xf32> to vector<8x128xf32>
    %418 = vector.extract_strided_slice %381 {offsets = [0, 256], sizes = [8, 128], strides = [1, 1]} : vector<8x384xf32> to vector<8x128xf32>
    %419 = vector.extract_strided_slice %382 {offsets = [0, 256], sizes = [8, 128], strides = [1, 1]} : vector<8x384xf32> to vector<8x128xf32>
    %420 = vector.broadcast %6 : vector<1x128xf32> to vector<8x128xf32>
    %421 = arith.addf %419, %420 : vector<8x128xf32>
    %422 = arith.mulf %416, %421 : vector<8x128xf32>
    %423 = arith.addf %418, %422 : vector<8x128xf32>
    %424 = math.tanh %423 : vector<8x128xf32>
    %cst_77 = arith.constant 1.000000e+00 : f32
    %425 = vector.broadcast %cst_77 : f32 to vector<8x128xf32>
    %426 = arith.subf %425, %417 : vector<8x128xf32>
    %427 = arith.mulf %426, %424 : vector<8x128xf32>
    %428 = arith.mulf %417, %375 : vector<8x128xf32>
    %429 = arith.addf %427, %428 : vector<8x128xf32>
    %430 = arith.addi %7, %c6_i32 : i32
    %c8_i32_78 = arith.constant 8 : i32
    %431 = arith.cmpi slt, %430, %c8_i32_78 : i32
    %c1_i32_79 = arith.constant 1 : i32
    %432 = arith.cmpi sge, %430, %c1_i32_79 : i32
    %c9_i32_80 = arith.constant 9 : i32
    %433 = arith.cmpi slt, %430, %c9_i32_80 : i32
    %434 = arith.andi %432, %433 : i1
    %435 = arith.select %431, %407, %374 : vector<8x128xf32>
    %436 = arith.select %434, %429, %375 : vector<8x128xf32>
    %c7_i32 = arith.constant 7 : i32
    %437 = tpu.concatenate %435, %436 in 1 : vector<8x128xf32>, vector<8x128xf32> -> vector<8x256xf32>
    %cst_81 = arith.constant dense<0.000000e+00> : vector<8x1152xf32>
    %438 = tpu.matmul %437, %3, %cst_81 {dimension_numbers = #tpu.dot_dimension_numbers<[1], [0], [0], [1], [0, 0, 1, 1], [], []>} : vector<8x256xf32>, vector<256x1152xf32>, vector<8x1152xf32> -> vector<8x1152xf32>
    %439 = vector.extract_strided_slice %438 {offsets = [0, 0], sizes = [8, 384], strides = [1, 1]} : vector<8x1152xf32> to vector<8x384xf32>
    %440 = vector.extract_strided_slice %438 {offsets = [0, 384], sizes = [8, 384], strides = [1, 1]} : vector<8x1152xf32> to vector<8x384xf32>
    %441 = vector.broadcast %4 : vector<1x384xf32> to vector<8x384xf32>
    %442 = arith.addf %440, %441 : vector<8x384xf32>
    %443 = vector.extract_strided_slice %438 {offsets = [0, 768], sizes = [8, 384], strides = [1, 1]} : vector<8x1152xf32> to vector<8x384xf32>
    %444 = arith.index_cast %c7_i32 : i32 to index
    %c0_82 = arith.constant 0 : index
    %c0_83 = arith.constant 0 : index
    %445 = vector.load %arg1[%444, %c0_82, %c0_83] : memref<9x8x384xf32, #tpu.memory_space<vmem>>, vector<1x8x384xf32>
    %446 = vector.shape_cast %445 : vector<1x8x384xf32> to vector<8x384xf32>
    %447 = vector.extract_strided_slice %446 {offsets = [0, 0], sizes = [8, 256], strides = [1, 1]} : vector<8x384xf32> to vector<8x256xf32>
    %448 = vector.extract_strided_slice %439 {offsets = [0, 0], sizes = [8, 256], strides = [1, 1]} : vector<8x384xf32> to vector<8x256xf32>
    %449 = arith.addf %447, %448 : vector<8x256xf32>
    %450 = arith.negf %449 : vector<8x256xf32>
    %451 = math.exp %450 : vector<8x256xf32>
    %cst_84 = arith.constant 1.000000e+00 : f32
    %452 = vector.broadcast %cst_84 : f32 to vector<8x256xf32>
    %453 = arith.addf %452, %451 : vector<8x256xf32>
    %454 = arith.divf %452, %453 : vector<8x256xf32>
    %455 = vector.extract_strided_slice %454 {offsets = [0, 0], sizes = [8, 128], strides = [1, 1]} : vector<8x256xf32> to vector<8x128xf32>
    %456 = vector.extract_strided_slice %454 {offsets = [0, 128], sizes = [8, 128], strides = [1, 1]} : vector<8x256xf32> to vector<8x128xf32>
    %457 = vector.extract_strided_slice %446 {offsets = [0, 256], sizes = [8, 128], strides = [1, 1]} : vector<8x384xf32> to vector<8x128xf32>
    %458 = vector.extract_strided_slice %439 {offsets = [0, 256], sizes = [8, 128], strides = [1, 1]} : vector<8x384xf32> to vector<8x128xf32>
    %459 = vector.broadcast %5 : vector<1x128xf32> to vector<8x128xf32>
    %460 = arith.addf %458, %459 : vector<8x128xf32>
    %461 = arith.mulf %455, %460 : vector<8x128xf32>
    %462 = arith.addf %457, %461 : vector<8x128xf32>
    %463 = math.tanh %462 : vector<8x128xf32>
    %cst_85 = arith.constant 1.000000e+00 : f32
    %464 = vector.broadcast %cst_85 : f32 to vector<8x128xf32>
    %465 = arith.subf %464, %456 : vector<8x128xf32>
    %466 = arith.mulf %465, %463 : vector<8x128xf32>
    %467 = arith.mulf %456, %435 : vector<8x128xf32>
    %468 = arith.addf %466, %467 : vector<8x128xf32>
    %469 = vector.extract_strided_slice %442 {offsets = [0, 0], sizes = [8, 256], strides = [1, 1]} : vector<8x384xf32> to vector<8x256xf32>
    %470 = vector.extract_strided_slice %443 {offsets = [0, 0], sizes = [8, 256], strides = [1, 1]} : vector<8x384xf32> to vector<8x256xf32>
    %471 = arith.addf %469, %470 : vector<8x256xf32>
    %472 = arith.negf %471 : vector<8x256xf32>
    %473 = math.exp %472 : vector<8x256xf32>
    %cst_86 = arith.constant 1.000000e+00 : f32
    %474 = vector.broadcast %cst_86 : f32 to vector<8x256xf32>
    %475 = arith.addf %474, %473 : vector<8x256xf32>
    %476 = arith.divf %474, %475 : vector<8x256xf32>
    %477 = vector.extract_strided_slice %476 {offsets = [0, 0], sizes = [8, 128], strides = [1, 1]} : vector<8x256xf32> to vector<8x128xf32>
    %478 = vector.extract_strided_slice %476 {offsets = [0, 128], sizes = [8, 128], strides = [1, 1]} : vector<8x256xf32> to vector<8x128xf32>
    %479 = vector.extract_strided_slice %442 {offsets = [0, 256], sizes = [8, 128], strides = [1, 1]} : vector<8x384xf32> to vector<8x128xf32>
    %480 = vector.extract_strided_slice %443 {offsets = [0, 256], sizes = [8, 128], strides = [1, 1]} : vector<8x384xf32> to vector<8x128xf32>
    %481 = vector.broadcast %6 : vector<1x128xf32> to vector<8x128xf32>
    %482 = arith.addf %480, %481 : vector<8x128xf32>
    %483 = arith.mulf %477, %482 : vector<8x128xf32>
    %484 = arith.addf %479, %483 : vector<8x128xf32>
    %485 = math.tanh %484 : vector<8x128xf32>
    %cst_87 = arith.constant 1.000000e+00 : f32
    %486 = vector.broadcast %cst_87 : f32 to vector<8x128xf32>
    %487 = arith.subf %486, %478 : vector<8x128xf32>
    %488 = arith.mulf %487, %485 : vector<8x128xf32>
    %489 = arith.mulf %478, %436 : vector<8x128xf32>
    %490 = arith.addf %488, %489 : vector<8x128xf32>
    %491 = arith.addi %7, %c7_i32 : i32
    %c8_i32_88 = arith.constant 8 : i32
    %492 = arith.cmpi slt, %491, %c8_i32_88 : i32
    %c1_i32_89 = arith.constant 1 : i32
    %493 = arith.cmpi sge, %491, %c1_i32_89 : i32
    %c9_i32_90 = arith.constant 9 : i32
    %494 = arith.cmpi slt, %491, %c9_i32_90 : i32
    %495 = arith.andi %493, %494 : i1
    %496 = arith.select %492, %468, %435 : vector<8x128xf32>
    %497 = arith.select %495, %490, %436 : vector<8x128xf32>
    %c8_i32_91 = arith.constant 8 : i32
    %498 = tpu.concatenate %496, %497 in 1 : vector<8x128xf32>, vector<8x128xf32> -> vector<8x256xf32>
    %cst_92 = arith.constant dense<0.000000e+00> : vector<8x1152xf32>
    %499 = tpu.matmul %498, %3, %cst_92 {dimension_numbers = #tpu.dot_dimension_numbers<[1], [0], [0], [1], [0, 0, 1, 1], [], []>} : vector<8x256xf32>, vector<256x1152xf32>, vector<8x1152xf32> -> vector<8x1152xf32>
    %500 = vector.extract_strided_slice %499 {offsets = [0, 0], sizes = [8, 384], strides = [1, 1]} : vector<8x1152xf32> to vector<8x384xf32>
    %501 = vector.extract_strided_slice %499 {offsets = [0, 384], sizes = [8, 384], strides = [1, 1]} : vector<8x1152xf32> to vector<8x384xf32>
    %502 = vector.broadcast %4 : vector<1x384xf32> to vector<8x384xf32>
    %503 = arith.addf %501, %502 : vector<8x384xf32>
    %504 = vector.extract_strided_slice %499 {offsets = [0, 768], sizes = [8, 384], strides = [1, 1]} : vector<8x1152xf32> to vector<8x384xf32>
    %505 = arith.index_cast %c8_i32_91 : i32 to index
    %c0_93 = arith.constant 0 : index
    %c0_94 = arith.constant 0 : index
    %506 = vector.load %arg1[%505, %c0_93, %c0_94] : memref<9x8x384xf32, #tpu.memory_space<vmem>>, vector<1x8x384xf32>
    %507 = vector.shape_cast %506 : vector<1x8x384xf32> to vector<8x384xf32>
    %508 = vector.extract_strided_slice %507 {offsets = [0, 0], sizes = [8, 256], strides = [1, 1]} : vector<8x384xf32> to vector<8x256xf32>
    %509 = vector.extract_strided_slice %500 {offsets = [0, 0], sizes = [8, 256], strides = [1, 1]} : vector<8x384xf32> to vector<8x256xf32>
    %510 = arith.addf %508, %509 : vector<8x256xf32>
    %511 = arith.negf %510 : vector<8x256xf32>
    %512 = math.exp %511 : vector<8x256xf32>
    %cst_95 = arith.constant 1.000000e+00 : f32
    %513 = vector.broadcast %cst_95 : f32 to vector<8x256xf32>
    %514 = arith.addf %513, %512 : vector<8x256xf32>
    %515 = arith.divf %513, %514 : vector<8x256xf32>
    %516 = vector.extract_strided_slice %515 {offsets = [0, 0], sizes = [8, 128], strides = [1, 1]} : vector<8x256xf32> to vector<8x128xf32>
    %517 = vector.extract_strided_slice %515 {offsets = [0, 128], sizes = [8, 128], strides = [1, 1]} : vector<8x256xf32> to vector<8x128xf32>
    %518 = vector.extract_strided_slice %507 {offsets = [0, 256], sizes = [8, 128], strides = [1, 1]} : vector<8x384xf32> to vector<8x128xf32>
    %519 = vector.extract_strided_slice %500 {offsets = [0, 256], sizes = [8, 128], strides = [1, 1]} : vector<8x384xf32> to vector<8x128xf32>
    %520 = vector.broadcast %5 : vector<1x128xf32> to vector<8x128xf32>
    %521 = arith.addf %519, %520 : vector<8x128xf32>
    %522 = arith.mulf %516, %521 : vector<8x128xf32>
    %523 = arith.addf %518, %522 : vector<8x128xf32>
    %524 = math.tanh %523 : vector<8x128xf32>
    %cst_96 = arith.constant 1.000000e+00 : f32
    %525 = vector.broadcast %cst_96 : f32 to vector<8x128xf32>
    %526 = arith.subf %525, %517 : vector<8x128xf32>
    %527 = arith.mulf %526, %524 : vector<8x128xf32>
    %528 = arith.mulf %517, %496 : vector<8x128xf32>
    %529 = arith.addf %527, %528 : vector<8x128xf32>
    %530 = vector.extract_strided_slice %503 {offsets = [0, 0], sizes = [8, 256], strides = [1, 1]} : vector<8x384xf32> to vector<8x256xf32>
    %531 = vector.extract_strided_slice %504 {offsets = [0, 0], sizes = [8, 256], strides = [1, 1]} : vector<8x384xf32> to vector<8x256xf32>
    %532 = arith.addf %530, %531 : vector<8x256xf32>
    %533 = arith.negf %532 : vector<8x256xf32>
    %534 = math.exp %533 : vector<8x256xf32>
    %cst_97 = arith.constant 1.000000e+00 : f32
    %535 = vector.broadcast %cst_97 : f32 to vector<8x256xf32>
    %536 = arith.addf %535, %534 : vector<8x256xf32>
    %537 = arith.divf %535, %536 : vector<8x256xf32>
    %538 = vector.extract_strided_slice %537 {offsets = [0, 0], sizes = [8, 128], strides = [1, 1]} : vector<8x256xf32> to vector<8x128xf32>
    %539 = vector.extract_strided_slice %537 {offsets = [0, 128], sizes = [8, 128], strides = [1, 1]} : vector<8x256xf32> to vector<8x128xf32>
    %540 = vector.extract_strided_slice %503 {offsets = [0, 256], sizes = [8, 128], strides = [1, 1]} : vector<8x384xf32> to vector<8x128xf32>
    %541 = vector.extract_strided_slice %504 {offsets = [0, 256], sizes = [8, 128], strides = [1, 1]} : vector<8x384xf32> to vector<8x128xf32>
    %542 = vector.broadcast %6 : vector<1x128xf32> to vector<8x128xf32>
    %543 = arith.addf %541, %542 : vector<8x128xf32>
    %544 = arith.mulf %538, %543 : vector<8x128xf32>
    %545 = arith.addf %540, %544 : vector<8x128xf32>
    %546 = math.tanh %545 : vector<8x128xf32>
    %cst_98 = arith.constant 1.000000e+00 : f32
    %547 = vector.broadcast %cst_98 : f32 to vector<8x128xf32>
    %548 = arith.subf %547, %539 : vector<8x128xf32>
    %549 = arith.mulf %548, %546 : vector<8x128xf32>
    %550 = arith.mulf %539, %497 : vector<8x128xf32>
    %551 = arith.addf %549, %550 : vector<8x128xf32>
    %552 = arith.addi %7, %c8_i32_91 : i32
    %c8_i32_99 = arith.constant 8 : i32
    %553 = arith.cmpi slt, %552, %c8_i32_99 : i32
    %c1_i32_100 = arith.constant 1 : i32
    %554 = arith.cmpi sge, %552, %c1_i32_100 : i32
    %c9_i32_101 = arith.constant 9 : i32
    %555 = arith.cmpi slt, %552, %c9_i32_101 : i32
    %556 = arith.andi %554, %555 : i1
    %557 = arith.select %553, %529, %496 : vector<8x128xf32>
    %558 = arith.select %556, %551, %497 : vector<8x128xf32>
    %c9_i32_102 = arith.constant 9 : i32
    %c0_103 = arith.constant 0 : index
    %c0_104 = arith.constant 0 : index
    %559 = vector.load %arg7[%c0_103, %c0_104] : memref<8x128xf32, #tpu.memory_space<vmem>>, vector<8x128xf32>
    tpu.vector_store %arg7[%c0_103, %c0_104], %557 {strides = array<i32>} : memref<8x128xf32, #tpu.memory_space<vmem>>, vector<8x128xf32>,
    %c0_105 = arith.constant 0 : index
    %c0_106 = arith.constant 0 : index
    %560 = vector.load %arg8[%c0_105, %c0_106] : memref<8x128xf32, #tpu.memory_space<vmem>>, vector<8x128xf32>
    tpu.vector_store %arg8[%c0_105, %c0_106], %558 {strides = array<i32>} : memref<8x128xf32, #tpu.memory_space<vmem>>, vector<8x128xf32>,
    %c0_107 = arith.constant 0 : index
    %c0_108 = arith.constant 0 : index
    %561 = vector.load %arg8[%c0_107, %c0_108] : memref<8x128xf32, #tpu.memory_space<vmem>>, vector<8x128xf32>
    %c0_109 = arith.constant 0 : index
    %c0_110 = arith.constant 0 : index
    %562 = vector.load %arg6[%c0_109, %c0_110] : memref<8x128xf32, #tpu.memory_space<vmem>>, vector<8x128xf32>
    tpu.vector_store %arg6[%c0_109, %c0_110], %561 {strides = array<i32>} : memref<8x128xf32, #tpu.memory_space<vmem>>, vector<8x128xf32>,
    return
  }
  func.func @transform_0(%arg0: i32) -> (i32, i32, i32) {
    %c0_i32 = arith.constant 0 : i32
    %c0_i32_0 = arith.constant 0 : i32
    %c0_i32_1 = arith.constant 0 : i32
    return %arg0, %c0_i32, %c0_i32_0 : i32, i32, i32
  }
  func.func @transform_1(%arg0: i32) -> (i32, i32) {
    %c0_i32 = arith.constant 0 : i32
    %c0_i32_0 = arith.constant 0 : i32
    %c0_i32_1 = arith.constant 0 : i32
    return %c0_i32, %c0_i32_0 : i32, i32
  }
  func.func @transform_2(%arg0: i32) -> (i32, i32) {
    %c0_i32 = arith.constant 0 : i32
    %c0_i32_0 = arith.constant 0 : i32
    %c0_i32_1 = arith.constant 0 : i32
    return %c0_i32, %c0_i32_0 : i32, i32
  }
  func.func @transform_3(%arg0: i32) -> (i32, i32) {
    %c0_i32 = arith.constant 0 : i32
    %c0_i32_0 = arith.constant 0 : i32
    %c0_i32_1 = arith.constant 0 : i32
    return %c0_i32, %c0_i32_0 : i32, i32
  }
  func.func @transform_4(%arg0: i32) -> (i32, i32) {
    %c0_i32 = arith.constant 0 : i32
    %c0_i32_0 = arith.constant 0 : i32
    %c0_i32_1 = arith.constant 0 : i32
    return %c0_i32, %c0_i32_0 : i32, i32
  }
  func.func @transform_5(%arg0: i32) -> (i32, i32) {
    %c0_i32 = arith.constant 0 : i32
    %c0_i32_0 = arith.constant 0 : i32
    %c0_i32_1 = arith.constant 0 : i32
    return %c0_i32, %c0_i32_0 : i32, i32
  }
}

</mosaic_0001>

<bundles_post_ra>
// kernel: tpu_custom_call.1
= control target key start
LH: loop header
LB: loop body
LE: loop exit
PB: predicated region body
PF: predicated region fallthrough
CT: control target
= control target key end

     0   :  { %10 = vsyncpa [#allocation5], 0  ;;  %s9350_s0 = inlined_call_operand.hbm [shape: f32[9,8,384], index: 0, kind: input, shape index: {}]   ;;  %s9351_s1 = inlined_call_operand.hbm [shape: f32[256,1152], index: 1, kind: input, shape index: {}]   ;;  %s9352_s2 = inlined_call_operand.hbm [shape: f32[1,384], index: 2, kind: input, shape index: {}]   ;;  %s9353_s3 = inlined_call_operand.hbm [shape: f32[1,128], index: 3, kind: input, shape index: {}]   ;;  %s9354_s4 = inlined_call_operand.hbm [shape: f32[1,128], index: 4, kind: input, shape index: {}]   ;;  %s9355_s5 = inlined_call_operand.hbm [shape: f32[8,128], index: 5, kind: output, shape index: {}]  }
   0x1   :  { %11 = vsyncpa [#allocation8], 0 }
   0x2   :  { %12 = vsyncpa [#allocation11], 0 }
   0x3   :  { %13 = vsyncpa [#allocation6], 0  ;;  %s7461_s18 = smov [#allocation7]   ;;  %s7321_s22 = scalar_lea.hbm %s9351_s1, 36864 }
   0x4   :  { %s31_s19 = sshll.u32 %s7461_s18, 4  ;;  %p7322_p0 = scmp.ne.s32.totalorder %s9351_s1, %s7321_s22  ;;  %s32_s19 = int_to_ptr.vmem [resolvable:$true] %s31_s19 }
   0x5   :  { %p7325_p1 = scmp.lt.u32.totalorder %s7321_s22, %s9351_s1 }
   0x7   :  { %p7327_p2 = pnand %p7325_p1, %p7322_p0 }
   0x9   :  { %7330 = shalt.err (!%p7327_p2)
}
   0xa   :  { %s7331_s27 = scalar_lea.vmem %s32_s19, 36864  ;;  %p7336_p4 = scmp.lt.s32.totalorder %s32_s19, %s32_s19 }
   0xb   :  { %p7332_p3 = scmp.ne.s32.totalorder %s32_s19, %s7331_s27  ;;  %p7337_p5 = scmp.lt.s32.totalorder %s7331_s27, %s7331_s27 }
   0xd   :  { %p7338_p6 = por %p7337_p5, %p7336_p4 }
   0xf   :  { %p7339_p7 = pnand %p7338_p6, %p7332_p3 }
  0x11   :  { %7342 = shalt.err (!%p7339_p7)
}
  0x12   :  { %s7462_s28 = smov 1152   ;;  %s7463_s29 = smov 72  }
  0x13   :  { %37 = dma.hbm_to_vmem [thread:$0]  %s9351_s1, 36864, %s32_s19, [#allocation8], %s7462_s28, %s7462_s28, %s7463_s29  }
  0x14   :  { %s7464_s7 = smov [#allocation10]   ;;  %s7465_s9 = smov [#allocation4]  }
  0x15   :  { %s54_s8 = sshll.u32 %s7464_s7, 4  ;;  %s19_s10 = sshll.u32 %s7465_s9, 4  ;;  %s55_s8 = int_to_ptr.vmem [resolvable:$true] %s54_s8  ;;  %s20_s10 = int_to_ptr.vmem [resolvable:$true] %s19_s10 }
  0x16   :  { %s7343_s13 = scalar_lea.hbm %s9353_s3, 16 }
  0x17   :  { %p7344_p8 = scmp.ne.s32.totalorder %s9353_s3, %s7343_s13  ;;  %p7347_p9 = scmp.lt.u32.totalorder %s7343_s13, %s9353_s3 }
  0x19   :  { %p7349_p10 = pnand %p7347_p9, %p7344_p8 }
  0x1b   :  { %7352 = shalt.err (!%p7349_p10)
}
  0x1c   :  { %s7353_s1 = scalar_lea.vmem %s55_s8, 16  ;;  %s7357_s18 = scalar_lea.vmem %s55_s8, 32 }
  0x1d   :  { %p7354_p11 = scmp.ne.s32.totalorder %s55_s8, %s7353_s1  ;;  %p7358_p12 = scmp.lt.s32.totalorder %s55_s8, %s55_s8 }
  0x1e   :  { %p7359_p13 = scmp.lt.s32.totalorder %s7357_s18, %s7353_s1 }
  0x20   :  { %p7360_p0 = por %p7359_p13, %p7358_p12 }
  0x22   :  { %p7361_p1 = pnand %p7360_p0, %p7354_p11 }
  0x24   :  { %7364 = shalt.err (!%p7361_p1)
}
  0x25   :  { %57 = dma.hbm_to_vmem [thread:$0]  %s9353_s3, 16, %s55_s8, [#allocation11]  }
  0x26   :  { %s7365_s23 = scalar_lea.hbm %s9350_s0, 3456 }
  0x27   :  { %p7366_p2 = scmp.ne.s32.totalorder %s9350_s0, %s7365_s23  ;;  %p7369_p3 = scmp.lt.u32.totalorder %s7365_s23, %s9350_s0 }
  0x29   :  { %p7371_p4 = pnand %p7369_p3, %p7366_p2 }
  0x2b   :  { %7374 = shalt.err (!%p7371_p4)
}
  0x2c   :  { %s7375_s28 = scalar_lea.vmem %s20_s10, 3456  ;;  %p7380_p6 = scmp.lt.s32.totalorder %s20_s10, %s20_s10 }
  0x2d   :  { %p7376_p5 = scmp.ne.s32.totalorder %s20_s10, %s7375_s28  ;;  %p7381_p7 = scmp.lt.s32.totalorder %s7375_s28, %s7375_s28 }
  0x2f   :  { %p7382_p8 = por %p7381_p7, %p7380_p6 }
  0x31   :  { %p7383_p9 = pnand %p7382_p8, %p7376_p5 }
  0x33   :  { %7386 = shalt.err (!%p7383_p9)
}
  0x34   :  { %s7466_s3 = smov 384   ;;  %s7467_s29 = smov 24  }
  0x35   :  { %25 = dma.hbm_to_vmem [thread:$0]  %s9350_s0, 3456, %s20_s10, [#allocation5], %s7466_s3, %s7466_s3, %s7467_s29  }
  0x36   :  { %s7468_s7 = smov [#allocation9]   ;;  %s7469_s9 = smov [#allocation12]  }
  0x37   :  { %s44_s8 = sshll.u32 %s7468_s7, 4  ;;  %s64_s11 = sshll.u32 %s7469_s9, 4  ;;  %s45_s8 = int_to_ptr.vmem [resolvable:$true] %s44_s8  ;;  %s65_s11 = int_to_ptr.vmem [resolvable:$true] %s64_s11 }
  0x38   :  { %s7387_s14 = scalar_lea.hbm %s9352_s2, 48 }
  0x39   :  { %p7388_p10 = scmp.ne.s32.totalorder %s9352_s2, %s7387_s14  ;;  %p7391_p11 = scmp.lt.u32.totalorder %s7387_s14, %s9352_s2 }
  0x3b   :  { %p7393_p12 = pnand %p7391_p11, %p7388_p10 }
  0x3d   :  { %7396 = shalt.err (!%p7393_p12)
}
  0x3e   :  { %s7397_s0 = scalar_lea.vmem %s45_s8, 48  ;;  %s7401_s10 = scalar_lea.vmem %s45_s8, 64 }
  0x3f   :  { %p7398_p13 = scmp.ne.s32.totalorder %s45_s8, %s7397_s0  ;;  %p7402_p0 = scmp.lt.s32.totalorder %s45_s8, %s45_s8 }
  0x40   :  { %p7403_p1 = scmp.lt.s32.totalorder %s7401_s10, %s7397_s0 }
  0x42   :  { %p7404_p2 = por %p7403_p1, %p7402_p0 }
  0x44   :  { %p7405_p3 = pnand %p7404_p2, %p7398_p13 }
  0x46   :  { %7408 = shalt.err (!%p7405_p3)
}
  0x47   :  { %47 = dma.hbm_to_vmem [thread:$0]  %s9352_s2, 48, %s45_s8, [#allocation8]  }
  0x48   :  { %s7409_s22 = scalar_lea.hbm %s9354_s4, 16 }
  0x49   :  { %p7410_p4 = scmp.ne.s32.totalorder %s9354_s4, %s7409_s22  ;;  %p7413_p5 = scmp.lt.u32.totalorder %s7409_s22, %s9354_s4 }
  0x4b   :  { %p7415_p6 = pnand %p7413_p5, %p7410_p4 }
  0x4d   :  { %7418 = shalt.err (!%p7415_p6)
}
  0x4e   :  { %s7419_s27 = scalar_lea.vmem %s65_s11, 16  ;;  %s7423_s28 = scalar_lea.vmem %s65_s11, 32 }
  0x4f   :  { %p7420_p7 = scmp.ne.s32.totalorder %s65_s11, %s7419_s27  ;;  %p7424_p8 = scmp.lt.s32.totalorder %s65_s11, %s65_s11 }
  0x50   :  { %p7425_p9 = scmp.lt.s32.totalorder %s7423_s28, %s7419_s27 }
  0x52   :  { %p7426_p10 = por %p7425_p9, %p7424_p8 }
  0x54   :  { %p7427_p11 = pnand %p7426_p10, %p7420_p7 }
  0x56   :  { %7430 = shalt.err (!%p7427_p11)
}
  0x57   :  { %67 = dma.hbm_to_vmem [thread:$0]  %s9354_s4, 16, %s65_s11, [#allocation11]  }
  0x58   :  { %7453 = dma.done.wait [#allocation5], 3456  }
  0x59   :  { %7454 = vsyncadd [#allocation5], 4294963840 }
  0x5a   :  { %7455 = dma.done.wait [#allocation8], 36912  }
  0x5b   :  { %7456 = vsyncadd [#allocation8], 4294930384 }
  0x5c   :  { %7457 = dma.done.wait [#allocation11], 32  }
  0x5d   :  { %7458 = vsyncadd [#allocation11], 4294967264  ;;  %v9356_v0 = vmov 0.0   ;;  %v90_v1 = vld [vmem:[#allocation7 + $0x8] sm:$0xff]  ;;  %v99_v2 = vld [vmem:[#allocation7 + $0x50] sm:$0xff]  ;;  %s7471_s4 = smov [#allocation13]  }
  0x5e   :  { %447 = vmatprep.mubr.f32.mxu0 %v9356_v0  ;;  %518 = vmatprep.mubr.f32.mxu1 %v9356_v0  ;;  %v89_v3 = vld [vmem:[#allocation7] sm:$0xff]  ;;  %v7564_v4 = vpack.c.bf16 %v99_v2, %v90_v1  ;;  %v98_v5 = vld [vmem:[#allocation7 + $0x48] sm:$0xff]  ;;  %v108_v6 = vld [vmem:[#allocation7 + $0x98] sm:$0xff]  ;;  %s4190_s29 = sshll.u32 %s7471_s4, 4  ;;  %s4191_s29 = int_to_ptr.vmem [resolvable:$true] %s4190_s29 }
  0x5f   :  { %v117_v7 = vld [vmem:[#allocation7 + $0xe0] sm:$0xff]  ;;  %v7566_v8 = vpack.c.bf16 %v98_v5, %v89_v3  ;;  %v107_v10 = vld [vmem:[#allocation7 + $0x90] sm:$0xff]  ;;  %v116_v11 = vld [vmem:[#allocation7 + $0xd8] sm:$0xff]  ;;  %s7431_s30 = scalar_lea.vmem %s4191_s29, 128  ;;  %p7436_p13 = scmp.lt.s32.totalorder %s4191_s29, %s4191_s29 }
  0x60   :  { %9684 = vst [vmem:[#allocation18_spill] sm:$0xff] %v7564_v4  ;;  %v7568_v9 = vpack.c.bf16 %v117_v7, %v108_v6  ;;  %v126_v12 = vld [vmem:[#allocation7 + $0x128] sm:$0xff]  ;;  %4555 = vmatprep.subr.bf16.mxu0 %v7564_v4  ;;  %v135_v13 = vld [vmem:[#allocation7 + $0x170] sm:$0xff]  ;;  %v7572_v14 = vpack.c.bf16 %v116_v11, %v107_v10  ;;  %v125_v16 = vld [vmem:[#allocation7 + $0x120] sm:$0xff]  ;;  %p7432_p12 = scmp.ne.s32.totalorder %s4191_s29, %s7431_s30  ;;  %p7437_p0 = scmp.lt.s32.totalorder %s7431_s30, %s7431_s30 }
  0x61   :  { %9685 = vst [vmem:[#allocation19_spill] sm:$0xff] %v7566_v8  ;;  %4557 = vmatpush1.bf16.msra.mxu0 %v7566_v8  ;;  %v7575_v15 = vpack.c.bf16 %v135_v13, %v126_v12  ;;  %v134_v17 = vld [vmem:[#allocation7 + $0x168] sm:$0xff]  ;;  %v144_v18 = vld [vmem:[#allocation7 + $0x1b8] sm:$0xff]  ;;  %v153_v19 = vld [vmem:[#allocation7 + $0x200] sm:$0xff] }
  0x62   :  { %9686 = vst [vmem:[#allocation20_spill] sm:$0xff] %v7568_v9  ;;  %9687 = vst [vmem:[#allocation21_spill] sm:$0xff] %v7572_v14  ;;  %4559 = vmatprep.subr.bf16.mxu0 %v7568_v9  ;;  %v7578_v20 = vpack.c.bf16 %v134_v17, %v125_v16  ;;  %v143_v21 = vld [vmem:[#allocation7 + $0x1b0] sm:$0xff]  ;;  %v152_v22 = vld [vmem:[#allocation7 + $0x1f8] sm:$0xff]  ;;  %v7581_v23 = vpack.c.bf16 %v153_v19, %v144_v18  ;;  %p7438_p1 = por %p7437_p0, %p7436_p13 }
  0x63   :  { %9688 = vst [vmem:[#allocation22_spill] sm:$0xff] %v7575_v15  ;;  %v162_v24 = vld [vmem:[#allocation7 + $0x248] sm:$0xff]  ;;  %v92_v25 = vld [vmem:[#allocation7 + $0x18] sm:$0xff]  ;;  %v101_v26 = vld [vmem:[#allocation7 + $0x60] sm:$0xff]  ;;  %v7588_v32 = vpack.c.bf16 %v152_v22, %v143_v21 }
  0x64   :  { %9689 = vst [vmem:[#allocation23_spill] sm:$0xff] %v7578_v20  ;;  %9690 = vst [vmem:[#allocation24_spill] sm:$0xff] %v7581_v23  ;;  %v171_v27 = vld [vmem:[#allocation7 + $0x290] sm:$0xff]  ;;  %v7583_v28 = vpack.c.bf16 %v101_v26, %v92_v25  ;;  %v100_v30 = vld [vmem:[#allocation7 + $0x58] sm:$0xff]  ;;  %p7439_p2 = pnand %p7438_p1, %p7432_p12 }
  0x65   :  { %4561 = vmatpush1.bf16.msra.mxu0 %v7572_v14  ;;  %v91_v29 = vld [vmem:[#allocation7 + $0x10] sm:$0xff]  ;;  %9693 = vst [vmem:[#allocation27_spill] sm:$0xff] %v7588_v32  ;;  %v110_v33 = vld [vmem:[#allocation7 + $0xa8] sm:$0xff]  ;;  %v109_v35 = vld [vmem:[#allocation7 + $0xa0] sm:$0xff]  ;;  %v7592_v36 = vpack.c.bf16 %v171_v27, %v162_v24 }
  0x66   :  { %4563 = vmatprep.subr.bf16.mxu0 %v7575_v15  ;;  %9691 = vst [vmem:[#allocation25_spill] sm:$0xff] %v7583_v28  ;;  %v7585_v31 = vpack.c.bf16 %v100_v30, %v91_v29  ;;  %4619 = vmatprep.subr.bf16.mxu1 %v7583_v28  ;;  %v119_v34 = vld [vmem:[#allocation7 + $0xf0] sm:$0xff]  ;;  %v161_v37 = vld [vmem:[#allocation7 + $0x240] sm:$0xff]  ;;  %v170_v38 = vld [vmem:[#allocation7 + $0x288] sm:$0xff] }
  0x67   :  { %9694 = vst [vmem:[#allocation28_spill] sm:$0xff] %v7592_v36  ;;  %v7595_v39 = vpack.c.bf16 %v119_v34, %v110_v33  ;;  %v118_v40 = vld [vmem:[#allocation7 + $0xe8] sm:$0xff]  ;;  %v180_v41 = vld [vmem:[#allocation7 + $0x2d8] sm:$0xff]  ;;  %v189_v42 = vld [vmem:[#allocation7 + $0x320] sm:$0xff]  ;;  %v7601_v48 = vpack.c.bf16 %v170_v38, %v161_v37 }
  0x68   :  { %9692 = vst [vmem:[#allocation26_spill] sm:$0xff] %v7585_v31  ;;  %4621 = vmatpush1.bf16.msra.mxu1 %v7585_v31  ;;  %v7597_v43 = vpack.c.bf16 %v118_v40, %v109_v35  ;;  %v128_v44 = vld [vmem:[#allocation7 + $0x138] sm:$0xff]  ;;  %v137_v45 = vld [vmem:[#allocation7 + $0x180] sm:$0xff]  ;;  %v127_v46 = vld [vmem:[#allocation7 + $0x130] sm:$0xff]  ;;  %v7606_v52 = vpack.c.bf16 %v189_v42, %v180_v41 }
  0x69   :  { %4565 = vmatpush1.bf16.msra.mxu0 %v7578_v20  ;;  %9695 = vst [vmem:[#allocation29_spill] sm:$0xff] %v7595_v39  ;;  %4623 = vmatprep.subr.bf16.mxu1 %v7595_v39  ;;  %v136_v47 = vld [vmem:[#allocation7 + $0x178] sm:$0xff]  ;;  %9697 = vst [vmem:[#allocation31_spill] sm:$0xff] %v7601_v48  ;;  %v179_v49 = vld [vmem:[#allocation7 + $0x2d0] sm:$0xff]  ;;  %v7603_v51 = vpack.c.bf16 %v137_v45, %v128_v44 }
  0x6a   :  { %4567 = vmatprep.subr.bf16.mxu0 %v7581_v23  ;;  %9696 = vst [vmem:[#allocation30_spill] sm:$0xff] %v7597_v43  ;;  %v188_v50 = vld [vmem:[#allocation7 + $0x318] sm:$0xff]  ;;  %9699 = vst [vmem:[#allocation33_spill] sm:$0xff] %v7606_v52  ;;  %v198_v53 = vld [vmem:[#allocation7 + $0x368] sm:$0xff]  ;;  %v7609_v54 = vpack.c.bf16 %v136_v47, %v127_v46 }
  0x6b   :  { %9698 = vst [vmem:[#allocation32_spill] sm:$0xff] %v7603_v51  ;;  %v146_v55 = vld [vmem:[#allocation7 + $0x1c8] sm:$0xff]  ;;  %v155_v56 = vld [vmem:[#allocation7 + $0x210] sm:$0xff]  ;;  %v145_v59 = vld [vmem:[#allocation7 + $0x1c0] sm:$0xff]  ;;  %v7615_v61 = vpack.c.bf16 %v188_v50, %v179_v49 }
  0x6c   :  { %4625 = vmatpush1.bf16.msra.mxu1 %v7597_v43  ;;  %9700 = vst [vmem:[#allocation34_spill] sm:$0xff] %v7609_v54  ;;  %v207_v57 = vld [vmem:[#allocation7 + $0x3b0] sm:$0xff]  ;;  %v7612_v58 = vpack.c.bf16 %v155_v56, %v146_v55  ;;  %v154_v60 = vld [vmem:[#allocation7 + $0x208] sm:$0xff]  ;;  %v164_v62 = vld [vmem:[#allocation7 + $0x258] sm:$0xff] }
  0x6d   :  { %4569 = vmatpush1.bf16.msra.mxu0 %v7588_v32  ;;  %4627 = vmatprep.subr.bf16.mxu1 %v7603_v51  ;;  %9702 = vst [vmem:[#allocation36_spill] sm:$0xff] %v7615_v61  ;;  %v173_v63 = vld [vmem:[#allocation7 + $0x2a0] sm:$0xff]  ;;  %v7618_v1 = vpack.c.bf16 %v207_v57, %v198_v53  ;;  %v206_v3 = vld [vmem:[#allocation7 + $0x3a8] sm:$0xff]  ;;  %v216_v5 = vld [vmem:[#allocation7 + $0x3f8] sm:$0xff]  ;;  %v7621_v6 = vpack.c.bf16 %v154_v60, %v145_v59 }
  0x6e   :  { %4571 = vmatprep.subr.bf16.mxu0 %v7592_v36  ;;  %9701 = vst [vmem:[#allocation35_spill] sm:$0xff] %v7612_v58  ;;  %v197_v2 = vld [vmem:[#allocation7 + $0x360] sm:$0xff]  ;;  %v7624_v10 = vpack.c.bf16 %v173_v63, %v164_v62  ;;  %v163_v11 = vld [vmem:[#allocation7 + $0x250] sm:$0xff]  ;;  %v172_v12 = vld [vmem:[#allocation7 + $0x298] sm:$0xff] }
  0x6f   :  { %9703 = vst [vmem:[#allocation37_spill] sm:$0xff] %v7618_v1  ;;  %9704 = vst [vmem:[#allocation38_spill] sm:$0xff] %v7621_v6  ;;  %v225_v7 = vld [vmem:[#allocation7 + $0x440] sm:$0xff]  ;;  %v182_v13 = vld [vmem:[#allocation7 + $0x2e8] sm:$0xff]  ;;  %v7627_v17 = vpack.c.bf16 %v206_v3, %v197_v2  ;;  %v7633_v24 = vpack.c.bf16 %v172_v12, %v163_v11 }
  0x70   :  { %4629 = vmatpush1.bf16.msra.mxu1 %v7609_v54  ;;  %9705 = vst [vmem:[#allocation39_spill] sm:$0xff] %v7624_v10  ;;  %v191_v16 = vld [vmem:[#allocation7 + $0x330] sm:$0xff]  ;;  %v7630_v18 = vpack.c.bf16 %v225_v7, %v216_v5  ;;  %v224_v21 = vld [vmem:[#allocation7 + $0x438] sm:$0xff]  ;;  %v234_v22 = vld [vmem:[#allocation7 + $0x488] sm:$0xff] }
  0x71   :  { %4573 = vmatpush1.bf16.msra.mxu0 %v7601_v48  ;;  %4631 = vmatprep.subr.bf16.mxu1 %v7612_v58  ;;  %9706 = vst [vmem:[#allocation40_spill] sm:$0xff] %v7627_v17  ;;  %v215_v19 = vld [vmem:[#allocation7 + $0x3f0] sm:$0xff]  ;;  %9708 = vst [vmem:[#allocation42_spill] sm:$0xff] %v7633_v24  ;;  %v7636_v26 = vpack.c.bf16 %v191_v16, %v182_v13  ;;  %v181_v27 = vld [vmem:[#allocation7 + $0x2e0] sm:$0xff] }
  0x72   :  { %4575 = vmatprep.subr.bf16.mxu0 %v7606_v52  ;;  %9707 = vst [vmem:[#allocation41_spill] sm:$0xff] %v7630_v18  ;;  %v243_v25 = vld [vmem:[#allocation7 + $0x4d0] sm:$0xff]  ;;  %v190_v29 = vld [vmem:[#allocation7 + $0x328] sm:$0xff]  ;;  %v200_v30 = vld [vmem:[#allocation7 + $0x378] sm:$0xff]  ;;  %v7639_v34 = vpack.c.bf16 %v224_v21, %v215_v19 }
  0x73   :  { %9709 = vst [vmem:[#allocation43_spill] sm:$0xff] %v7636_v26  ;;  %v209_v33 = vld [vmem:[#allocation7 + $0x3c0] sm:$0xff]  ;;  %v7642_v35 = vpack.c.bf16 %v243_v25, %v234_v22  ;;  %v242_v38 = vld [vmem:[#allocation7 + $0x4c8] sm:$0xff]  ;;  %v252_v40 = vld [vmem:[#allocation7 + $0x518] sm:$0xff]  ;;  %v7645_v41 = vpack.c.bf16 %v190_v29, %v181_v27 }
  0x74   :  { %4633 = vmatpush1.bf16.msra.mxu1 %v7621_v6  ;;  %9710 = vst [vmem:[#allocation44_spill] sm:$0xff] %v7639_v34  ;;  %v233_v37 = vld [vmem:[#allocation7 + $0x480] sm:$0xff]  ;;  %v7648_v44 = vpack.c.bf16 %v209_v33, %v200_v30  ;;  %v199_v45 = vld [vmem:[#allocation7 + $0x370] sm:$0xff]  ;;  %v208_v46 = vld [vmem:[#allocation7 + $0x3b8] sm:$0xff] }
  0x75   :  { %4577 = vmatpush1.bf16.msra.mxu0 %v7615_v61  ;;  %4635 = vmatprep.subr.bf16.mxu1 %v7624_v10  ;;  %9711 = vst [vmem:[#allocation45_spill] sm:$0xff] %v7642_v35  ;;  %9712 = vst [vmem:[#allocation46_spill] sm:$0xff] %v7645_v41  ;;  %v261_v42 = vld [vmem:[#allocation7 + $0x560] sm:$0xff]  ;;  %v218_v47 = vld [vmem:[#allocation7 + $0x408] sm:$0xff]  ;;  %v7651_v50 = vpack.c.bf16 %v242_v38, %v233_v37  ;;  %v7657_v59 = vpack.c.bf16 %v208_v46, %v199_v45 }
  0x76   :  { %4579 = vmatprep.subr.bf16.mxu0 %v7618_v1  ;;  %9713 = vst [vmem:[#allocation47_spill] sm:$0xff] %v7648_v44  ;;  %v227_v49 = vld [vmem:[#allocation7 + $0x450] sm:$0xff]  ;;  %v7654_v53 = vpack.c.bf16 %v261_v42, %v252_v40  ;;  %v260_v56 = vld [vmem:[#allocation7 + $0x558] sm:$0xff]  ;;  %v270_v57 = vld [vmem:[#allocation7 + $0x5a8] sm:$0xff] }
  0x77   :  { %9714 = vst [vmem:[#allocation48_spill] sm:$0xff] %v7651_v50  ;;  %v251_v55 = vld [vmem:[#allocation7 + $0x510] sm:$0xff]  ;;  %9716 = vst [vmem:[#allocation50_spill] sm:$0xff] %v7657_v59  ;;  %v7660_v62 = vpack.c.bf16 %v227_v49, %v218_v47  ;;  %v217_v63 = vld [vmem:[#allocation7 + $0x400] sm:$0xff] }
  0x78   :  { %4637 = vmatpush1.bf16.msra.mxu1 %v7633_v24  ;;  %9715 = vst [vmem:[#allocation49_spill] sm:$0xff] %v7654_v53  ;;  %v279_v60 = vld [vmem:[#allocation7 + $0x5f0] sm:$0xff]  ;;  %v226_v2 = vld [vmem:[#allocation7 + $0x448] sm:$0xff]  ;;  %v236_v3 = vld [vmem:[#allocation7 + $0x498] sm:$0xff]  ;;  %v7663_v7 = vpack.c.bf16 %v260_v56, %v251_v55 }
  0x79   :  { %4581 = vmatpush1.bf16.msra.mxu0 %v7627_v17  ;;  %4639 = vmatprep.subr.bf16.mxu1 %v7636_v26  ;;  %9717 = vst [vmem:[#allocation51_spill] sm:$0xff] %v7660_v62  ;;  %v245_v5 = vld [vmem:[#allocation7 + $0x4e0] sm:$0xff]  ;;  %v7666_v11 = vpack.c.bf16 %v279_v60, %v270_v57  ;;  %v278_v13 = vld [vmem:[#allocation7 + $0x5e8] sm:$0xff]  ;;  %v288_v16 = vld [vmem:[#allocation7 + $0x638] sm:$0xff]  ;;  %v7669_v19 = vpack.c.bf16 %v226_v2, %v217_v63 }
  0x7a   :  { %4583 = vmatprep.subr.bf16.mxu0 %v7630_v18  ;;  %9718 = vst [vmem:[#allocation52_spill] sm:$0xff] %v7663_v7  ;;  %v269_v12 = vld [vmem:[#allocation7 + $0x5a0] sm:$0xff]  ;;  %v7672_v22 = vpack.c.bf16 %v245_v5, %v236_v3  ;;  %v235_v25 = vld [vmem:[#allocation7 + $0x490] sm:$0xff]  ;;  %v244_v27 = vld [vmem:[#allocation7 + $0x4d8] sm:$0xff] }
  0x7b   :  { %9719 = vst [vmem:[#allocation53_spill] sm:$0xff] %v7666_v11  ;;  %9720 = vst [vmem:[#allocation54_spill] sm:$0xff] %v7669_v19  ;;  %v297_v21 = vld [vmem:[#allocation7 + $0x680] sm:$0xff]  ;;  %v254_v29 = vld [vmem:[#allocation7 + $0x528] sm:$0xff]  ;;  %v7675_v33 = vpack.c.bf16 %v278_v13, %v269_v12  ;;  %v7681_v45 = vpack.c.bf16 %v244_v27, %v235_v25 }
  0x7c   :  { %4641 = vmatpush1.bf16.msra.mxu1 %v7645_v41  ;;  %9721 = vst [vmem:[#allocation55_spill] sm:$0xff] %v7672_v22  ;;  %v263_v30 = vld [vmem:[#allocation7 + $0x570] sm:$0xff]  ;;  %v7678_v37 = vpack.c.bf16 %v297_v21, %v288_v16  ;;  %v296_v40 = vld [vmem:[#allocation7 + $0x678] sm:$0xff]  ;;  %v306_v42 = vld [vmem:[#allocation7 + $0x6c8] sm:$0xff] }
  0x7d   :  { %4585 = vmatpush1.bf16.msra.mxu0 %v7639_v34  ;;  %4643 = vmatprep.subr.bf16.mxu1 %v7648_v44  ;;  %9722 = vst [vmem:[#allocation56_spill] sm:$0xff] %v7675_v33  ;;  %v287_v38 = vld [vmem:[#allocation7 + $0x630] sm:$0xff]  ;;  %9724 = vst [vmem:[#allocation58_spill] sm:$0xff] %v7681_v45  ;;  %v7684_v47 = vpack.c.bf16 %v263_v30, %v254_v29  ;;  %v253_v49 = vld [vmem:[#allocation7 + $0x520] sm:$0xff] }
  0x7e   :  { %4587 = vmatprep.subr.bf16.mxu0 %v7642_v35  ;;  %9723 = vst [vmem:[#allocation57_spill] sm:$0xff] %v7678_v37  ;;  %v315_v46 = vld [vmem:[#allocation7 + $0x710] sm:$0xff]  ;;  %v262_v55 = vld [vmem:[#allocation7 + $0x568] sm:$0xff]  ;;  %v272_v56 = vld [vmem:[#allocation7 + $0x5b8] sm:$0xff]  ;;  %v7687_v60 = vpack.c.bf16 %v296_v40, %v287_v38 }
  0x7f   :  { %9725 = vst [vmem:[#allocation59_spill] sm:$0xff] %v7684_v47  ;;  %v281_v57 = vld [vmem:[#allocation7 + $0x600] sm:$0xff]  ;;  %v7690_v63 = vpack.c.bf16 %v315_v46, %v306_v42  ;;  %v314_v3 = vld [vmem:[#allocation7 + $0x708] sm:$0xff]  ;;  %v324_v5 = vld [vmem:[#allocation7 + $0x758] sm:$0xff]  ;;  %v7693_v12 = vpack.c.bf16 %v262_v55, %v253_v49 }
  0x80   :  { %4645 = vmatpush1.bf16.msra.mxu1 %v7657_v59  ;;  %9726 = vst [vmem:[#allocation60_spill] sm:$0xff] %v7687_v60  ;;  %v305_v2 = vld [vmem:[#allocation7 + $0x6c0] sm:$0xff]  ;;  %v7696_v16 = vpack.c.bf16 %v281_v57, %v272_v56  ;;  %v271_v21 = vld [vmem:[#allocation7 + $0x5b0] sm:$0xff]  ;;  %v280_v25 = vld [vmem:[#allocation7 + $0x5f8] sm:$0xff] }
  0x81   :  { %4589 = vmatpush1.bf16.msra.mxu0 %v7651_v50  ;;  %4647 = vmatprep.subr.bf16.mxu1 %v7660_v62  ;;  %9727 = vst [vmem:[#allocation61_spill] sm:$0xff] %v7690_v63  ;;  %9728 = vst [vmem:[#allocation62_spill] sm:$0xff] %v7693_v12  ;;  %v333_v13 = vld [vmem:[#allocation7 + $0x7a0] sm:$0xff]  ;;  %v290_v27 = vld [vmem:[#allocation7 + $0x648] sm:$0xff]  ;;  %v7699_v30 = vpack.c.bf16 %v314_v3, %v305_v2  ;;  %v7705_v49 = vpack.c.bf16 %v280_v25, %v271_v21 }
  0x82   :  { %4591 = vmatprep.subr.bf16.mxu0 %v7654_v53  ;;  %9729 = vst [vmem:[#allocation63_spill] sm:$0xff] %v7696_v16  ;;  %v299_v29 = vld [vmem:[#allocation7 + $0x690] sm:$0xff]  ;;  %v7702_v38 = vpack.c.bf16 %v333_v13, %v324_v5  ;;  %v332_v42 = vld [vmem:[#allocation7 + $0x798] sm:$0xff]  ;;  %v342_v46 = vld [vmem:[#allocation7 + $0x7e8] sm:$0xff] }
  0x83   :  { %9730 = vst [vmem:[#allocation64_spill] sm:$0xff] %v7699_v30  ;;  %v323_v40 = vld [vmem:[#allocation7 + $0x750] sm:$0xff]  ;;  %9732 = vst [vmem:[#allocation66_spill] sm:$0xff] %v7705_v49  ;;  %v7708_v56 = vpack.c.bf16 %v299_v29, %v290_v27  ;;  %v289_v57 = vld [vmem:[#allocation7 + $0x640] sm:$0xff] }
  0x84   :  { %4649 = vmatpush1.bf16.msra.mxu1 %v7669_v19  ;;  %9731 = vst [vmem:[#allocation65_spill] sm:$0xff] %v7702_v38  ;;  %v351_v55 = vld [vmem:[#allocation7 + $0x830] sm:$0xff]  ;;  %v298_v0 = vld [vmem:[#allocation7 + $0x688] sm:$0xff]  ;;  %v308_v2 = vld [vmem:[#allocation7 + $0x6d8] sm:$0xff]  ;;  %v7711_v5 = vpack.c.bf16 %v332_v42, %v323_v40 }
  0x85   :  { %4593 = vmatpush1.bf16.msra.mxu0 %v7663_v7  ;;  %4651 = vmatprep.subr.bf16.mxu1 %v7672_v22  ;;  %9733 = vst [vmem:[#allocation67_spill] sm:$0xff] %v7708_v56  ;;  %v317_v3 = vld [vmem:[#allocation7 + $0x720] sm:$0xff]  ;;  %v7714_v13 = vpack.c.bf16 %v351_v55, %v342_v46  ;;  %v350_v21 = vld [vmem:[#allocation7 + $0x828] sm:$0xff]  ;;  %v360_v25 = vld [vmem:[#allocation7 + $0x878] sm:$0xff] }
  0x86   :  { %4595 = vmatprep.subr.bf16.mxu0 %v7666_v11  ;;  %9734 = vst [vmem:[#allocation68_spill] sm:$0xff] %v7711_v5  ;;  %v369_v27 = vld [vmem:[#allocation7 + $0x8c0] sm:$0xff]  ;;  %v7720_v29 = vpack.c.bf16 %v317_v3, %v308_v2  ;;  %v326_v40 = vld [vmem:[#allocation7 + $0x768] sm:$0xff]  ;;  %v335_v42 = vld [vmem:[#allocation7 + $0x7b0] sm:$0xff] }
  0x87   :  { %9735 = vst [vmem:[#allocation69_spill] sm:$0xff] %v7714_v13  ;;  %v7726_v55 = vpack.c.bf16 %v369_v27, %v360_v25  ;;  %v325_v2 = vld [vmem:[#allocation7 + $0x760] sm:$0xff]  ;;  %v7732_v3 = vpack.c.bf16 %v335_v42, %v326_v40  ;;  %v94_v22 = vld [vmem:[#allocation7 + $0x28] sm:$0xff]  ;;  %v123_v19 = vld [vmem:[#allocation7 + $0x110] sm:$0xff] }
  0x88   :  { %4653 = vmatpush1.bf16.msra.mxu1 %v7681_v45  ;;  %9737 = vst [vmem:[#allocation71_spill] sm:$0xff] %v7720_v29  ;;  %v316_v45 = vld [vmem:[#allocation7 + $0x718] sm:$0xff]  ;;  %v93_v40 = vld [vmem:[#allocation7 + $0x20] sm:$0xff]  ;;  %v102_v42 = vld [vmem:[#allocation7 + $0x68] sm:$0xff] }
  0x89   :  { %4597 = vmatpush1.bf16.msra.mxu0 %v7675_v33  ;;  %4655 = vmatprep.subr.bf16.mxu1 %v7684_v47  ;;  %v307_v47 = vld [vmem:[#allocation7 + $0x6d0] sm:$0xff]  ;;  %9739 = vst [vmem:[#allocation73_spill] sm:$0xff] %v7726_v55  ;;  %9741 = vst [vmem:[#allocation75_spill] sm:$0xff] %v7732_v3 }
  0x8a   :  { %4599 = vmatprep.subr.bf16.mxu0 %v7678_v37 }
  0x8c   :  { %4657 = vmatpush1.bf16.msra.mxu1 %v7693_v12  ;;  %v341_v12 = vld [vmem:[#allocation7 + $0x7e0] sm:$0xff] }
  0x8d   :  { %4601 = vmatpush1.bf16.msra.mxu0 %v7687_v60  ;;  %4659 = vmatprep.subr.bf16.mxu1 %v7696_v16  ;;  %v7717_v16 = vpack.c.bf16 %v298_v0, %v289_v57  ;;  %v7723_v46 = vpack.c.bf16 %v350_v21, %v341_v12  ;;  %v368_v0 = vld [vmem:[#allocation7 + $0x8b8] sm:$0xff]  ;;  %v7729_v57 = vpack.c.bf16 %v316_v45, %v307_v47  ;;  %v353_v21 = vld [vmem:[#allocation7 + $0x840] sm:$0xff]  ;;  %v343_v47 = vld [vmem:[#allocation7 + $0x7f0] sm:$0xff] }
  0x8e   :  { %4603 = vmatprep.subr.bf16.mxu0 %v7690_v63  ;;  %v344_v12 = vld [vmem:[#allocation7 + $0x7f8] sm:$0xff] }
  0x8f   :  { %9736 = vst [vmem:[#allocation70_spill] sm:$0xff] %v7717_v16  ;;  %9738 = vst [vmem:[#allocation72_spill] sm:$0xff] %v7723_v46 }
  0x90   :  { %4661 = vmatpush1.bf16.msra.mxu1 %v7705_v49  ;;  %v359_v49 = vld [vmem:[#allocation7 + $0x870] sm:$0xff]  ;;  %9740 = vst [vmem:[#allocation74_spill] sm:$0xff] %v7729_v57 }
  0x91   :  { %4605 = vmatpush1.bf16.msra.mxu0 %v7699_v30  ;;  %4663 = vmatprep.subr.bf16.mxu1 %v7708_v56  ;;  %v334_v56 = vld [vmem:[#allocation7 + $0x7a8] sm:$0xff]  ;;  %v7735_v25 = vpack.c.bf16 %v368_v0, %v359_v49  ;;  %v371_v0 = vld [vmem:[#allocation7 + $0x8d0] sm:$0xff] }
  0x92   :  { %4607 = vmatprep.subr.bf16.mxu0 %v7702_v38  ;;  %v7739_v45 = vpack.c.bf16 %v334_v56, %v325_v2  ;;  %v362_v49 = vld [vmem:[#allocation7 + $0x888] sm:$0xff]  ;;  %v111_v2 = vld [vmem:[#allocation7 + $0xb0] sm:$0xff] }
  0x93   :  { %9742 = vst [vmem:[#allocation76_spill] sm:$0xff] %v7735_v25 }
  0x94   :  { %4665 = vmatpush1.bf16.msra.mxu1 %v7717_v16  ;;  %9743 = vst [vmem:[#allocation77_spill] sm:$0xff] %v7739_v45  ;;  %v352_v16 = vld [vmem:[#allocation7 + $0x838] sm:$0xff] }
  0x95   :  { %4609 = vmatpush1.bf16.msra.mxu0 %v7711_v5  ;;  %4667 = vmatprep.subr.bf16.mxu1 %v7720_v29  ;;  %v103_v5 = vld [vmem:[#allocation7 + $0x70] sm:$0xff]  ;;  %v7744_v29 = vpack.c.bf16 %v353_v21, %v344_v12  ;;  %v7750_v56 = vpack.c.bf16 %v352_v16, %v343_v47  ;;  %v120_v12 = vld [vmem:[#allocation7 + $0xf8] sm:$0xff]  ;;  %v7756_v21 = vpack.c.bf16 %v371_v0, %v362_v49  ;;  %v129_v47 = vld [vmem:[#allocation7 + $0x140] sm:$0xff] }
  0x96   :  { %4611 = vmatprep.subr.bf16.mxu0 %v7714_v13  ;;  %v7741_v27 = vpack.c.bf16 %v103_v5, %v94_v22  ;;  %v112_v13 = vld [vmem:[#allocation7 + $0xb8] sm:$0xff]  ;;  %v361_v22 = vld [vmem:[#allocation7 + $0x880] sm:$0xff]  ;;  %v7760_v16 = vpack.c.bf16 %v120_v12, %v111_v2  ;;  %v138_v49 = vld [vmem:[#allocation7 + $0x188] sm:$0xff] }
  0x97   :  { %9745 = vst [vmem:[#allocation79_spill] sm:$0xff] %v7744_v29  ;;  %9747 = vst [vmem:[#allocation81_spill] sm:$0xff] %v7750_v56  ;;  %v148_v0 = vld [vmem:[#allocation7 + $0x1d8] sm:$0xff]  ;;  %v95_v2 = vld [vmem:[#allocation7 + $0x30] sm:$0xff] }
  0x98   :  { %4669 = vmatpush1.bf16.msra.mxu1 %v7729_v57  ;;  %9744 = vst [vmem:[#allocation78_spill] sm:$0xff] %v7741_v27  ;;  %9749 = vst [vmem:[#allocation83_spill] sm:$0xff] %v7756_v21  ;;  %v130_v57 = vld [vmem:[#allocation7 + $0x148] sm:$0xff]  ;;  %v104_v12 = vld [vmem:[#allocation7 + $0x78] sm:$0xff] }
  0x99   :  { %4613 = vmatpush1.bf16.msra.mxu0 %v7723_v46  ;;  %4671 = vmatprep.subr.bf16.mxu1 %v7732_v3  ;;  %v121_v46 = vld [vmem:[#allocation7 + $0x100] sm:$0xff]  ;;  %v370_v3 = vld [vmem:[#allocation7 + $0x8c8] sm:$0xff]  ;;  %9751 = vst [vmem:[#allocation84_spill] sm:$0xff] %v7760_v16 }
  0x9a   :  { %4615 = vmatprep.subr.bf16.mxu0 %v7726_v55  ;;  %v7747_v55 = vpack.c.bf16 %v102_v42, %v93_v40  ;;  %v7753_v5 = vpack.c.bf16 %v121_v46, %v112_v13  ;;  %v9750_v40 = vmov 0.0   ;;  %v96_v42 = vld [vmem:[#allocation7 + $0x38] sm:$0xff]  ;;  %v7764_v13 = vpack.c.bf16 %v370_v3, %v361_v22 }
  0x9b   :  { %v7773_v3 = vpack.c.bf16 %v138_v49, %v129_v47  ;;  %v156_v22 = vld [vmem:[#allocation7 + $0x218] sm:$0xff]  ;;  %v141_v49 = vld [vmem:[#allocation7 + $0x1a0] sm:$0xff] }
  0x9c   :  { %9746 = vst [vmem:[#allocation80_spill] sm:$0xff] %v7747_v55  ;;  %4673 = vmatpush1.bf16.msra.mxu1 %v7739_v45  ;;  %9748 = vst [vmem:[#allocation82_spill] sm:$0xff] %v7753_v5  ;;  %v105_v45 = vld [vmem:[#allocation7 + $0x80] sm:$0xff]  ;;  %v132_v47 = vld [vmem:[#allocation7 + $0x158] sm:$0xff] }
  0x9d   :  { %4617 = vmatpush1.bf16.msra.mxu0 %v7735_v25  ;;  %4675 = vmatprep.subr.bf16.mxu1 %v7744_v29  ;;  %v139_v25 = vld [vmem:[#allocation7 + $0x190] sm:$0xff]  ;;  %9752 = vst [vmem:[#allocation85_spill] sm:$0xff] %v7764_v13  ;;  %v157_v29 = vld [vmem:[#allocation7 + $0x220] sm:$0xff]  ;;  %9755 = vst [vmem:[#allocation88_spill] sm:$0xff] %v7773_v3 }
  0x9e   :  { %4683 = vmatprep.subr.bf16.mxu0 %v7741_v27  ;;  %v7767_v46 = vpack.c.bf16 %v139_v25, %v130_v57  ;;  %v7770_v27 = vpack.c.bf16 %v105_v45, %v96_v42  ;;  %v7777_v57 = vpack.c.bf16 %v157_v29, %v148_v0  ;;  %v147_v25 = vld [vmem:[#allocation7 + $0x1d0] sm:$0xff] }
  0x9f   :  { %v175_v45 = vld [vmem:[#allocation7 + $0x2b0] sm:$0xff]  ;;  %v7786_v29 = vpack.c.bf16 %v156_v22, %v147_v25  ;;  %v150_v25 = vld [vmem:[#allocation7 + $0x1e8] sm:$0xff] }
  0xa0   :  { %448 = vmatmul.mubr.f32.vlgmr.msra.gmra.mrb[0].mxu0 %v9750_v40  ;;  %4677 = vmatpush1.bf16.msra.mxu1 %v7750_v56  ;;  %9753 = vst [vmem:[#allocation86_spill] sm:$0xff] %v7767_v46  ;;  %9754 = vst [vmem:[#allocation87_spill] sm:$0xff] %v7770_v27  ;;  %v113_v56 = vld [vmem:[#allocation7 + $0xc0] sm:$0xff]  ;;  %v159_v22 = vld [vmem:[#allocation7 + $0x230] sm:$0xff] }
  0xa1   :  { %4685 = vmatpush1.bf16.msra.mxu0 %v7747_v55  ;;  %589 = vmatprep.mubr.f32.mxu0 %v9750_v40  ;;  %v114_v55 = vld [vmem:[#allocation7 + $0xc8] sm:$0xff]  ;;  %9756 = vst [vmem:[#allocation89_spill] sm:$0xff] %v7777_v57  ;;  %9759 = vst [vmem:[#allocation92_spill] sm:$0xff] %v7786_v29 }
  0xa2   :  { %4687 = vmatprep.subr.bf16.mxu0 %v7753_v5  ;;  %4679 = vmatprep.subr.bf16.mxu1 %v7756_v21  ;;  %v166_v5 = vld [vmem:[#allocation7 + $0x268] sm:$0xff]  ;;  %v7779_v21 = vpack.c.bf16 %v104_v12, %v95_v2  ;;  %v7782_v42 = vpack.c.bf16 %v123_v19, %v114_v55  ;;  %v165_v2 = vld [vmem:[#allocation7 + $0x260] sm:$0xff] }
  0xa3   :  { %v7789_v0 = vpack.c.bf16 %v175_v45, %v166_v5  ;;  %v174_v12 = vld [vmem:[#allocation7 + $0x2a8] sm:$0xff]  ;;  %v193_v55 = vld [vmem:[#allocation7 + $0x340] sm:$0xff] }
  0xa4   :  { %4681 = vmatpush1.bf16.msra.mxu1 %v7764_v13  ;;  %9757 = vst [vmem:[#allocation90_spill] sm:$0xff] %v7779_v21  ;;  %9758 = vst [vmem:[#allocation91_spill] sm:$0xff] %v7782_v42  ;;  %v131_v13 = vld [vmem:[#allocation7 + $0x150] sm:$0xff]  ;;  %v7799_v5 = vpack.c.bf16 %v174_v12, %v165_v2  ;;  %v168_v2 = vld [vmem:[#allocation7 + $0x278] sm:$0xff] }
  0xa5   :  { %4689 = vmatpush1.bf16.msra.mxu0 %v7760_v16  ;;  %4747 = vmatprep.subr.bf16.mxu1 %v7770_v27  ;;  %v122_v16 = vld [vmem:[#allocation7 + $0x108] sm:$0xff]  ;;  %9760 = vst [vmem:[#allocation93_spill] sm:$0xff] %v7789_v0  ;;  %v7795_v27 = vpack.c.bf16 %v141_v49, %v132_v47  ;;  %v211_v49 = vld [vmem:[#allocation7 + $0x3d0] sm:$0xff]  ;;  %v177_v12 = vld [vmem:[#allocation7 + $0x2c0] sm:$0xff] }
  0xa6   :  { %4691 = vmatprep.subr.bf16.mxu0 %v7767_v46  ;;  %v184_v46 = vld [vmem:[#allocation7 + $0x2f8] sm:$0xff]  ;;  %v7792_v19 = vpack.c.bf16 %v122_v16, %v113_v56  ;;  %9763 = vst [vmem:[#allocation96_spill] sm:$0xff] %v7799_v5  ;;  %v183_v56 = vld [vmem:[#allocation7 + $0x2f0] sm:$0xff] }
  0xa7   :  { %519 = vmatmul.mubr.f32.vlgmr.msra.gmra.mrb[0].mxu1 %v9750_v40  ;;  %9762 = vst [vmem:[#allocation95_spill] sm:$0xff] %v7795_v27  ;;  %v7802_v45 = vpack.c.bf16 %v193_v55, %v184_v46  ;;  %v192_v16 = vld [vmem:[#allocation7 + $0x338] sm:$0xff] }
  0xa8   :  { %4749 = vmatpush1.bf16.msra.mxu1 %v7779_v21  ;;  %9761 = vst [vmem:[#allocation94_spill] sm:$0xff] %v7792_v19  ;;  %660 = vmatprep.mubr.f32.mxu1 %v9750_v40  ;;  %v149_v21 = vld [vmem:[#allocation7 + $0x1e0] sm:$0xff]  ;;  %v7811_v46 = vpack.c.bf16 %v192_v16, %v183_v56  ;;  %v186_v56 = vld [vmem:[#allocation7 + $0x308] sm:$0xff]  ;;  %v195_v16 = vld [vmem:[#allocation7 + $0x350] sm:$0xff] }
  0xa9   :  { %4693 = vmatpush1.bf16.msra.mxu0 %v7773_v3  ;;  %4751 = vmatprep.subr.bf16.mxu1 %v7782_v42  ;;  %v140_v3 = vld [vmem:[#allocation7 + $0x198] sm:$0xff]  ;;  %9764 = vst [vmem:[#allocation97_spill] sm:$0xff] %v7802_v45  ;;  %v7808_v42 = vpack.c.bf16 %v159_v22, %v150_v25  ;;  %v229_v25 = vld [vmem:[#allocation7 + $0x460] sm:$0xff]  ;;  %v7820_v22 = vpack.c.bf16 %v177_v12, %v168_v2  ;;  %v247_v2 = vld [vmem:[#allocation7 + $0x4f0] sm:$0xff] }
  0xaa   :  { %4695 = vmatprep.subr.bf16.mxu0 %v7777_v57  ;;  %v202_v57 = vld [vmem:[#allocation7 + $0x388] sm:$0xff]  ;;  %v7805_v47 = vpack.c.bf16 %v140_v3, %v131_v13  ;;  %9767 = vst [vmem:[#allocation100_spill] sm:$0xff] %v7811_v46  ;;  %v220_v3 = vld [vmem:[#allocation7 + $0x418] sm:$0xff]  ;;  %v7832_v12 = vpack.c.bf16 %v195_v16, %v186_v56  ;;  %v265_v56 = vld [vmem:[#allocation7 + $0x580] sm:$0xff] }
  0xab   :  { %9766 = vst [vmem:[#allocation99_spill] sm:$0xff] %v7808_v42  ;;  %v7814_v55 = vpack.c.bf16 %v211_v49, %v202_v57  ;;  %v210_v13 = vld [vmem:[#allocation7 + $0x3c8] sm:$0xff]  ;;  %9770 = vst [vmem:[#allocation103_spill] sm:$0xff] %v7820_v22  ;;  %v7826_v49 = vpack.c.bf16 %v229_v25, %v220_v3 }
  0xac   :  { %4753 = vmatpush1.bf16.msra.mxu1 %v7792_v19  ;;  %9765 = vst [vmem:[#allocation98_spill] sm:$0xff] %v7805_v47  ;;  %v167_v19 = vld [vmem:[#allocation7 + $0x270] sm:$0xff]  ;;  %9774 = vst [vmem:[#allocation107_spill] sm:$0xff] %v7832_v12 }
  0xad   :  { %4697 = vmatpush1.bf16.msra.mxu0 %v7786_v29  ;;  %4755 = vmatprep.subr.bf16.mxu1 %v7795_v27  ;;  %v158_v29 = vld [vmem:[#allocation7 + $0x228] sm:$0xff]  ;;  %9768 = vst [vmem:[#allocation101_spill] sm:$0xff] %v7814_v55  ;;  %9772 = vst [vmem:[#allocation105_spill] sm:$0xff] %v7826_v49 }
  0xae   :  { %4699 = vmatprep.subr.bf16.mxu0 %v7789_v0  ;;  %v201_v0 = vld [vmem:[#allocation7 + $0x380] sm:$0xff]  ;;  %v7817_v27 = vpack.c.bf16 %v158_v29, %v149_v21  ;;  %v228_v21 = vld [vmem:[#allocation7 + $0x458] sm:$0xff]  ;;  %v238_v29 = vld [vmem:[#allocation7 + $0x4a8] sm:$0xff] }
  0xaf   :  { %v7823_v57 = vpack.c.bf16 %v210_v13, %v201_v0  ;;  %v204_v0 = vld [vmem:[#allocation7 + $0x398] sm:$0xff]  ;;  %v213_v13 = vld [vmem:[#allocation7 + $0x3e0] sm:$0xff]  ;;  %v7838_v25 = vpack.c.bf16 %v247_v2, %v238_v29 }
  0xb0   :  { %4757 = vmatpush1.bf16.msra.mxu1 %v7805_v47  ;;  %9769 = vst [vmem:[#allocation102_spill] sm:$0xff] %v7817_v27  ;;  %v185_v47 = vld [vmem:[#allocation7 + $0x300] sm:$0xff]  ;;  %v7844_v16 = vpack.c.bf16 %v213_v13, %v204_v0  ;;  %v283_v0 = vld [vmem:[#allocation7 + $0x610] sm:$0xff] }
  0xb1   :  { %4701 = vmatpush1.bf16.msra.mxu0 %v7799_v5  ;;  %4759 = vmatprep.subr.bf16.mxu1 %v7808_v42  ;;  %v176_v5 = vld [vmem:[#allocation7 + $0x2b8] sm:$0xff]  ;;  %9771 = vst [vmem:[#allocation104_spill] sm:$0xff] %v7823_v57  ;;  %9776 = vst [vmem:[#allocation109_spill] sm:$0xff] %v7838_v25 }
  0xb2   :  { %4703 = vmatprep.subr.bf16.mxu0 %v7802_v45  ;;  %v219_v45 = vld [vmem:[#allocation7 + $0x410] sm:$0xff]  ;;  %v7829_v42 = vpack.c.bf16 %v176_v5, %v167_v19  ;;  %v246_v19 = vld [vmem:[#allocation7 + $0x4e8] sm:$0xff]  ;;  %v256_v5 = vld [vmem:[#allocation7 + $0x538] sm:$0xff]  ;;  %9778 = vst [vmem:[#allocation111_spill] sm:$0xff] %v7844_v16 }
  0xb3   :  { %v7835_v3 = vpack.c.bf16 %v228_v21, %v219_v45  ;;  %v222_v45 = vld [vmem:[#allocation7 + $0x428] sm:$0xff]  ;;  %v231_v21 = vld [vmem:[#allocation7 + $0x470] sm:$0xff]  ;;  %v7850_v2 = vpack.c.bf16 %v265_v56, %v256_v5 }
  0xb4   :  { %4761 = vmatpush1.bf16.msra.mxu1 %v7817_v27  ;;  %9773 = vst [vmem:[#allocation106_spill] sm:$0xff] %v7829_v42  ;;  %v203_v27 = vld [vmem:[#allocation7 + $0x390] sm:$0xff]  ;;  %v7856_v13 = vpack.c.bf16 %v231_v21, %v222_v45  ;;  %v301_v45 = vld [vmem:[#allocation7 + $0x6a0] sm:$0xff] }
  0xb5   :  { %4705 = vmatpush1.bf16.msra.mxu0 %v7811_v46  ;;  %4763 = vmatprep.subr.bf16.mxu1 %v7820_v22  ;;  %v194_v46 = vld [vmem:[#allocation7 + $0x348] sm:$0xff]  ;;  %9775 = vst [vmem:[#allocation108_spill] sm:$0xff] %v7835_v3  ;;  %9780 = vst [vmem:[#allocation113_spill] sm:$0xff] %v7850_v2 }
  0xb6   :  { %4707 = vmatprep.subr.bf16.mxu0 %v7814_v55  ;;  %v237_v55 = vld [vmem:[#allocation7 + $0x4a0] sm:$0xff]  ;;  %v7841_v22 = vpack.c.bf16 %v194_v46, %v185_v47  ;;  %v264_v47 = vld [vmem:[#allocation7 + $0x578] sm:$0xff]  ;;  %v274_v46 = vld [vmem:[#allocation7 + $0x5c8] sm:$0xff]  ;;  %9782 = vst [vmem:[#allocation115_spill] sm:$0xff] %v7856_v13 }
  0xb7   :  { %v7847_v29 = vpack.c.bf16 %v246_v19, %v237_v55  ;;  %v240_v55 = vld [vmem:[#allocation7 + $0x4b8] sm:$0xff]  ;;  %v249_v19 = vld [vmem:[#allocation7 + $0x500] sm:$0xff]  ;;  %v7862_v56 = vpack.c.bf16 %v283_v0, %v274_v46 }
  0xb8   :  { %4765 = vmatpush1.bf16.msra.mxu1 %v7829_v42  ;;  %9777 = vst [vmem:[#allocation110_spill] sm:$0xff] %v7841_v22  ;;  %v221_v42 = vld [vmem:[#allocation7 + $0x420] sm:$0xff]  ;;  %v7868_v21 = vpack.c.bf16 %v249_v19, %v240_v55  ;;  %v319_v55 = vld [vmem:[#allocation7 + $0x730] sm:$0xff] }
  0xb9   :  { %4709 = vmatpush1.bf16.msra.mxu0 %v7823_v57  ;;  %4767 = vmatprep.subr.bf16.mxu1 %v7832_v12  ;;  %v212_v57 = vld [vmem:[#allocation7 + $0x3d8] sm:$0xff]  ;;  %9779 = vst [vmem:[#allocation112_spill] sm:$0xff] %v7847_v29  ;;  %9784 = vst [vmem:[#allocation117_spill] sm:$0xff] %v7862_v56 }
  0xba   :  { %4711 = vmatprep.subr.bf16.mxu0 %v7826_v49  ;;  %v255_v49 = vld [vmem:[#allocation7 + $0x530] sm:$0xff]  ;;  %v7853_v12 = vpack.c.bf16 %v212_v57, %v203_v27  ;;  %v282_v27 = vld [vmem:[#allocation7 + $0x608] sm:$0xff]  ;;  %v292_v57 = vld [vmem:[#allocation7 + $0x658] sm:$0xff]  ;;  %9786 = vst [vmem:[#allocation119_spill] sm:$0xff] %v7868_v21 }
  0xbb   :  { %v7859_v5 = vpack.c.bf16 %v264_v47, %v255_v49  ;;  %v258_v49 = vld [vmem:[#allocation7 + $0x548] sm:$0xff]  ;;  %v267_v47 = vld [vmem:[#allocation7 + $0x590] sm:$0xff]  ;;  %v7874_v0 = vpack.c.bf16 %v301_v45, %v292_v57 }
  0xbc   :  { %4769 = vmatpush1.bf16.msra.mxu1 %v7841_v22  ;;  %9781 = vst [vmem:[#allocation114_spill] sm:$0xff] %v7853_v12  ;;  %v239_v22 = vld [vmem:[#allocation7 + $0x4b0] sm:$0xff]  ;;  %v7880_v19 = vpack.c.bf16 %v267_v47, %v258_v49  ;;  %v337_v49 = vld [vmem:[#allocation7 + $0x7c0] sm:$0xff] }
  0xbd   :  { %4713 = vmatpush1.bf16.msra.mxu0 %v7835_v3  ;;  %4771 = vmatprep.subr.bf16.mxu1 %v7844_v16  ;;  %v230_v3 = vld [vmem:[#allocation7 + $0x468] sm:$0xff]  ;;  %9783 = vst [vmem:[#allocation116_spill] sm:$0xff] %v7859_v5  ;;  %9788 = vst [vmem:[#allocation121_spill] sm:$0xff] %v7874_v0 }
  0xbe   :  { %4715 = vmatprep.subr.bf16.mxu0 %v7838_v25  ;;  %v273_v25 = vld [vmem:[#allocation7 + $0x5c0] sm:$0xff]  ;;  %v7865_v16 = vpack.c.bf16 %v230_v3, %v221_v42  ;;  %v300_v42 = vld [vmem:[#allocation7 + $0x698] sm:$0xff]  ;;  %v310_v3 = vld [vmem:[#allocation7 + $0x6e8] sm:$0xff]  ;;  %9790 = vst [vmem:[#allocation123_spill] sm:$0xff] %v7880_v19 }
  0xbf   :  { %v7871_v46 = vpack.c.bf16 %v282_v27, %v273_v25  ;;  %v276_v25 = vld [vmem:[#allocation7 + $0x5d8] sm:$0xff]  ;;  %v285_v27 = vld [vmem:[#allocation7 + $0x620] sm:$0xff]  ;;  %v7886_v45 = vpack.c.bf16 %v319_v55, %v310_v3 }
  0xc0   :  { %4773 = vmatpush1.bf16.msra.mxu1 %v7853_v12  ;;  %9785 = vst [vmem:[#allocation118_spill] sm:$0xff] %v7865_v16  ;;  %v257_v12 = vld [vmem:[#allocation7 + $0x540] sm:$0xff]  ;;  %v7892_v47 = vpack.c.bf16 %v285_v27, %v276_v25  ;;  %v355_v25 = vld [vmem:[#allocation7 + $0x850] sm:$0xff] }
  0xc1   :  { %4717 = vmatpush1.bf16.msra.mxu0 %v7847_v29  ;;  %4775 = vmatprep.subr.bf16.mxu1 %v7856_v13  ;;  %v248_v29 = vld [vmem:[#allocation7 + $0x4f8] sm:$0xff]  ;;  %9787 = vst [vmem:[#allocation120_spill] sm:$0xff] %v7871_v46  ;;  %9792 = vst [vmem:[#allocation125_spill] sm:$0xff] %v7886_v45 }
  0xc2   :  { %4719 = vmatprep.subr.bf16.mxu0 %v7850_v2  ;;  %v291_v2 = vld [vmem:[#allocation7 + $0x650] sm:$0xff]  ;;  %v7877_v13 = vpack.c.bf16 %v248_v29, %v239_v22  ;;  %v318_v22 = vld [vmem:[#allocation7 + $0x728] sm:$0xff]  ;;  %v328_v29 = vld [vmem:[#allocation7 + $0x778] sm:$0xff]  ;;  %9794 = vst [vmem:[#allocation127_spill] sm:$0xff] %v7892_v47 }
  0xc3   :  { %v7883_v57 = vpack.c.bf16 %v300_v42, %v291_v2  ;;  %v294_v2 = vld [vmem:[#allocation7 + $0x668] sm:$0xff]  ;;  %v303_v42 = vld [vmem:[#allocation7 + $0x6b0] sm:$0xff]  ;;  %v7898_v55 = vpack.c.bf16 %v337_v49, %v328_v29 }
  0xc4   :  { %4777 = vmatpush1.bf16.msra.mxu1 %v7865_v16  ;;  %9789 = vst [vmem:[#allocation122_spill] sm:$0xff] %v7877_v13  ;;  %v275_v16 = vld [vmem:[#allocation7 + $0x5d0] sm:$0xff]  ;;  %v7904_v27 = vpack.c.bf16 %v303_v42, %v294_v2  ;;  %v373_v2 = vld [vmem:[#allocation7 + $0x8e0] sm:$0xff] }
  0xc5   :  { %4721 = vmatpush1.bf16.msra.mxu0 %v7859_v5  ;;  %4779 = vmatprep.subr.bf16.mxu1 %v7868_v21  ;;  %v266_v5 = vld [vmem:[#allocation7 + $0x588] sm:$0xff]  ;;  %9791 = vst [vmem:[#allocation124_spill] sm:$0xff] %v7883_v57  ;;  %9796 = vst [vmem:[#allocation129_spill] sm:$0xff] %v7898_v55 }
  0xc6   :  { %4723 = vmatprep.subr.bf16.mxu0 %v7862_v56  ;;  %v309_v56 = vld [vmem:[#allocation7 + $0x6e0] sm:$0xff]  ;;  %v7889_v21 = vpack.c.bf16 %v266_v5, %v257_v12  ;;  %v336_v12 = vld [vmem:[#allocation7 + $0x7b8] sm:$0xff]  ;;  %v346_v5 = vld [vmem:[#allocation7 + $0x808] sm:$0xff]  ;;  %9798 = vst [vmem:[#allocation131_spill] sm:$0xff] %v7904_v27 }
  0xc7   :  { %v7895_v3 = vpack.c.bf16 %v318_v22, %v309_v56  ;;  %v312_v56 = vld [vmem:[#allocation7 + $0x6f8] sm:$0xff]  ;;  %v321_v22 = vld [vmem:[#allocation7 + $0x740] sm:$0xff]  ;;  %v7910_v49 = vpack.c.bf16 %v355_v25, %v346_v5 }
  0xc8   :  { %4781 = vmatpush1.bf16.msra.mxu1 %v7877_v13  ;;  %9793 = vst [vmem:[#allocation126_spill] sm:$0xff] %v7889_v21  ;;  %v293_v13 = vld [vmem:[#allocation7 + $0x660] sm:$0xff]  ;;  %v7916_v42 = vpack.c.bf16 %v321_v22, %v312_v56  ;;  %v250_v56 = vld [vmem:[#allocation7 + $0x508] sm:$0xff] }
  0xc9   :  { %4725 = vmatpush1.bf16.msra.mxu0 %v7871_v46  ;;  %4783 = vmatprep.subr.bf16.mxu1 %v7880_v19  ;;  %v284_v46 = vld [vmem:[#allocation7 + $0x618] sm:$0xff]  ;;  %9795 = vst [vmem:[#allocation128_spill] sm:$0xff] %v7895_v3  ;;  %9800 = vst [vmem:[#allocation133_spill] sm:$0xff] %v7910_v49 }
  0xca   :  { %4727 = vmatprep.subr.bf16.mxu0 %v7874_v0  ;;  %v327_v0 = vld [vmem:[#allocation7 + $0x770] sm:$0xff]  ;;  %v7901_v19 = vpack.c.bf16 %v284_v46, %v275_v16  ;;  %v354_v16 = vld [vmem:[#allocation7 + $0x848] sm:$0xff]  ;;  %v364_v46 = vld [vmem:[#allocation7 + $0x898] sm:$0xff]  ;;  %9802 = vst [vmem:[#allocation135_spill] sm:$0xff] %v7916_v42 }
  0xcb   :  { %v7907_v29 = vpack.c.bf16 %v336_v12, %v327_v0  ;;  %v330_v0 = vld [vmem:[#allocation7 + $0x788] sm:$0xff]  ;;  %v339_v12 = vld [vmem:[#allocation7 + $0x7d0] sm:$0xff]  ;;  %v7922_v25 = vpack.c.bf16 %v373_v2, %v364_v46 }
  0xcc   :  { %4785 = vmatpush1.bf16.msra.mxu1 %v7889_v21  ;;  %9797 = vst [vmem:[#allocation130_spill] sm:$0xff] %v7901_v19  ;;  %v311_v21 = vld [vmem:[#allocation7 + $0x6f0] sm:$0xff]  ;;  %v7928_v22 = vpack.c.bf16 %v339_v12, %v330_v0  ;;  %v268_v0 = vld [vmem:[#allocation7 + $0x598] sm:$0xff] }
  0xcd   :  { %4729 = vmatpush1.bf16.msra.mxu0 %v7883_v57  ;;  %4787 = vmatprep.subr.bf16.mxu1 %v7892_v47  ;;  %v302_v57 = vld [vmem:[#allocation7 + $0x6a8] sm:$0xff]  ;;  %9799 = vst [vmem:[#allocation132_spill] sm:$0xff] %v7907_v29  ;;  %9804 = vst [vmem:[#allocation137_spill] sm:$0xff] %v7922_v25 }
  0xce   :  { %4731 = vmatprep.subr.bf16.mxu0 %v7886_v45  ;;  %v345_v45 = vld [vmem:[#allocation7 + $0x800] sm:$0xff]  ;;  %v7913_v47 = vpack.c.bf16 %v302_v57, %v293_v13  ;;  %v372_v13 = vld [vmem:[#allocation7 + $0x8d8] sm:$0xff]  ;;  %9806 = vst [vmem:[#allocation139_spill] sm:$0xff] %v7928_v22 }
  0xcf   :  { %v7919_v5 = vpack.c.bf16 %v354_v16, %v345_v45  ;;  %v241_v57 = vld [vmem:[#allocation7 + $0x4c0] sm:$0xff]  ;;  %v348_v45 = vld [vmem:[#allocation7 + $0x818] sm:$0xff] }
  0xd0   :  { %4789 = vmatpush1.bf16.msra.mxu1 %v7901_v19  ;;  %9801 = vst [vmem:[#allocation134_spill] sm:$0xff] %v7913_v47  ;;  %v329_v19 = vld [vmem:[#allocation7 + $0x780] sm:$0xff]  ;;  %v7934_v2 = vpack.c.bf16 %v250_v56, %v241_v57 }
  0xd1   :  { %4733 = vmatpush1.bf16.msra.mxu0 %v7895_v3  ;;  %4791 = vmatprep.subr.bf16.mxu1 %v7904_v27  ;;  %v320_v3 = vld [vmem:[#allocation7 + $0x738] sm:$0xff]  ;;  %9803 = vst [vmem:[#allocation136_spill] sm:$0xff] %v7919_v5  ;;  %v357_v16 = vld [vmem:[#allocation7 + $0x860] sm:$0xff] }
  0xd2   :  { %4735 = vmatprep.subr.bf16.mxu0 %v7898_v55  ;;  %v363_v55 = vld [vmem:[#allocation7 + $0x890] sm:$0xff]  ;;  %v7925_v27 = vpack.c.bf16 %v320_v3, %v311_v21  ;;  %9808 = vst [vmem:[#allocation141_spill] sm:$0xff] %v7934_v2  ;;  %v106_v21 = vld [vmem:[#allocation7 + $0x88] sm:$0xff]  ;;  %v7940_v12 = vpack.c.bf16 %v357_v16, %v348_v45 }
  0xd3   :  { %v7931_v46 = vpack.c.bf16 %v372_v13, %v363_v55  ;;  %v259_v3 = vld [vmem:[#allocation7 + $0x550] sm:$0xff]  ;;  %v366_v55 = vld [vmem:[#allocation7 + $0x8a8] sm:$0xff] }
  0xd4   :  { %4793 = vmatpush1.bf16.msra.mxu1 %v7913_v47  ;;  %9805 = vst [vmem:[#allocation138_spill] sm:$0xff] %v7925_v27  ;;  %9810 = vst [vmem:[#allocation143_spill] sm:$0xff] %v7940_v12  ;;  %v347_v47 = vld [vmem:[#allocation7 + $0x810] sm:$0xff]  ;;  %v7946_v56 = vpack.c.bf16 %v268_v0, %v259_v3  ;;  %v286_v45 = vld [vmem:[#allocation7 + $0x628] sm:$0xff] }
  0xd5   :  { %4737 = vmatpush1.bf16.msra.mxu0 %v7907_v29  ;;  %4795 = vmatprep.subr.bf16.mxu1 %v7916_v42  ;;  %v338_v29 = vld [vmem:[#allocation7 + $0x7c8] sm:$0xff]  ;;  %9807 = vst [vmem:[#allocation140_spill] sm:$0xff] %v7931_v46  ;;  %v375_v13 = vld [vmem:[#allocation7 + $0x8f0] sm:$0xff] }
  0xd6   :  { %4739 = vmatprep.subr.bf16.mxu0 %v7910_v49  ;;  %v97_v49 = vld [vmem:[#allocation7 + $0x40] sm:$0xff]  ;;  %v7937_v42 = vpack.c.bf16 %v338_v29, %v329_v19  ;;  %9812 = vst [vmem:[#allocation145_spill] sm:$0xff] %v7946_v56  ;;  %v124_v19 = vld [vmem:[#allocation7 + $0x118] sm:$0xff]  ;;  %v7952_v16 = vpack.c.bf16 %v375_v13, %v366_v55  ;;  %v295_v0 = vld [vmem:[#allocation7 + $0x670] sm:$0xff] }
  0xd7   :  { %v7943_v57 = vpack.c.bf16 %v106_v21, %v97_v49  ;;  %v277_v29 = vld [vmem:[#allocation7 + $0x5e0] sm:$0xff]  ;;  %v304_v55 = vld [vmem:[#allocation7 + $0x6b8] sm:$0xff] }
  0xd8   :  { %4797 = vmatpush1.bf16.msra.mxu1 %v7925_v27  ;;  %9809 = vst [vmem:[#allocation142_spill] sm:$0xff] %v7937_v42  ;;  %9814 = vst [vmem:[#allocation147_spill] sm:$0xff] %v7952_v16  ;;  %v365_v27 = vld [vmem:[#allocation7 + $0x8a0] sm:$0xff]  ;;  %v7960_v21 = vpack.c.bf16 %v286_v45, %v277_v29  ;;  %v7970_v13 = vpack.c.bf16 %v304_v55, %v295_v0  ;;  %v160_v29 = vld [vmem:[#allocation7 + $0x238] sm:$0xff] }
  0xd9   :  { %4741 = vmatpush1.bf16.msra.mxu0 %v7919_v5  ;;  %4799 = vmatprep.subr.bf16.mxu1 %v7928_v22  ;;  %v356_v5 = vld [vmem:[#allocation7 + $0x858] sm:$0xff]  ;;  %9811 = vst [vmem:[#allocation144_spill] sm:$0xff] %v7943_v57  ;;  %v313_v45 = vld [vmem:[#allocation7 + $0x700] sm:$0xff]  ;;  %v331_v0 = vld [vmem:[#allocation7 + $0x790] sm:$0xff] }
  0xda   :  { %4743 = vmatprep.subr.bf16.mxu0 %v7922_v25  ;;  %v115_v25 = vld [vmem:[#allocation7 + $0xd0] sm:$0xff]  ;;  %v7949_v22 = vpack.c.bf16 %v356_v5, %v347_v47  ;;  %9816 = vst [vmem:[#allocation149_spill] sm:$0xff] %v7960_v21  ;;  %v133_v47 = vld [vmem:[#allocation7 + $0x160] sm:$0xff]  ;;  %v142_v5 = vld [vmem:[#allocation7 + $0x1a8] sm:$0xff] }
  0xdb   :  { %v7956_v49 = vpack.c.bf16 %v124_v19, %v115_v25  ;;  %v7967_v25 = vpack.c.bf16 %v142_v5, %v133_v47  ;;  %9819 = vst [vmem:[#allocation152_spill] sm:$0xff] %v7970_v13  ;;  %v151_v19 = vld [vmem:[#allocation7 + $0x1f0] sm:$0xff]  ;;  %v169_v47 = vld [vmem:[#allocation7 + $0x280] sm:$0xff]  ;;  %v178_v5 = vld [vmem:[#allocation7 + $0x2c8] sm:$0xff] }
  0xdc   :  { %4801 = vmatpush1.bf16.msra.mxu1 %v7937_v42  ;;  %9813 = vst [vmem:[#allocation146_spill] sm:$0xff] %v7949_v22  ;;  %v340_v55 = vld [vmem:[#allocation7 + $0x7d8] sm:$0xff] }
  0xdd   :  { %4745 = vmatpush1.bf16.msra.mxu0 %v7931_v46  ;;  %4803 = vmatprep.subr.bf16.mxu1 %v7940_v12  ;;  %v374_v46 = vld [vmem:[#allocation7 + $0x8e8] sm:$0xff]  ;;  %9815 = vst [vmem:[#allocation148_spill] sm:$0xff] %v7956_v49  ;;  %9818 = vst [vmem:[#allocation151_spill] sm:$0xff] %v7967_v25 }
  0xde   :  { %4811 = vmatprep.subr.bf16.mxu0 %v7934_v2  ;;  %v7963_v3 = vpack.c.bf16 %v374_v46, %v365_v27  ;;  %v7975_v27 = vpack.c.bf16 %v160_v29, %v151_v19  ;;  %v7985_v19 = vpack.c.bf16 %v178_v5, %v169_v47  ;;  %v7988_v29 = vpack.c.bf16 %v340_v55, %v331_v0  ;;  %v205_v5 = vld [vmem:[#allocation7 + $0x3a0] sm:$0xff]  ;;  %v367_v0 = vld [vmem:[#allocation7 + $0x8b0] sm:$0xff]  ;;  %v376_v55 = vld [vmem:[#allocation7 + $0x8f8] sm:$0xff] }
  0xe0   :  { %590 = vmatmul.mubr.f32.vlgmr.msra.gmra.mrb[2].mxu0 %v9750_v40  ;;  %4805 = vmatpush1.bf16.msra.mxu1 %v7949_v22  ;;  %9817 = vst [vmem:[#allocation150_spill] sm:$0xff] %v7963_v3  ;;  %9820 = vst [vmem:[#allocation153_spill] sm:$0xff] %v7975_v27 }
  0xe1   :  { %4813 = vmatpush3.bf16.msra.mxu0 %v7943_v57  ;;  %731 = vmatprep.mubr.f32.mxu0 %v9750_v40  ;;  %9822 = vst [vmem:[#allocation155_spill] sm:$0xff] %v7985_v19  ;;  %9823 = vst [vmem:[#allocation156_spill] sm:$0xff] %v7988_v29 }
  0xe2   :  { %4815 = vmatprep.subr.bf16.mxu0 %v7946_v56  ;;  %4807 = vmatprep.subr.bf16.mxu1 %v7952_v16  ;;  %v322_v56 = vld [vmem:[#allocation7 + $0x748] sm:$0xff] }
  0xe3   :  { %v7979_v46 = vpack.c.bf16 %v322_v56, %v313_v45  ;;  %v187_v56 = vld [vmem:[#allocation7 + $0x310] sm:$0xff]  ;;  %v196_v45 = vld [vmem:[#allocation7 + $0x358] sm:$0xff] }
  0xe4   :  { %4809 = vmatpush1.bf16.msra.mxu1 %v7963_v3 }
  0xe5   :  { %4817 = vmatpush3.bf16.msra.mxu0 %v7956_v49  ;;  %4843 = vmatprep.subr.bf16.mxu1 %v7564_v4  ;;  %9821 = vst [vmem:[#allocation154_spill] sm:$0xff] %v7979_v46 }
  0xe6   :  { %4819 = vmatprep.subr.bf16.mxu0 %v7960_v21  ;;  %v7993_v21 = vpack.c.bf16 %v196_v45, %v187_v56  ;;  %v8004_v56 = vpack.c.bf16 %v376_v55, %v367_v0  ;;  %v223_v45 = vld [vmem:[#allocation7 + $0x430] sm:$0xff]  ;;  %v9834_v55 = vld [vmem:[#allocation59_spill] sm:$0xff] }
  0xe7   :  { %661 = vmatmul.mubr.f32.vlgmr.msra.gmra.mrb[2].mxu1 %v9750_v40  ;;  %v9833_v0 = vld [vmem:[#allocation58_spill] sm:$0xff] }
  0xe8   :  { %4845 = vmatpush1.bf16.msra.mxu1 %v7566_v8  ;;  %892 = vmatprep.mubr.f32.mxu1 %v9750_v40  ;;  %9824 = vst [vmem:[#allocation157_spill] sm:$0xff] %v7993_v21  ;;  %9827 = vst [vmem:[#allocation160_spill] sm:$0xff] %v8004_v56 }
  0xe9   :  { %4821 = vmatpush3.bf16.msra.mxu0 %v7967_v25  ;;  %4847 = vmatprep.subr.bf16.mxu1 %v7568_v9  ;;  %v358_v25 = vld [vmem:[#allocation7 + $0x868] sm:$0xff] }
  0xea   :  { %4823 = vmatprep.subr.bf16.mxu0 %v7970_v13  ;;  %v349_v13 = vld [vmem:[#allocation7 + $0x820] sm:$0xff] }
  0xeb   :  { %v7996_v47 = vpack.c.bf16 %v358_v25, %v349_v13  ;;  %v9829_v13 = vld [vmem:[#allocation54_spill] sm:$0xff] }
  0xec   :  { %4849 = vmatpush1.bf16.msra.mxu1 %v7572_v14 }
  0xed   :  { %4825 = vmatpush3.bf16.msra.mxu0 %v7975_v27  ;;  %4851 = vmatprep.subr.bf16.mxu1 %v7575_v15  ;;  %9825 = vst [vmem:[#allocation158_spill] sm:$0xff] %v7996_v47 }
  0xee   :  { %4827 = vmatprep.subr.bf16.mxu0 %v7979_v46  ;;  %v214_v46 = vld [vmem:[#allocation7 + $0x3e8] sm:$0xff] }
  0xef   :  { %v8001_v27 = vpack.c.bf16 %v214_v46, %v205_v5  ;;  %v9830_v46 = vld [vmem:[#allocation55_spill] sm:$0xff]  ;;  %v9832_v5 = vld [vmem:[#allocation69_spill] sm:$0xff] }
  0xf0   :  { %4853 = vmatpush1.bf16.msra.mxu1 %v7578_v20 }
  0xf1   :  { %4829 = vmatpush3.bf16.msra.mxu0 %v7985_v19  ;;  %4855 = vmatprep.subr.bf16.mxu1 %v7581_v23  ;;  %9826 = vst [vmem:[#allocation159_spill] sm:$0xff] %v8001_v27 }
  0xf2   :  { %4831 = vmatprep.subr.bf16.mxu0 %v7988_v29  ;;  %v232_v29 = vld [vmem:[#allocation7 + $0x478] sm:$0xff] }
  0xf3   :  { %v8009_v25 = vpack.c.bf16 %v232_v29, %v223_v45  ;;  %v9831_v29 = vld [vmem:[#allocation68_spill] sm:$0xff] }
  0xf4   :  { %4857 = vmatpush1.bf16.msra.mxu1 %v7588_v32  ;;  %v9835_v45 = vld [vmem:[#allocation72_spill] sm:$0xff] }
  0xf5   :  { %4833 = vmatpush3.bf16.msra.mxu0 %v7993_v21  ;;  %4859 = vmatprep.subr.bf16.mxu1 %v7592_v36  ;;  %9828 = vst [vmem:[#allocation161_spill] sm:$0xff] %v8009_v25 }
  0xf6   :  { %4835 = vmatprep.subr.bf16.mxu0 %v7996_v47 }
  0xf8   :  { %4861 = vmatpush1.bf16.msra.mxu1 %v7601_v48 }
  0xf9   :  { %4837 = vmatpush3.bf16.msra.mxu0 %v8001_v27  ;;  %4863 = vmatprep.subr.bf16.mxu1 %v7606_v52 }
  0xfa   :  { %4839 = vmatprep.subr.bf16.mxu0 %v8004_v56 }
  0xfc   :  { %4865 = vmatpush1.bf16.msra.mxu1 %v7615_v61 }
  0xfd   :  { %4841 = vmatpush3.bf16.msra.mxu0 %v8009_v25  ;;  %4867 = vmatprep.subr.bf16.mxu1 %v7618_v1 }
  0xfe   :  { %4907 = vmatprep.subr.bf16.mxu0 %v7583_v28 }
 0x100   :  { %732 = vmatmul.mubr.f32.vlgmr.msra.gmra.mrb[4].mxu0 %v9750_v40  ;;  %4869 = vmatpush1.bf16.msra.mxu1 %v7627_v17 }
 0x101   :  { %4909 = vmatpush1.bf16.msra.mxu0 %v7585_v31  ;;  %963 = vmatprep.mubr.f32.mxu0 %v9750_v40 }
 0x102   :  { %4911 = vmatprep.subr.bf16.mxu0 %v7595_v39  ;;  %4871 = vmatprep.subr.bf16.mxu1 %v7630_v18 }
 0x104   :  { %4873 = vmatpush1.bf16.msra.mxu1 %v7639_v34 }
 0x105   :  { %4913 = vmatpush1.bf16.msra.mxu0 %v7597_v43  ;;  %4875 = vmatprep.subr.bf16.mxu1 %v7642_v35 }
 0x106   :  { %4915 = vmatprep.subr.bf16.mxu0 %v7603_v51 }
 0x108   :  { %4877 = vmatpush1.bf16.msra.mxu1 %v7651_v50 }
 0x109   :  { %4917 = vmatpush1.bf16.msra.mxu0 %v7609_v54  ;;  %4879 = vmatprep.subr.bf16.mxu1 %v7654_v53 }
 0x10a   :  { %4919 = vmatprep.subr.bf16.mxu0 %v7612_v58 }
 0x10c   :  { %4881 = vmatpush1.bf16.msra.mxu1 %v7663_v7 }
 0x10d   :  { %4921 = vmatpush1.bf16.msra.mxu0 %v7621_v6  ;;  %4883 = vmatprep.subr.bf16.mxu1 %v7666_v11 }
 0x10e   :  { %4923 = vmatprep.subr.bf16.mxu0 %v7624_v10 }
 0x110   :  { %4885 = vmatpush1.bf16.msra.mxu1 %v7675_v33 }
 0x111   :  { %4925 = vmatpush1.bf16.msra.mxu0 %v7633_v24  ;;  %4887 = vmatprep.subr.bf16.mxu1 %v7678_v37 }
 0x112   :  { %4927 = vmatprep.subr.bf16.mxu0 %v7636_v26 }
 0x114   :  { %4889 = vmatpush1.bf16.msra.mxu1 %v7687_v60 }
 0x115   :  { %4929 = vmatpush1.bf16.msra.mxu0 %v7645_v41  ;;  %4891 = vmatprep.subr.bf16.mxu1 %v7690_v63  ;;  %v9839_v41 = vld [vmem:[#allocation76_spill] sm:$0xff] }
 0x116   :  { %4931 = vmatprep.subr.bf16.mxu0 %v7648_v44  ;;  %v9838_v44 = vld [vmem:[#allocation63_spill] sm:$0xff]  ;;  %v8072_v63 = vld [vmem:[#allocation10] ss:$0 sm:$0xff] }
 0x117   :  { %9853 = vst [vmem:[#allocation162_spill] sm:$0xff] %v8072_v63 }
 0x118   :  { %4893 = vmatpush1.bf16.msra.mxu1 %v7699_v30  ;;  %v757_v30 = vld [vmem:[#allocation4 + $0x8] sm:$0xff] }
 0x119   :  { %4933 = vmatpush1.bf16.msra.mxu0 %v7657_v59  ;;  %4895 = vmatprep.subr.bf16.mxu1 %v7702_v38  ;;  %v9836_v59 = vld [vmem:[#allocation73_spill] sm:$0xff] }
 0x11a   :  { %4935 = vmatprep.subr.bf16.mxu0 %v7660_v62  ;;  %v9837_v62 = vld [vmem:[#allocation62_spill] sm:$0xff] }
 0x11c   :  { %4897 = vmatpush1.bf16.msra.mxu1 %v9831_v29  ;;  %v9842_v29 = vld [vmem:[#allocation67_spill] sm:$0xff] }
 0x11d   :  { %4937 = vmatpush1.bf16.msra.mxu0 %v9829_v13  ;;  %4899 = vmatprep.subr.bf16.mxu1 %v9832_v5  ;;  %v9840_v13 = vld [vmem:[#allocation78_spill] sm:$0xff] }
 0x11e   :  { %4939 = vmatprep.subr.bf16.mxu0 %v9830_v46  ;;  %v9841_v46 = vld [vmem:[#allocation66_spill] sm:$0xff] }
 0x11f   :  { %v9843_v5 = vld [vmem:[#allocation70_spill] sm:$0xff] }
 0x120   :  { %4901 = vmatpush1.bf16.msra.mxu1 %v9835_v45  ;;  %v9846_v45 = vld [vmem:[#allocation75_spill] sm:$0xff] }
 0x121   :  { %4941 = vmatpush1.bf16.msra.mxu0 %v9833_v0  ;;  %4903 = vmatprep.subr.bf16.mxu1 %v9836_v59  ;;  %v9844_v0 = vld [vmem:[#allocation71_spill] sm:$0xff]  ;;  %v9847_v59 = vld [vmem:[#allocation77_spill] sm:$0xff] }
 0x122   :  { %4943 = vmatprep.subr.bf16.mxu0 %v9834_v55  ;;  %v9845_v55 = vld [vmem:[#allocation74_spill] sm:$0xff] }
 0x124   :  { %4905 = vmatpush1.bf16.msra.mxu1 %v9839_v41  ;;  %v9850_v41 = vld [vmem:[#allocation83_spill] sm:$0xff] }
 0x125   :  { %4945 = vmatpush1.bf16.msra.mxu0 %v9837_v62  ;;  %4971 = vmatprep.subr.bf16.mxu1 %v9840_v13  ;;  %v9848_v62 = vld [vmem:[#allocation79_spill] sm:$0xff]  ;;  %v9851_v13 = vld [vmem:[#allocation85_spill] sm:$0xff] }
 0x126   :  { %4947 = vmatprep.subr.bf16.mxu0 %v9838_v44  ;;  %v9849_v44 = vld [vmem:[#allocation81_spill] sm:$0xff] }
 0x129   :  { %4949 = vmatpush1.bf16.msra.mxu0 %v9841_v46  ;;  %v9852_v46 = vld [vmem:[#allocation87_spill] sm:$0xff] }
 0x12a   :  { %4951 = vmatprep.subr.bf16.mxu0 %v9842_v29  ;;  %v756_v29 = vld [vmem:[#allocation4] sm:$0xff] }
 0x12d   :  { %4953 = vmatpush1.bf16.msra.mxu0 %v9843_v5 }
 0x12e   :  { %4955 = vmatprep.subr.bf16.mxu0 %v9844_v0 }
 0x131   :  { %4957 = vmatpush1.bf16.msra.mxu0 %v9845_v55 }
 0x132   :  { %4959 = vmatprep.subr.bf16.mxu0 %v9846_v45 }
 0x135   :  { %4961 = vmatpush1.bf16.msra.mxu0 %v9847_v59 }
 0x136   :  { %4963 = vmatprep.subr.bf16.mxu0 %v9848_v62 }
 0x139   :  { %4965 = vmatpush1.bf16.msra.mxu0 %v9849_v44 }
 0x13a   :  { %4967 = vmatprep.subr.bf16.mxu0 %v9850_v41 }
 0x13d   :  { %4969 = vmatpush1.bf16.msra.mxu0 %v9851_v13 }
 0x13e   :  { %5035 = vmatprep.subr.bf16.mxu0 %v9852_v46 }
 0x173   :  { %v449_v5 = vpop.f32.mrb[0].mxu0 }
 0x174   :  { %v759_v38 = vadd.f32 %v756_v29, %v449_v5  ;;  %v451_v0 = vpop.f32.mrb[1].mxu0  ;;  %v758_v29 = vld [vmem:[#allocation4 + $0x10] sm:$0xff] }
 0x175   :  { %v760_v26 = vadd.f32 %v757_v30, %v451_v0 }
 0x176   :  { %v4201_v55 = vmul.f32 -1.442695, %v759_v38 }
 0x177   :  { %v4202_v45 = vmul.f32 -1.442695, %v760_v26 }
 0x178   :  { %7157 = vpow2.f32 %v4201_v55 }
 0x179   :  { %7159 = vpow2.f32 %v4202_v45 }
 0x17a   :  { %v520_v59 = vpop.f32.mrb[0].mxu1 }
 0x17b   :  { %v522_v24 = vpop.f32.mrb[1].mxu1  ;;  %v779_v46 = vadd.f32 %v8072_v63, %v520_v59  ;;  %v9856_v59 = vld [vmem:[#allocation82_spill] sm:$0xff] }
 0x182   :  { %v7158_v62 = vpop.eup %7157 }
 0x183   :  { %v767_v44 = vadd.f32 1.0, %v7158_v62  ;;  %v7160_v41 = vpop.eup %7159  ;;  %v9857_v62 = vld [vmem:[#allocation91_spill] sm:$0xff] }
 0x184   :  { %v768_v13 = vadd.f32 1.0, %v7160_v41  ;;  %v9854_v41 = vld [vmem:[#allocation80_spill] sm:$0xff] }
 0x185   :  { %7161 = vrcp.f32 %v767_v44  ;;  %v9855_v44 = vld [vmem:[#allocation90_spill] sm:$0xff] }
 0x186   :  { %7163 = vrcp.f32 %v768_v13  ;;  %v9859_v13 = vld [vmem:[#allocation94_spill] sm:$0xff] }
 0x18f   :  { %v7162_v60 = vpop.eup %7161 }
 0x190   :  { %v780_v5 = vmul.f32 %v7162_v60, %v779_v46  ;;  %v7164_v30 = vpop.eup %7163  ;;  %v9858_v60 = vld [vmem:[#allocation84_spill] sm:$0xff]  ;;  %v9860_v46 = vld [vmem:[#allocation86_spill] sm:$0xff] }
 0x191   :  { %v783_v26 = vsub.f32 1.0, %v7164_v30  ;;  %v785_v24 = vmul.f32 0.0, %v7164_v30  ;;  %v9864_v30 = vld [vmem:[#allocation89_spill] sm:$0xff] }
 0x192   :  { %v781_v38 = vadd.f32 %v780_v5, %v758_v29  ;;  %v9861_v29 = vld [vmem:[#allocation95_spill] sm:$0xff]  ;;  %v9862_v5 = vld [vmem:[#allocation88_spill] sm:$0xff] }
 0x194   :  { %7165 = vtanh.f32 %v781_v38  ;;  %v9863_v38 = vld [vmem:[#allocation98_spill] sm:$0xff] }
 0x19e   :  { %v7166_v0 = vpop.eup %7165 }
 0x19f   :  { %v784_v55 = vmul.f32 %v7166_v0, %v783_v26  ;;  %v9865_v26 = vld [vmem:[#allocation99_spill] sm:$0xff]  ;;  %v9866_v0 = vld [vmem:[#allocation92_spill] sm:$0xff] }
 0x1a1   :  { %v8075_v45 = vadd.f32 %v785_v24, %v784_v55  ;;  %v9867_v24 = vld [vmem:[#allocation102_spill] sm:$0xff]  ;;  %v9868_v55 = vld [vmem:[#allocation93_spill] sm:$0xff] }
 0x1a3   :  { %893 = vmatmul.mubr.f32.vlgmr.msra.gmra.mrb[4].mxu1 %v8075_v45  ;;  %964 = vmatmul.mubr.f32.vlgmr.msra.gmra.mrb[6].mxu0 %v8075_v45 }
 0x1a4   :  { %4973 = vmatpush1.bf16.msra.mxu1 %v9854_v41  ;;  %5037 = vmatpush1.bf16.msra.mxu0 %v9855_v44 }
 0x1a5   :  { %4975 = vmatprep.subr.bf16.mxu1 %v9856_v59  ;;  %5039 = vmatprep.subr.bf16.mxu0 %v9857_v62  ;;  %v9872_v62 = vld [vmem:[#allocation97_spill] sm:$0xff] }
 0x1a6   :  { %1034 = vmatprep.mubr.f32.mxu1 %v9750_v40  ;;  %1105 = vmatprep.mubr.f32.mxu0 %v9750_v40 }
 0x1a8   :  { %4977 = vmatpush1.bf16.msra.mxu1 %v9858_v60  ;;  %5041 = vmatpush1.bf16.msra.mxu0 %v9859_v13  ;;  %v9869_v60 = vld [vmem:[#allocation103_spill] sm:$0xff] }
 0x1a9   :  { %4979 = vmatprep.subr.bf16.mxu1 %v9860_v46  ;;  %5043 = vmatprep.subr.bf16.mxu0 %v9861_v29  ;;  %v9870_v46 = vld [vmem:[#allocation96_spill] sm:$0xff]  ;;  %v9871_v29 = vld [vmem:[#allocation106_spill] sm:$0xff] }
 0x1ac   :  { %4981 = vmatpush1.bf16.msra.mxu1 %v9862_v5  ;;  %5045 = vmatpush1.bf16.msra.mxu0 %v9863_v38  ;;  %v9873_v38 = vld [vmem:[#allocation107_spill] sm:$0xff] }
 0x1ad   :  { %4983 = vmatprep.subr.bf16.mxu1 %v9864_v30  ;;  %5047 = vmatprep.subr.bf16.mxu0 %v9865_v26  ;;  %v9874_v30 = vld [vmem:[#allocation100_spill] sm:$0xff]  ;;  %v9875_v26 = vld [vmem:[#allocation110_spill] sm:$0xff] }
 0x1b0   :  { %4985 = vmatpush1.bf16.msra.mxu1 %v9866_v0  ;;  %5049 = vmatpush1.bf16.msra.mxu0 %v9867_v24  ;;  %v9876_v0 = vld [vmem:[#allocation101_spill] sm:$0xff]  ;;  %v9877_v24 = vld [vmem:[#allocation111_spill] sm:$0xff] }
 0x1b1   :  { %4987 = vmatprep.subr.bf16.mxu1 %v9868_v55  ;;  %5051 = vmatprep.subr.bf16.mxu0 %v9869_v60  ;;  %v9878_v55 = vld [vmem:[#allocation104_spill] sm:$0xff]  ;;  %v9880_v60 = vld [vmem:[#allocation105_spill] sm:$0xff] }
 0x1b3   :  { %v591_v13 = vpop.f32.mrb[2].mxu0 }
 0x1b4   :  { %4989 = vmatpush1.bf16.msra.mxu1 %v9870_v46  ;;  %5053 = vmatpush1.bf16.msra.mxu0 %v9871_v29  ;;  %v593_v5 = vpop.f32.mrb[3].mxu0  ;;  %v9879_v13 = vld [vmem:[#allocation114_spill] sm:$0xff]  ;;  %v9882_v29 = vld [vmem:[#allocation108_spill] sm:$0xff] }
 0x1b5   :  { %4991 = vmatprep.subr.bf16.mxu1 %v9872_v62  ;;  %5055 = vmatprep.subr.bf16.mxu0 %v9873_v38  ;;  %v9881_v5 = vld [vmem:[#allocation115_spill] sm:$0xff]  ;;  %v9883_v38 = vld [vmem:[#allocation118_spill] sm:$0xff] }
 0x1b8   :  { %4993 = vmatpush1.bf16.msra.mxu1 %v9874_v30  ;;  %5057 = vmatpush1.bf16.msra.mxu0 %v9875_v26  ;;  %v9884_v30 = vld [vmem:[#allocation109_spill] sm:$0xff]  ;;  %v9885_v26 = vld [vmem:[#allocation119_spill] sm:$0xff] }
 0x1b9   :  { %4995 = vmatprep.subr.bf16.mxu1 %v9876_v0  ;;  %5059 = vmatprep.subr.bf16.mxu0 %v9877_v24  ;;  %v9886_v0 = vld [vmem:[#allocation112_spill] sm:$0xff]  ;;  %v9887_v24 = vld [vmem:[#allocation122_spill] sm:$0xff] }
 0x1ba   :  { %v662_v46 = vpop.f32.mrb[2].mxu1 }
 0x1bb   :  { %v664_v62 = vpop.f32.mrb[3].mxu1  ;;  %v9889_v46 = vld [vmem:[#allocation123_spill] sm:$0xff] }
 0x1bc   :  { %4997 = vmatpush1.bf16.msra.mxu1 %v9878_v55  ;;  %5061 = vmatpush1.bf16.msra.mxu0 %v9879_v13  ;;  %v9888_v55 = vld [vmem:[#allocation113_spill] sm:$0xff] }
 0x1bd   :  { %4999 = vmatprep.subr.bf16.mxu1 %v9880_v60  ;;  %5063 = vmatprep.subr.bf16.mxu0 %v9881_v5  ;;  %v9890_v60 = vld [vmem:[#allocation116_spill] sm:$0xff]  ;;  %v9891_v5 = vld [vmem:[#allocation126_spill] sm:$0xff]  ;;  %v9892_v62 = vld [vmem:[#allocation117_spill] sm:$0xff] }
 0x1be   :  { %v9904_v13 = vld [vmem:[#allocation129_spill] sm:$0xff] }
 0x1c0   :  { %5001 = vmatpush1.bf16.msra.mxu1 %v9882_v29  ;;  %5065 = vmatpush1.bf16.msra.mxu0 %v9883_v38  ;;  %v9893_v29 = vld [vmem:[#allocation127_spill] sm:$0xff]  ;;  %v9894_v38 = vld [vmem:[#allocation120_spill] sm:$0xff] }
 0x1c1   :  { %5003 = vmatprep.subr.bf16.mxu1 %v9884_v30  ;;  %5067 = vmatprep.subr.bf16.mxu0 %v9885_v26  ;;  %v9895_v30 = vld [vmem:[#allocation130_spill] sm:$0xff]  ;;  %v9896_v26 = vld [vmem:[#allocation121_spill] sm:$0xff] }
 0x1c4   :  { %5005 = vmatpush1.bf16.msra.mxu1 %v9886_v0  ;;  %5069 = vmatpush1.bf16.msra.mxu0 %v9887_v24  ;;  %v9897_v0 = vld [vmem:[#allocation131_spill] sm:$0xff]  ;;  %v9898_v24 = vld [vmem:[#allocation124_spill] sm:$0xff] }
 0x1c5   :  { %5007 = vmatprep.subr.bf16.mxu1 %v9888_v55  ;;  %5071 = vmatprep.subr.bf16.mxu0 %v9889_v46  ;;  %v9899_v55 = vld [vmem:[#allocation134_spill] sm:$0xff]  ;;  %v9900_v46 = vld [vmem:[#allocation125_spill] sm:$0xff] }
 0x1c8   :  { %5009 = vmatpush1.bf16.msra.mxu1 %v9890_v60  ;;  %5073 = vmatpush1.bf16.msra.mxu0 %v9891_v5  ;;  %v9901_v60 = vld [vmem:[#allocation135_spill] sm:$0xff] }
 0x1c9   :  { %5011 = vmatprep.subr.bf16.mxu1 %v9892_v62  ;;  %5075 = vmatprep.subr.bf16.mxu0 %v9893_v29  ;;  %v9902_v62 = vld [vmem:[#allocation128_spill] sm:$0xff]  ;;  %v9903_v29 = vld [vmem:[#allocation138_spill] sm:$0xff] }
 0x1cc   :  { %5013 = vmatpush1.bf16.msra.mxu1 %v9894_v38  ;;  %5077 = vmatpush1.bf16.msra.mxu0 %v9895_v30  ;;  %v9905_v30 = vld [vmem:[#allocation139_spill] sm:$0xff] }
 0x1cd   :  { %5015 = vmatprep.subr.bf16.mxu1 %v9896_v26  ;;  %5079 = vmatprep.subr.bf16.mxu0 %v9897_v0  ;;  %v9906_v26 = vld [vmem:[#allocation132_spill] sm:$0xff] }
 0x1d0   :  { %5017 = vmatpush1.bf16.msra.mxu1 %v9898_v24  ;;  %5081 = vmatpush1.bf16.msra.mxu0 %v9899_v55  ;;  %v9907_v24 = vld [vmem:[#allocation133_spill] sm:$0xff] }
 0x1d1   :  { %5019 = vmatprep.subr.bf16.mxu1 %v9900_v46  ;;  %5083 = vmatprep.subr.bf16.mxu0 %v9901_v60  ;;  %v9908_v46 = vld [vmem:[#allocation136_spill] sm:$0xff] }
 0x1d3   :  { %v4271_v5 = vpop.f32.mrb[4].mxu0 }
 0x1d4   :  { %5021 = vmatpush1.bf16.msra.mxu1 %v9902_v62  ;;  %5085 = vmatpush1.bf16.msra.mxu0 %v9903_v29  ;;  %v4272_v38 = vpop.f32.mrb[5].mxu0  ;;  %v9909_v5 = vld [vmem:[#allocation137_spill] sm:$0xff] }
 0x1d5   :  { %5023 = vmatprep.subr.bf16.mxu1 %v9904_v13  ;;  %5087 = vmatprep.subr.bf16.mxu0 %v9905_v30  ;;  %v9910_v38 = vld [vmem:[#allocation140_spill] sm:$0xff] }
 0x1d8   :  { %5025 = vmatpush1.bf16.msra.mxu1 %v9906_v26  ;;  %5089 = vmatpush1.bf16.msra.mxu0 %v7937_v42 }
 0x1d9   :  { %5027 = vmatprep.subr.bf16.mxu1 %v9907_v24  ;;  %5091 = vmatprep.subr.bf16.mxu0 %v7940_v12 }
 0x1dc   :  { %5029 = vmatpush1.bf16.msra.mxu1 %v9908_v46  ;;  %5093 = vmatpush1.bf16.msra.mxu0 %v7949_v22  ;;  %v9911_v22 = vld [vmem:[#allocation145_spill] sm:$0xff] }
 0x1dd   :  { %5031 = vmatprep.subr.bf16.mxu1 %v9909_v5  ;;  %5095 = vmatprep.subr.bf16.mxu0 %v7952_v16 }
 0x1e0   :  { %5033 = vmatpush1.bf16.msra.mxu1 %v9910_v38  ;;  %5097 = vmatpush1.bf16.msra.mxu0 %v7963_v3  ;;  %v9912_v3 = vld [vmem:[#allocation149_spill] sm:$0xff] }
 0x1e1   :  { %5099 = vmatprep.subr.bf16.mxu1 %v7934_v2  ;;  %5131 = vmatprep.subr.bf16.mxu0 %v7564_v4  ;;  %v9913_v4 = vld [vmem:[#allocation151_spill] sm:$0xff]  ;;  %v9914_v2 = vld [vmem:[#allocation152_spill] sm:$0xff] }
 0x1e3   :  { %1035 = vmatmul.mubr.f32.vlgmr.msra.gmra.mrb[6].mxu1 %v8075_v45  ;;  %1106 = vmatmul.mubr.f32.vlgmr.msra.gmra.mrb[8].mxu0 %v8075_v45 }
 0x1e4   :  { %5101 = vmatpush3.bf16.msra.mxu1 %v7943_v57  ;;  %1176 = vmatprep.mubr.f32.mxu1 %v9750_v40  ;;  %v9915_v40 = vld [vmem:[#allocation153_spill] sm:$0xff] }
 0x1e5   :  { %5103 = vmatprep.subr.bf16.mxu1 %v9911_v22  ;;  %5133 = vmatpush1.bf16.msra.mxu0 %v7566_v8  ;;  %v9916_v8 = vld [vmem:[#allocation154_spill] sm:$0xff] }
 0x1e6   :  { %5135 = vmatprep.subr.bf16.mxu0 %v7568_v9 }
 0x1e8   :  { %5105 = vmatpush3.bf16.msra.mxu1 %v7956_v49 }
 0x1e9   :  { %5107 = vmatprep.subr.bf16.mxu1 %v9912_v3  ;;  %5137 = vmatpush1.bf16.msra.mxu0 %v7572_v14  ;;  %v9917_v14 = vld [vmem:[#allocation156_spill] sm:$0xff] }
 0x1ea   :  { %5139 = vmatprep.subr.bf16.mxu0 %v7575_v15 }
 0x1ec   :  { %5109 = vmatpush3.bf16.msra.mxu1 %v9913_v4 }
 0x1ed   :  { %5111 = vmatprep.subr.bf16.mxu1 %v9914_v2  ;;  %5141 = vmatpush1.bf16.msra.mxu0 %v7578_v20 }
 0x1ee   :  { %5143 = vmatprep.subr.bf16.mxu0 %v7581_v23 }
 0x1f0   :  { %5113 = vmatpush3.bf16.msra.mxu1 %v9915_v40 }
 0x1f1   :  { %5115 = vmatprep.subr.bf16.mxu1 %v9916_v8  ;;  %5145 = vmatpush1.bf16.msra.mxu0 %v7588_v32 }
 0x1f2   :  { %5147 = vmatprep.subr.bf16.mxu0 %v7592_v36 }
 0x1f4   :  { %5117 = vmatpush3.bf16.msra.mxu1 %v7985_v19 }
 0x1f5   :  { %5119 = vmatprep.subr.bf16.mxu1 %v9917_v14  ;;  %5149 = vmatpush1.bf16.msra.mxu0 %v7601_v48 }
 0x1f6   :  { %5151 = vmatprep.subr.bf16.mxu0 %v7606_v52 }
 0x1f8   :  { %5121 = vmatpush3.bf16.msra.mxu1 %v7993_v21 }
 0x1f9   :  { %5123 = vmatprep.subr.bf16.mxu1 %v7996_v47  ;;  %5153 = vmatpush1.bf16.msra.mxu0 %v7615_v61 }
 0x1fa   :  { %5155 = vmatprep.subr.bf16.mxu0 %v7618_v1 }
 0x1fc   :  { %5125 = vmatpush3.bf16.msra.mxu1 %v8001_v27 }
 0x1fd   :  { %5127 = vmatprep.subr.bf16.mxu1 %v8004_v56  ;;  %5157 = vmatpush1.bf16.msra.mxu0 %v7627_v17  ;;  %v8239_v17 = vld [vmem:[#allocation12] ss:$0 sm:$0xff] }
 0x1fe   :  { %5159 = vmatprep.subr.bf16.mxu0 %v7630_v18 }
 0x200   :  { %5129 = vmatpush3.bf16.msra.mxu1 %v8009_v25 }
 0x201   :  { %5195 = vmatprep.subr.bf16.mxu1 %v7583_v28  ;;  %5161 = vmatpush1.bf16.msra.mxu0 %v7639_v34  ;;  %v1188_v28 = vld [vmem:[#allocation4 + $0x28] sm:$0xff] }
 0x202   :  { %5163 = vmatprep.subr.bf16.mxu0 %v7642_v35 }
 0x203   :  { %1177 = vmatmul.mubr.f32.vlgmr.msra.gmra.mrb[8].mxu1 %v8075_v45 }
 0x204   :  { %5197 = vmatpush1.bf16.msra.mxu1 %v7585_v31 }
 0x205   :  { %5199 = vmatprep.subr.bf16.mxu1 %v7595_v39  ;;  %5165 = vmatpush1.bf16.msra.mxu0 %v7651_v50 }
 0x206   :  { %5167 = vmatprep.subr.bf16.mxu0 %v7654_v53  ;;  %v9918_v53 = vld [vmem:[#allocation60_spill] sm:$0xff] }
 0x208   :  { %5201 = vmatpush1.bf16.msra.mxu1 %v7597_v43  ;;  %v9919_v43 = vld [vmem:[#allocation61_spill] sm:$0xff] }
 0x209   :  { %5203 = vmatprep.subr.bf16.mxu1 %v7603_v51  ;;  %5169 = vmatpush1.bf16.msra.mxu0 %v7663_v7  ;;  %v9920_v51 = vld [vmem:[#allocation42_spill] sm:$0xff]  ;;  %v9921_v7 = vld [vmem:[#allocation43_spill] sm:$0xff] }
 0x20a   :  { %5171 = vmatprep.subr.bf16.mxu0 %v7666_v11  ;;  %v9922_v11 = vld [vmem:[#allocation64_spill] sm:$0xff] }
 0x20c   :  { %5205 = vmatpush1.bf16.msra.mxu1 %v7609_v54  ;;  %v9923_v54 = vld [vmem:[#allocation65_spill] sm:$0xff] }
 0x20d   :  { %5207 = vmatprep.subr.bf16.mxu1 %v7612_v58  ;;  %5173 = vmatpush1.bf16.msra.mxu0 %v7675_v33  ;;  %v9924_v58 = vld [vmem:[#allocation46_spill] sm:$0xff]  ;;  %v9925_v33 = vld [vmem:[#allocation47_spill] sm:$0xff] }
 0x20e   :  { %5175 = vmatprep.subr.bf16.mxu0 %v7678_v37  ;;  %v9926_v37 = vld [vmem:[#allocation68_spill] sm:$0xff] }
 0x210   :  { %5209 = vmatpush1.bf16.msra.mxu1 %v7621_v6  ;;  %v9927_v6 = vld [vmem:[#allocation69_spill] sm:$0xff] }
 0x211   :  { %5211 = vmatprep.subr.bf16.mxu1 %v7624_v10  ;;  %5177 = vmatpush1.bf16.msra.mxu0 %v9918_v53  ;;  %v9928_v10 = vld [vmem:[#allocation50_spill] sm:$0xff]  ;;  %v9929_v53 = vld [vmem:[#allocation51_spill] sm:$0xff] }
 0x212   :  { %5179 = vmatprep.subr.bf16.mxu0 %v9919_v43  ;;  %v9930_v43 = vld [vmem:[#allocation72_spill] sm:$0xff] }
 0x214   :  { %5213 = vmatpush1.bf16.msra.mxu1 %v9920_v51  ;;  %v9931_v51 = vld [vmem:[#allocation73_spill] sm:$0xff] }
 0x215   :  { %5215 = vmatprep.subr.bf16.mxu1 %v9921_v7  ;;  %5181 = vmatpush1.bf16.msra.mxu0 %v9922_v11  ;;  %v9932_v7 = vld [vmem:[#allocation54_spill] sm:$0xff]  ;;  %v9933_v11 = vld [vmem:[#allocation55_spill] sm:$0xff] }
 0x216   :  { %5183 = vmatprep.subr.bf16.mxu0 %v9923_v54  ;;  %v9934_v54 = vld [vmem:[#allocation76_spill] sm:$0xff] }
 0x218   :  { %5217 = vmatpush1.bf16.msra.mxu1 %v9924_v58  ;;  %v9935_v58 = vld [vmem:[#allocation78_spill] sm:$0xff] }
 0x219   :  { %5219 = vmatprep.subr.bf16.mxu1 %v9925_v33  ;;  %5185 = vmatpush1.bf16.msra.mxu0 %v9926_v37  ;;  %v9936_v33 = vld [vmem:[#allocation58_spill] sm:$0xff]  ;;  %v9937_v37 = vld [vmem:[#allocation59_spill] sm:$0xff] }
 0x21a   :  { %5187 = vmatprep.subr.bf16.mxu0 %v9927_v6  ;;  %v9938_v6 = vld [vmem:[#allocation62_spill] sm:$0xff] }
 0x21c   :  { %5221 = vmatpush1.bf16.msra.mxu1 %v9928_v10  ;;  %v9939_v10 = vld [vmem:[#allocation63_spill] sm:$0xff] }
 0x21d   :  { %5223 = vmatprep.subr.bf16.mxu1 %v9929_v53  ;;  %5189 = vmatpush1.bf16.msra.mxu0 %v9930_v43  ;;  %v9940_v53 = vld [vmem:[#allocation66_spill] sm:$0xff]  ;;  %v9941_v43 = vld [vmem:[#allocation67_spill] sm:$0xff] }
 0x21e   :  { %5191 = vmatprep.subr.bf16.mxu0 %v9931_v51  ;;  %v9942_v51 = vld [vmem:[#allocation70_spill] sm:$0xff] }
 0x220   :  { %5225 = vmatpush1.bf16.msra.mxu1 %v9932_v7  ;;  %v9943_v7 = vld [vmem:[#allocation71_spill] sm:$0xff] }
 0x221   :  { %5227 = vmatprep.subr.bf16.mxu1 %v9933_v11  ;;  %5193 = vmatpush1.bf16.msra.mxu0 %v9934_v54  ;;  %v9944_v11 = vld [vmem:[#allocation74_spill] sm:$0xff]  ;;  %v9945_v54 = vld [vmem:[#allocation75_spill] sm:$0xff] }
 0x222   :  { %5259 = vmatprep.subr.bf16.mxu0 %v9935_v58  ;;  %v9946_v58 = vld [vmem:[#allocation77_spill] sm:$0xff] }
 0x224   :  { %5229 = vmatpush1.bf16.msra.mxu1 %v9936_v33  ;;  %v9947_v33 = vld [vmem:[#allocation79_spill] sm:$0xff] }
 0x225   :  { %5231 = vmatprep.subr.bf16.mxu1 %v9937_v37  ;;  %v9948_v37 = vld [vmem:[#allocation81_spill] sm:$0xff] }
 0x228   :  { %5233 = vmatpush1.bf16.msra.mxu1 %v9938_v6  ;;  %v9949_v6 = vld [vmem:[#allocation83_spill] sm:$0xff] }
 0x229   :  { %5235 = vmatprep.subr.bf16.mxu1 %v9939_v10  ;;  %v9950_v10 = vld [vmem:[#allocation85_spill] sm:$0xff] }
 0x22c   :  { %5237 = vmatpush1.bf16.msra.mxu1 %v9940_v53  ;;  %v9951_v53 = vld [vmem:[#allocation87_spill] sm:$0xff] }
 0x22d   :  { %5239 = vmatprep.subr.bf16.mxu1 %v9941_v43  ;;  %v1186_v43 = vld [vmem:[#allocation4 + $0x18] sm:$0xff] }
 0x230   :  { %5241 = vmatpush1.bf16.msra.mxu1 %v9942_v51 }
 0x231   :  { %5243 = vmatprep.subr.bf16.mxu1 %v9943_v7 }
 0x234   :  { %5245 = vmatpush1.bf16.msra.mxu1 %v9944_v11  ;;  %v1187_v11 = vld [vmem:[#allocation4 + $0x20] sm:$0xff] }
 0x235   :  { %5247 = vmatprep.subr.bf16.mxu1 %v9945_v54 }
 0x238   :  { %5249 = vmatpush1.bf16.msra.mxu1 %v9946_v58 }
 0x239   :  { %5251 = vmatprep.subr.bf16.mxu1 %v9947_v33 }
 0x23c   :  { %5253 = vmatpush1.bf16.msra.mxu1 %v9948_v37 }
 0x23d   :  { %5255 = vmatprep.subr.bf16.mxu1 %v9949_v6 }
 0x240   :  { %5257 = vmatpush1.bf16.msra.mxu1 %v9950_v10 }
 0x241   :  { %5323 = vmatprep.subr.bf16.mxu1 %v9951_v53 }
 0x276   :  { %v894_v51 = vpop.f32.mrb[4].mxu1  ;;  %v965_v50 = vpop.f32.mrb[6].mxu0 }
 0x277   :  { %v1189_v7 = vadd.f32 %v1186_v43, %v894_v51  ;;  %v896_v39 = vpop.f32.mrb[5].mxu1  ;;  %v967_v31 = vpop.f32.mrb[7].mxu0  ;;  %v1203_v10 = vadd.f32 %v8072_v63, %v965_v50 }
 0x278   :  { %v1190_v35 = vadd.f32 %v1187_v11, %v896_v39 }
 0x279   :  { %v4207_v54 = vmul.f32 -1.442695, %v1189_v7 }
 0x27a   :  { %v4208_v58 = vmul.f32 -1.442695, %v1190_v35  ;;  %v738_v35 = vlaneseq }
 0x27b   :  { %7167 = vpow2.f32 %v4207_v54 }
 0x27c   :  { %7169 = vpow2.f32 %v4208_v58  ;;  %v739_v11 = vshrl.u32 %v738_v35, 7 }
 0x27e   :  { %v748_v35 = vsub.s32 2, %v739_v11 }
 0x285   :  { %v7168_v33 = vpop.eup %7167 }
 0x286   :  { %v1197_v37 = vadd.f32 1.0, %v7168_v33  ;;  %v7170_v6 = vpop.eup %7169  ;;  %v740_v33 = vsub.s32 0, %v739_v11 }
 0x287   :  { %v1198_v34 = vadd.f32 1.0, %v7170_v6  ;;  %v377_v6 = vld [vmem:[#allocation9] sm:$0x7] }
 0x288   :  { %7171 = vrcp.f32 %v1197_v37  ;;  %v744_v37 = vsub.s32 1, %v739_v11  ;;  %v8233_v50 = vrot.slane %v377_v6, %v740_v33 }
 0x289   :  { %7173 = vrcp.f32 %v1198_v34 }
 0x28a   :  { %9952 = vst [vmem:[#allocation80_spill] sm:$0xff] %v8233_v50  ;;  %v8235_v63 = vrot.slane %v377_v6, %v744_v37 }
 0x28c   :  { %9953 = vst [vmem:[#allocation90_spill] sm:$0xff] %v8235_v63 }
 0x292   :  { %v7172_v53 = vpop.eup %7171 }
 0x293   :  { %v1204_v25 = vmul.f32 %v7172_v53, %v1203_v10  ;;  %v7174_v51 = vpop.eup %7173 }
 0x294   :  { %v1207_v18 = vsub.f32 1.0, %v7174_v51  ;;  %v1209_v54 = vmul.f32 %v7174_v51, %v8075_v45 }
 0x295   :  { %v1205_v43 = vadd.f32 %v1204_v25, %v1188_v28  ;;  %v1182_v28 = vadd.f32 %v967_v31, %v8233_v50  ;;  %v8241_v50 = vrot.slane %v377_v6, %v748_v35  ;;  %v9954_v6 = vld [vmem:[#allocation91_spill] sm:$0xff]  ;;  %v9956_v35 = vld [vmem:[#allocation94_spill] sm:$0xff] }
 0x297   :  { %7175 = vtanh.f32 %v1205_v43 }
 0x2a1   :  { %v7176_v7 = vpop.eup %7175 }
 0x2a2   :  { %v1208_v39 = vmul.f32 %v7176_v7, %v1207_v18 }
 0x2a4   :  { %v8231_v58 = vadd.f32 %v1209_v54, %v1208_v39 }
 0x2b6   :  { %v1036_v10 = vpop.f32.mrb[6].mxu1  ;;  %v1107_v34 = vpop.f32.mrb[8].mxu0 }
 0x2b7   :  { %v1183_v53 = vadd.f32 %v1036_v10, %v8235_v63  ;;  %v1211_v18 = vadd.f32 %v1182_v28, %v1107_v34  ;;  %v1038_v25 = vpop.f32.mrb[7].mxu1  ;;  %v1109_v45 = vpop.f32.mrb[9].mxu0 }
 0x2b9   :  { %v1212_v43 = vadd.f32 %v1183_v53, %v1109_v45  ;;  %v4209_v51 = vmul.f32 -1.442695, %v1211_v18  ;;  %v1184_v18 = vadd.f32 %v1038_v25, %v8241_v50  ;;  %v9955_v25 = vld [vmem:[#allocation84_spill] sm:$0xff] }
 0x2bb   :  { %7177 = vpow2.f32 %v4209_v51  ;;  %v4210_v7 = vmul.f32 -1.442695, %v1212_v43 }
 0x2bd   :  { %7179 = vpow2.f32 %v4210_v7 }
 0x2c5   :  { %v7178_v39 = vpop.eup %7177 }
 0x2c6   :  { %v1219_v54 = vadd.f32 1.0, %v7178_v39 }
 0x2c7   :  { %v7180_v33 = vpop.eup %7179 }
 0x2c8   :  { %7181 = vrcp.f32 %v1219_v54  ;;  %v1220_v10 = vadd.f32 1.0, %v7180_v33  ;;  %v9957_v33 = vld [vmem:[#allocation86_spill] sm:$0xff] }
 0x2ca   :  { %7183 = vrcp.f32 %v1220_v10  ;;  %v9960_v10 = vld [vmem:[#allocation98_spill] sm:$0xff] }
 0x2d2   :  { %v7182_v53 = vpop.eup %7181 }
 0x2d4   :  { %v7184_v51 = vpop.eup %7183 }
 0x2d5   :  { %v1229_v11 = vsub.f32 1.0, %v7184_v51  ;;  %v1231_v39 = vmul.f32 0.0, %v7184_v51  ;;  %v9967_v51 = vld [vmem:[#allocation96_spill] sm:$0xff] }
 0x2d6   :  { %v4306_v37 = vpop.f32.mrb[8].mxu1 }
 0x2d7   :  { %v4307_v31 = vpop.f32.mrb[9].mxu1 }
 0x2d8   :  { %v4308_v28 = vadd.f32 %v4307_v31, %v4306_v37  ;;  %v9958_v37 = vld [vmem:[#allocation95_spill] sm:$0xff]  ;;  %v9959_v31 = vld [vmem:[#allocation88_spill] sm:$0xff] }
 0x2da   :  { %v1225_v34 = vadd.f32 %v4308_v28, %v8239_v17  ;;  %v9961_v28 = vld [vmem:[#allocation89_spill] sm:$0xff] }
 0x2dc   :  { %v1226_v45 = vmul.f32 %v7182_v53, %v1225_v34  ;;  %v9962_v34 = vld [vmem:[#allocation99_spill] sm:$0xff]  ;;  %v9963_v53 = vld [vmem:[#allocation92_spill] sm:$0xff] }
 0x2de   :  { %v1227_v43 = vadd.f32 %v1226_v45, %v1184_v18  ;;  %v9964_v18 = vld [vmem:[#allocation102_spill] sm:$0xff]  ;;  %v9965_v45 = vld [vmem:[#allocation93_spill] sm:$0xff] }
 0x2e0   :  { %7185 = vtanh.f32 %v1227_v43  ;;  %v9966_v43 = vld [vmem:[#allocation103_spill] sm:$0xff] }
 0x2ea   :  { %v7186_v7 = vpop.eup %7185 }
 0x2eb   :  { %v1230_v54 = vmul.f32 %v7186_v7, %v1229_v11  ;;  %v9968_v11 = vld [vmem:[#allocation106_spill] sm:$0xff]  ;;  %v9969_v7 = vld [vmem:[#allocation97_spill] sm:$0xff] }
 0x2ed   :  { %v8245_v63 = vadd.f32 %v1231_v39, %v1230_v54  ;;  %v9970_v39 = vld [vmem:[#allocation107_spill] sm:$0xff]  ;;  %v9971_v54 = vld [vmem:[#allocation100_spill] sm:$0xff] }
 0x2ef   :  { %1311 = vmatprep.mubr.f32.mxu0 %v8245_v63  ;;  %1382 = vmatprep.mubr.f32.mxu1 %v8245_v63 }
 0x2f0   :  { %1312 = vmatmul.mubr.f32.vlgmr.msra.gmra.mrb[10].mxu0 %v8231_v58  ;;  %1383 = vmatmul.mubr.f32.vlgmr.msra.gmra.mrb[10].mxu1 %v8231_v58 }
 0x2f1   :  { %5261 = vmatpush1.bf16.msra.mxu0 %v9854_v41  ;;  %5325 = vmatpush1.bf16.msra.mxu1 %v9855_v44 }
 0x2f2   :  { %1453 = vmatprep.mubr.f32.mxu0 %v8245_v63  ;;  %1524 = vmatprep.mubr.f32.mxu1 %v8245_v63 }
 0x2f3   :  { %5263 = vmatprep.subr.bf16.mxu0 %v9856_v59  ;;  %5327 = vmatprep.subr.bf16.mxu1 %v9954_v6 }
 0x2f5   :  { %5265 = vmatpush1.bf16.msra.mxu0 %v9955_v25  ;;  %5329 = vmatpush1.bf16.msra.mxu1 %v9956_v35 }
 0x2f6   :  { %5267 = vmatprep.subr.bf16.mxu0 %v9957_v33  ;;  %5331 = vmatprep.subr.bf16.mxu1 %v9958_v37 }
 0x2f9   :  { %5269 = vmatpush1.bf16.msra.mxu0 %v9959_v31  ;;  %5333 = vmatpush1.bf16.msra.mxu1 %v9960_v10 }
 0x2fa   :  { %5271 = vmatprep.subr.bf16.mxu0 %v9961_v28  ;;  %5335 = vmatprep.subr.bf16.mxu1 %v9962_v34  ;;  %v9972_v28 = vld [vmem:[#allocation110_spill] sm:$0xff]  ;;  %v9973_v34 = vld [vmem:[#allocation101_spill] sm:$0xff] }
 0x2fd   :  { %5273 = vmatpush1.bf16.msra.mxu0 %v9963_v53  ;;  %5337 = vmatpush1.bf16.msra.mxu1 %v9964_v18  ;;  %v9974_v53 = vld [vmem:[#allocation111_spill] sm:$0xff]  ;;  %v9975_v18 = vld [vmem:[#allocation104_spill] sm:$0xff] }
 0x2fe   :  { %5275 = vmatprep.subr.bf16.mxu0 %v9965_v45  ;;  %5339 = vmatprep.subr.bf16.mxu1 %v9966_v43  ;;  %v9976_v45 = vld [vmem:[#allocation114_spill] sm:$0xff]  ;;  %v9977_v43 = vld [vmem:[#allocation105_spill] sm:$0xff] }
 0x301   :  { %5277 = vmatpush1.bf16.msra.mxu0 %v9967_v51  ;;  %5341 = vmatpush1.bf16.msra.mxu1 %v9968_v11  ;;  %v9978_v51 = vld [vmem:[#allocation115_spill] sm:$0xff]  ;;  %v9979_v11 = vld [vmem:[#allocation108_spill] sm:$0xff] }
 0x302   :  { %5279 = vmatprep.subr.bf16.mxu0 %v9969_v7  ;;  %5343 = vmatprep.subr.bf16.mxu1 %v9970_v39  ;;  %v9980_v7 = vld [vmem:[#allocation118_spill] sm:$0xff]  ;;  %v9981_v39 = vld [vmem:[#allocation109_spill] sm:$0xff] }
 0x305   :  { %5281 = vmatpush1.bf16.msra.mxu0 %v9971_v54  ;;  %5345 = vmatpush1.bf16.msra.mxu1 %v9972_v28  ;;  %v9982_v54 = vld [vmem:[#allocation119_spill] sm:$0xff]  ;;  %v9983_v28 = vld [vmem:[#allocation112_spill] sm:$0xff] }
 0x306   :  { %5283 = vmatprep.subr.bf16.mxu0 %v9973_v34  ;;  %5347 = vmatprep.subr.bf16.mxu1 %v9974_v53  ;;  %v9984_v34 = vld [vmem:[#allocation122_spill] sm:$0xff]  ;;  %v9985_v53 = vld [vmem:[#allocation113_spill] sm:$0xff] }
 0x309   :  { %5285 = vmatpush1.bf16.msra.mxu0 %v9975_v18  ;;  %5349 = vmatpush1.bf16.msra.mxu1 %v9976_v45  ;;  %v9986_v18 = vld [vmem:[#allocation123_spill] sm:$0xff]  ;;  %v9987_v45 = vld [vmem:[#allocation116_spill] sm:$0xff] }
 0x30a   :  { %5287 = vmatprep.subr.bf16.mxu0 %v9977_v43  ;;  %5351 = vmatprep.subr.bf16.mxu1 %v9978_v51  ;;  %v9988_v43 = vld [vmem:[#allocation126_spill] sm:$0xff]  ;;  %v9989_v51 = vld [vmem:[#allocation117_spill] sm:$0xff] }
 0x30d   :  { %5289 = vmatpush1.bf16.msra.mxu0 %v9979_v11  ;;  %5353 = vmatpush1.bf16.msra.mxu1 %v9980_v7  ;;  %v9990_v11 = vld [vmem:[#allocation127_spill] sm:$0xff]  ;;  %v9991_v7 = vld [vmem:[#allocation120_spill] sm:$0xff] }
 0x30e   :  { %5291 = vmatprep.subr.bf16.mxu0 %v9981_v39  ;;  %5355 = vmatprep.subr.bf16.mxu1 %v9982_v54  ;;  %v9992_v39 = vld [vmem:[#allocation130_spill] sm:$0xff]  ;;  %v9993_v54 = vld [vmem:[#allocation121_spill] sm:$0xff] }
 0x311   :  { %5293 = vmatpush1.bf16.msra.mxu0 %v9983_v28  ;;  %5357 = vmatpush1.bf16.msra.mxu1 %v9984_v34  ;;  %v9994_v34 = vld [vmem:[#allocation124_spill] sm:$0xff] }
 0x312   :  { %5295 = vmatprep.subr.bf16.mxu0 %v9985_v53  ;;  %5359 = vmatprep.subr.bf16.mxu1 %v9986_v18  ;;  %v9995_v18 = vld [vmem:[#allocation125_spill] sm:$0xff] }
 0x315   :  { %5297 = vmatpush1.bf16.msra.mxu0 %v9987_v45  ;;  %5361 = vmatpush1.bf16.msra.mxu1 %v9988_v43 }
 0x316   :  { %5299 = vmatprep.subr.bf16.mxu0 %v9989_v51  ;;  %5363 = vmatprep.subr.bf16.mxu1 %v9990_v11 }
 0x319   :  { %5301 = vmatpush1.bf16.msra.mxu0 %v9991_v7  ;;  %5365 = vmatpush1.bf16.msra.mxu1 %v9992_v39 }
 0x31a   :  { %5303 = vmatprep.subr.bf16.mxu0 %v9993_v54  ;;  %5367 = vmatprep.subr.bf16.mxu1 %v9897_v0 }
 0x31d   :  { %5305 = vmatpush1.bf16.msra.mxu0 %v9994_v34  ;;  %5369 = vmatpush1.bf16.msra.mxu1 %v9899_v55 }
 0x31e   :  { %5307 = vmatprep.subr.bf16.mxu0 %v9995_v18  ;;  %5371 = vmatprep.subr.bf16.mxu1 %v9901_v60  ;;  %v9996_v18 = vld [vmem:[#allocation146_spill] sm:$0xff] }
 0x321   :  { %5309 = vmatpush1.bf16.msra.mxu0 %v9902_v62  ;;  %5373 = vmatpush1.bf16.msra.mxu1 %v9903_v29 }
 0x322   :  { %5311 = vmatprep.subr.bf16.mxu0 %v9904_v13  ;;  %5375 = vmatprep.subr.bf16.mxu1 %v9905_v30  ;;  %v9997_v13 = vld [vmem:[#allocation150_spill] sm:$0xff]  ;;  %v9998_v30 = vld [vmem:[#allocation141_spill] sm:$0xff] }
 0x325   :  { %5313 = vmatpush1.bf16.msra.mxu0 %v9906_v26  ;;  %5377 = vmatpush1.bf16.msra.mxu1 %v7937_v42  ;;  %v9999_v26 = vld [vmem:[#allocation18_spill] sm:$0xff] }
 0x326   :  { %5315 = vmatprep.subr.bf16.mxu0 %v9907_v24  ;;  %5379 = vmatprep.subr.bf16.mxu1 %v7940_v12 }
 0x329   :  { %5317 = vmatpush1.bf16.msra.mxu0 %v9908_v46  ;;  %5381 = vmatpush1.bf16.msra.mxu1 %v9996_v18 }
 0x32a   :  { %5319 = vmatprep.subr.bf16.mxu0 %v9909_v5  ;;  %5383 = vmatprep.subr.bf16.mxu1 %v7952_v16  ;;  %v10000_v5 = vld [vmem:[#allocation19_spill] sm:$0xff] }
 0x32d   :  { %5321 = vmatpush1.bf16.msra.mxu0 %v9910_v38  ;;  %5385 = vmatpush1.bf16.msra.mxu1 %v9997_v13 }
 0x32e   :  { %5387 = vmatprep.subr.bf16.mxu0 %v9998_v30  ;;  %5419 = vmatprep.subr.bf16.mxu1 %v9999_v26  ;;  %v10001_v30 = vld [vmem:[#allocation21_spill] sm:$0xff] }
 0x330   :  { %1454 = vmatmul.mubr.f32.vlgmr.msra.gmra.mrb[12].mxu0 %v8231_v58  ;;  %1525 = vmatmul.mubr.f32.vlgmr.msra.gmra.mrb[12].mxu1 %v8231_v58 }
 0x331   :  { %5389 = vmatpush3.bf16.msra.mxu0 %v7943_v57  ;;  %1595 = vmatprep.mubr.f32.mxu0 %v8245_v63 }
 0x332   :  { %5391 = vmatprep.subr.bf16.mxu0 %v9911_v22  ;;  %5421 = vmatpush1.bf16.msra.mxu1 %v10000_v5 }
 0x333   :  { %5423 = vmatprep.subr.bf16.mxu1 %v7568_v9 }
 0x335   :  { %5393 = vmatpush3.bf16.msra.mxu0 %v7956_v49 }
 0x336   :  { %5395 = vmatprep.subr.bf16.mxu0 %v9912_v3  ;;  %5425 = vmatpush1.bf16.msra.mxu1 %v10001_v30 }
 0x337   :  { %5427 = vmatprep.subr.bf16.mxu1 %v7575_v15 }
 0x339   :  { %5397 = vmatpush3.bf16.msra.mxu0 %v9913_v4  ;;  %v1607_v4 = vld [vmem:[#allocation4 + $0x40] sm:$0xff] }
 0x33a   :  { %5399 = vmatprep.subr.bf16.mxu0 %v9914_v2  ;;  %5429 = vmatpush1.bf16.msra.mxu1 %v7578_v20 }
 0x33b   :  { %5431 = vmatprep.subr.bf16.mxu1 %v7581_v23 }
 0x33d   :  { %5401 = vmatpush3.bf16.msra.mxu0 %v9915_v40 }
 0x33e   :  { %5403 = vmatprep.subr.bf16.mxu0 %v9916_v8  ;;  %5433 = vmatpush1.bf16.msra.mxu1 %v7588_v32 }
 0x33f   :  { %5435 = vmatprep.subr.bf16.mxu1 %v7592_v36  ;;  %v10002_v36 = vld [vmem:[#allocation40_spill] sm:$0xff] }
 0x341   :  { %5405 = vmatpush3.bf16.msra.mxu0 %v7985_v19  ;;  %v10003_v19 = vld [vmem:[#allocation41_spill] sm:$0xff] }
 0x342   :  { %5407 = vmatprep.subr.bf16.mxu0 %v9917_v14  ;;  %5437 = vmatpush1.bf16.msra.mxu1 %v7601_v48  ;;  %v10004_v14 = vld [vmem:[#allocation161_spill] sm:$0xff] }
 0x343   :  { %5439 = vmatprep.subr.bf16.mxu1 %v7606_v52  ;;  %v10005_v48 = vld [vmem:[#allocation25_spill] sm:$0xff]  ;;  %v10006_v52 = vld [vmem:[#allocation44_spill] sm:$0xff] }
 0x345   :  { %5409 = vmatpush3.bf16.msra.mxu0 %v7993_v21  ;;  %v10007_v21 = vld [vmem:[#allocation45_spill] sm:$0xff] }
 0x346   :  { %5411 = vmatprep.subr.bf16.mxu0 %v7996_v47  ;;  %5441 = vmatpush1.bf16.msra.mxu1 %v7615_v61  ;;  %v10008_v61 = vld [vmem:[#allocation26_spill] sm:$0xff]  ;;  %v10018_v47 = vld [vmem:[#allocation56_spill] sm:$0xff] }
 0x347   :  { %5443 = vmatprep.subr.bf16.mxu1 %v7618_v1  ;;  %v10009_v1 = vld [vmem:[#allocation29_spill] sm:$0xff] }
 0x349   :  { %5413 = vmatpush3.bf16.msra.mxu0 %v8001_v27  ;;  %v10010_v27 = vld [vmem:[#allocation48_spill] sm:$0xff] }
 0x34a   :  { %5415 = vmatprep.subr.bf16.mxu0 %v8004_v56  ;;  %5445 = vmatpush1.bf16.msra.mxu1 %v10002_v36  ;;  %v10011_v56 = vld [vmem:[#allocation49_spill] sm:$0xff]  ;;  %v10012_v36 = vld [vmem:[#allocation30_spill] sm:$0xff] }
 0x34b   :  { %5447 = vmatprep.subr.bf16.mxu1 %v10003_v19  ;;  %v10013_v19 = vld [vmem:[#allocation32_spill] sm:$0xff] }
 0x34d   :  { %5417 = vmatpush3.bf16.msra.mxu0 %v10004_v14  ;;  %v10014_v14 = vld [vmem:[#allocation52_spill] sm:$0xff] }
 0x34e   :  { %5483 = vmatprep.subr.bf16.mxu0 %v10005_v48  ;;  %5449 = vmatpush1.bf16.msra.mxu1 %v10006_v52  ;;  %v10015_v48 = vld [vmem:[#allocation53_spill] sm:$0xff]  ;;  %v10016_v52 = vld [vmem:[#allocation34_spill] sm:$0xff] }
 0x34f   :  { %5451 = vmatprep.subr.bf16.mxu1 %v10007_v21  ;;  %v10017_v21 = vld [vmem:[#allocation35_spill] sm:$0xff] }
 0x350   :  { %1596 = vmatmul.mubr.f32.vlgmr.msra.gmra.mrb[14].mxu0 %v8231_v58 }
 0x351   :  { %5485 = vmatpush1.bf16.msra.mxu0 %v10008_v61  ;;  %v10019_v61 = vld [vmem:[#allocation57_spill] sm:$0xff] }
 0x352   :  { %5487 = vmatprep.subr.bf16.mxu0 %v10009_v1  ;;  %5453 = vmatpush1.bf16.msra.mxu1 %v10010_v27  ;;  %v10020_v1 = vld [vmem:[#allocation38_spill] sm:$0xff]  ;;  %v10021_v27 = vld [vmem:[#allocation39_spill] sm:$0xff] }
 0x353   :  { %5455 = vmatprep.subr.bf16.mxu1 %v10011_v56  ;;  %v10022_v56 = vld [vmem:[#allocation60_spill] sm:$0xff] }
 0x355   :  { %5489 = vmatpush1.bf16.msra.mxu0 %v10012_v36  ;;  %v10023_v36 = vld [vmem:[#allocation61_spill] sm:$0xff] }
 0x356   :  { %5491 = vmatprep.subr.bf16.mxu0 %v10013_v19  ;;  %5457 = vmatpush1.bf16.msra.mxu1 %v10014_v14  ;;  %v10024_v19 = vld [vmem:[#allocation42_spill] sm:$0xff]  ;;  %v10025_v14 = vld [vmem:[#allocation43_spill] sm:$0xff] }
 0x357   :  { %5459 = vmatprep.subr.bf16.mxu1 %v10015_v48  ;;  %v10026_v48 = vld [vmem:[#allocation64_spill] sm:$0xff] }
 0x359   :  { %5493 = vmatpush1.bf16.msra.mxu0 %v10016_v52  ;;  %v10027_v52 = vld [vmem:[#allocation65_spill] sm:$0xff] }
 0x35a   :  { %5495 = vmatprep.subr.bf16.mxu0 %v10017_v21  ;;  %5461 = vmatpush1.bf16.msra.mxu1 %v10018_v47  ;;  %v10028_v21 = vld [vmem:[#allocation46_spill] sm:$0xff]  ;;  %v10029_v47 = vld [vmem:[#allocation47_spill] sm:$0xff] }
 0x35b   :  { %5463 = vmatprep.subr.bf16.mxu1 %v10019_v61  ;;  %v10030_v61 = vld [vmem:[#allocation68_spill] sm:$0xff] }
 0x35d   :  { %5497 = vmatpush1.bf16.msra.mxu0 %v10020_v1  ;;  %v10031_v1 = vld [vmem:[#allocation69_spill] sm:$0xff] }
 0x35e   :  { %5499 = vmatprep.subr.bf16.mxu0 %v10021_v27  ;;  %5465 = vmatpush1.bf16.msra.mxu1 %v10022_v56  ;;  %v10032_v27 = vld [vmem:[#allocation50_spill] sm:$0xff]  ;;  %v10033_v56 = vld [vmem:[#allocation51_spill] sm:$0xff] }
 0x35f   :  { %5467 = vmatprep.subr.bf16.mxu1 %v10023_v36  ;;  %v10034_v36 = vld [vmem:[#allocation72_spill] sm:$0xff] }
 0x361   :  { %5501 = vmatpush1.bf16.msra.mxu0 %v10024_v19  ;;  %v10035_v19 = vld [vmem:[#allocation73_spill] sm:$0xff] }
 0x362   :  { %5503 = vmatprep.subr.bf16.mxu0 %v10025_v14  ;;  %5469 = vmatpush1.bf16.msra.mxu1 %v10026_v48  ;;  %v10036_v14 = vld [vmem:[#allocation54_spill] sm:$0xff]  ;;  %v10037_v48 = vld [vmem:[#allocation55_spill] sm:$0xff] }
 0x363   :  { %5471 = vmatprep.subr.bf16.mxu1 %v10027_v52  ;;  %v10038_v52 = vld [vmem:[#allocation76_spill] sm:$0xff] }
 0x365   :  { %5505 = vmatpush1.bf16.msra.mxu0 %v10028_v21  ;;  %v10039_v21 = vld [vmem:[#allocation78_spill] sm:$0xff] }
 0x366   :  { %5507 = vmatprep.subr.bf16.mxu0 %v10029_v47  ;;  %5473 = vmatpush1.bf16.msra.mxu1 %v10030_v61  ;;  %v10040_v47 = vld [vmem:[#allocation58_spill] sm:$0xff]  ;;  %v10041_v61 = vld [vmem:[#allocation59_spill] sm:$0xff] }
 0x367   :  { %5475 = vmatprep.subr.bf16.mxu1 %v10031_v1  ;;  %v10042_v1 = vld [vmem:[#allocation62_spill] sm:$0xff] }
 0x369   :  { %5509 = vmatpush1.bf16.msra.mxu0 %v10032_v27  ;;  %v10043_v27 = vld [vmem:[#allocation63_spill] sm:$0xff] }
 0x36a   :  { %5511 = vmatprep.subr.bf16.mxu0 %v10033_v56  ;;  %5477 = vmatpush1.bf16.msra.mxu1 %v10034_v36  ;;  %v10044_v56 = vld [vmem:[#allocation66_spill] sm:$0xff]  ;;  %v10045_v36 = vld [vmem:[#allocation67_spill] sm:$0xff] }
 0x36b   :  { %5479 = vmatprep.subr.bf16.mxu1 %v10035_v19  ;;  %v10046_v19 = vld [vmem:[#allocation70_spill] sm:$0xff] }
 0x36d   :  { %5513 = vmatpush1.bf16.msra.mxu0 %v10036_v14  ;;  %v10047_v14 = vld [vmem:[#allocation71_spill] sm:$0xff] }
 0x36e   :  { %5515 = vmatprep.subr.bf16.mxu0 %v10037_v48  ;;  %5481 = vmatpush1.bf16.msra.mxu1 %v10038_v52  ;;  %v10048_v48 = vld [vmem:[#allocation74_spill] sm:$0xff]  ;;  %v10049_v52 = vld [vmem:[#allocation75_spill] sm:$0xff] }
 0x36f   :  { %5547 = vmatprep.subr.bf16.mxu1 %v10039_v21  ;;  %v10050_v21 = vld [vmem:[#allocation77_spill] sm:$0xff] }
 0x371   :  { %5517 = vmatpush1.bf16.msra.mxu0 %v10040_v47  ;;  %v10051_v47 = vld [vmem:[#allocation79_spill] sm:$0xff] }
 0x372   :  { %5519 = vmatprep.subr.bf16.mxu0 %v10041_v61  ;;  %v10052_v61 = vld [vmem:[#allocation81_spill] sm:$0xff] }
 0x375   :  { %5521 = vmatpush1.bf16.msra.mxu0 %v10042_v1  ;;  %v10053_v1 = vld [vmem:[#allocation83_spill] sm:$0xff] }
 0x376   :  { %5523 = vmatprep.subr.bf16.mxu0 %v10043_v27  ;;  %v10054_v27 = vld [vmem:[#allocation85_spill] sm:$0xff] }
 0x379   :  { %5525 = vmatpush1.bf16.msra.mxu0 %v10044_v56  ;;  %v10055_v56 = vld [vmem:[#allocation87_spill] sm:$0xff] }
 0x37a   :  { %5527 = vmatprep.subr.bf16.mxu0 %v10045_v36  ;;  %v1605_v36 = vld [vmem:[#allocation4 + $0x30] sm:$0xff] }
 0x37d   :  { %5529 = vmatpush1.bf16.msra.mxu0 %v10046_v19 }
 0x37e   :  { %5531 = vmatprep.subr.bf16.mxu0 %v10047_v14 }
 0x381   :  { %5533 = vmatpush1.bf16.msra.mxu0 %v10048_v48  ;;  %v1606_v48 = vld [vmem:[#allocation4 + $0x38] sm:$0xff] }
 0x382   :  { %5535 = vmatprep.subr.bf16.mxu0 %v10049_v52 }
 0x385   :  { %5537 = vmatpush1.bf16.msra.mxu0 %v10050_v21 }
 0x386   :  { %5539 = vmatprep.subr.bf16.mxu0 %v10051_v47 }
 0x389   :  { %5541 = vmatpush1.bf16.msra.mxu0 %v10052_v61 }
 0x38a   :  { %5543 = vmatprep.subr.bf16.mxu0 %v10053_v1 }
 0x38d   :  { %5545 = vmatpush1.bf16.msra.mxu0 %v10054_v27  ;;  %v10056_v27 = vld [vmem:[#allocation162_spill] sm:$0xff] }
 0x38e   :  { %5611 = vmatprep.subr.bf16.mxu0 %v10055_v56 }
 0x3c3   :  { %v1313_v19 = vpop.f32.mrb[10].mxu0  ;;  %v1384_v32 = vpop.f32.mrb[10].mxu1 }
 0x3c4   :  { %v1608_v14 = vadd.f32 %v1605_v36, %v1313_v19  ;;  %v1315_v8 = vpop.f32.mrb[11].mxu0  ;;  %v1386_v40 = vpop.f32.mrb[11].mxu1  ;;  %v1622_v2 = vadd.f32 %v10056_v27, %v1384_v32 }
 0x3c5   :  { %v1609_v23 = vadd.f32 %v1606_v48, %v1315_v8 }
 0x3c6   :  { %v4211_v52 = vmul.f32 -1.442695, %v1608_v14 }
 0x3c7   :  { %v4212_v21 = vmul.f32 -1.442695, %v1609_v23 }
 0x3c8   :  { %7187 = vpow2.f32 %v4211_v52  ;;  %v10057_v52 = vld [vmem:[#allocation80_spill] sm:$0xff] }
 0x3c9   :  { %7189 = vpow2.f32 %v4212_v21 }
 0x3d2   :  { %v7188_v47 = vpop.eup %7187 }
 0x3d3   :  { %v1616_v61 = vadd.f32 1.0, %v7188_v47  ;;  %v7190_v1 = vpop.eup %7189  ;;  %v10058_v47 = vld [vmem:[#allocation90_spill] sm:$0xff] }
 0x3d4   :  { %v1617_v20 = vadd.f32 1.0, %v7190_v1 }
 0x3d5   :  { %7191 = vrcp.f32 %v1616_v61  ;;  %v1601_v61 = vadd.f32 %v1386_v40, %v10057_v52 }
 0x3d6   :  { %7193 = vrcp.f32 %v1617_v20 }
 0x3df   :  { %v7192_v56 = vpop.eup %7191 }
 0x3e0   :  { %v1623_v15 = vmul.f32 %v7192_v56, %v1622_v2  ;;  %v7194_v19 = vpop.eup %7193 }
 0x3e1   :  { %v1626_v30 = vsub.f32 1.0, %v7194_v19  ;;  %v1628_v23 = vmul.f32 %v7194_v19, %v8231_v58 }
 0x3e2   :  { %v1624_v36 = vadd.f32 %v1623_v15, %v1607_v4 }
 0x3e4   :  { %7195 = vtanh.f32 %v1624_v36 }
 0x3ee   :  { %v7196_v14 = vpop.eup %7195 }
 0x3ef   :  { %v1627_v8 = vmul.f32 %v7196_v14, %v1626_v30 }
 0x3f1   :  { %v8403_v48 = vadd.f32 %v1628_v23, %v1627_v8 }
 0x403   :  { %v1455_v21 = vpop.f32.mrb[12].mxu0  ;;  %v1526_v1 = vpop.f32.mrb[12].mxu1 }
 0x404   :  { %v1602_v32 = vadd.f32 %v1455_v21, %v10058_v47  ;;  %v1630_v27 = vadd.f32 %v1601_v61, %v1526_v1  ;;  %v1457_v3 = vpop.f32.mrb[13].mxu0  ;;  %v1528_v2 = vpop.f32.mrb[13].mxu1 }
 0x405   :  { %v1603_v61 = vadd.f32 %v1457_v3, %v8241_v50  ;;  %v10060_v3 = vld [vmem:[#allocation99_spill] sm:$0xff] }
 0x406   :  { %v1631_v20 = vadd.f32 %v1602_v32, %v1528_v2  ;;  %v4213_v4 = vmul.f32 -1.442695, %v1630_v27 }
 0x408   :  { %7197 = vpow2.f32 %v4213_v4  ;;  %v4214_v15 = vmul.f32 -1.442695, %v1631_v20 }
 0x40a   :  { %7199 = vpow2.f32 %v4214_v15 }
 0x412   :  { %v7198_v56 = vpop.eup %7197 }
 0x413   :  { %v1638_v30 = vadd.f32 1.0, %v7198_v56  ;;  %v10061_v56 = vld [vmem:[#allocation92_spill] sm:$0xff] }
 0x414   :  { %v7200_v58 = vpop.eup %7199 }
 0x415   :  { %7201 = vrcp.f32 %v1638_v30  ;;  %v1639_v14 = vadd.f32 1.0, %v7200_v58  ;;  %v10062_v30 = vld [vmem:[#allocation102_spill] sm:$0xff]  ;;  %v10063_v58 = vld [vmem:[#allocation93_spill] sm:$0xff] }
 0x417   :  { %7203 = vrcp.f32 %v1639_v14  ;;  %v10066_v14 = vld [vmem:[#allocation106_spill] sm:$0xff] }
 0x41f   :  { %v7202_v23 = vpop.eup %7201 }
 0x421   :  { %v7204_v32 = vpop.eup %7203 }
 0x422   :  { %v1648_v27 = vsub.f32 1.0, %v7204_v32  ;;  %v1650_v20 = vmul.f32 %v7204_v32, %v8245_v63  ;;  %v10059_v63 = vld [vmem:[#allocation89_spill] sm:$0xff]  ;;  %v10073_v32 = vld [vmem:[#allocation104_spill] sm:$0xff] }
 0x423   :  { %v4341_v36 = vpop.f32.mrb[14].mxu0 }
 0x424   :  { %v4342_v19 = vpop.f32.mrb[15].mxu0 }
 0x425   :  { %v4343_v40 = vadd.f32 %v4342_v19, %v4341_v36  ;;  %v10064_v36 = vld [vmem:[#allocation103_spill] sm:$0xff]  ;;  %v10065_v19 = vld [vmem:[#allocation96_spill] sm:$0xff] }
 0x427   :  { %v1644_v8 = vadd.f32 %v4343_v40, %v8239_v17  ;;  %v10067_v40 = vld [vmem:[#allocation97_spill] sm:$0xff] }
 0x429   :  { %v1645_v21 = vmul.f32 %v7202_v23, %v1644_v8  ;;  %v10068_v8 = vld [vmem:[#allocation107_spill] sm:$0xff]  ;;  %v10069_v23 = vld [vmem:[#allocation100_spill] sm:$0xff] }
 0x42b   :  { %v1646_v1 = vadd.f32 %v1645_v21, %v1603_v61  ;;  %v10070_v61 = vld [vmem:[#allocation110_spill] sm:$0xff]  ;;  %v10071_v21 = vld [vmem:[#allocation101_spill] sm:$0xff] }
 0x42d   :  { %7205 = vtanh.f32 %v1646_v1  ;;  %v10072_v1 = vld [vmem:[#allocation111_spill] sm:$0xff] }
 0x437   :  { %v7206_v2 = vpop.eup %7205 }
 0x438   :  { %v1649_v4 = vmul.f32 %v7206_v2, %v1648_v27  ;;  %v10074_v27 = vld [vmem:[#allocation114_spill] sm:$0xff]  ;;  %v10075_v2 = vld [vmem:[#allocation105_spill] sm:$0xff] }
 0x43a   :  { %v8410_v15 = vadd.f32 %v1650_v20, %v1649_v4  ;;  %v10076_v20 = vld [vmem:[#allocation115_spill] sm:$0xff]  ;;  %v10077_v4 = vld [vmem:[#allocation108_spill] sm:$0xff] }
 0x43c   :  { %1730 = vmatprep.mubr.f32.mxu1 %v8410_v15  ;;  %1801 = vmatprep.mubr.f32.mxu0 %v8410_v15 }
 0x43d   :  { %1731 = vmatmul.mubr.f32.vlgmr.msra.gmra.mrb[14].mxu1 %v8403_v48  ;;  %1802 = vmatmul.mubr.f32.vlgmr.msra.gmra.mrb[16].mxu0 %v8403_v48 }
 0x43e   :  { %5549 = vmatpush1.bf16.msra.mxu1 %v9854_v41  ;;  %5613 = vmatpush1.bf16.msra.mxu0 %v9855_v44 }
 0x43f   :  { %1872 = vmatprep.mubr.f32.mxu1 %v8410_v15  ;;  %1943 = vmatprep.mubr.f32.mxu0 %v8410_v15 }
 0x440   :  { %5551 = vmatprep.subr.bf16.mxu1 %v9856_v59  ;;  %5615 = vmatprep.subr.bf16.mxu0 %v9954_v6 }
 0x442   :  { %5553 = vmatpush1.bf16.msra.mxu1 %v9955_v25  ;;  %5617 = vmatpush1.bf16.msra.mxu0 %v9956_v35 }
 0x443   :  { %5555 = vmatprep.subr.bf16.mxu1 %v9957_v33  ;;  %5619 = vmatprep.subr.bf16.mxu0 %v9958_v37 }
 0x446   :  { %5557 = vmatpush1.bf16.msra.mxu1 %v9959_v31  ;;  %5621 = vmatpush1.bf16.msra.mxu0 %v9960_v10 }
 0x447   :  { %5559 = vmatprep.subr.bf16.mxu1 %v10059_v63  ;;  %5623 = vmatprep.subr.bf16.mxu0 %v10060_v3 }
 0x44a   :  { %5561 = vmatpush1.bf16.msra.mxu1 %v10061_v56  ;;  %5625 = vmatpush1.bf16.msra.mxu0 %v10062_v30 }
 0x44b   :  { %5563 = vmatprep.subr.bf16.mxu1 %v10063_v58  ;;  %5627 = vmatprep.subr.bf16.mxu0 %v10064_v36 }
 0x44e   :  { %5565 = vmatpush1.bf16.msra.mxu1 %v10065_v19  ;;  %5629 = vmatpush1.bf16.msra.mxu0 %v10066_v14 }
 0x44f   :  { %5567 = vmatprep.subr.bf16.mxu1 %v10067_v40  ;;  %5631 = vmatprep.subr.bf16.mxu0 %v10068_v8  ;;  %v10078_v40 = vld [vmem:[#allocation118_spill] sm:$0xff]  ;;  %v10079_v8 = vld [vmem:[#allocation109_spill] sm:$0xff] }
 0x452   :  { %5569 = vmatpush1.bf16.msra.mxu1 %v10069_v23  ;;  %5633 = vmatpush1.bf16.msra.mxu0 %v10070_v61  ;;  %v10080_v23 = vld [vmem:[#allocation119_spill] sm:$0xff] }
 0x453   :  { %5571 = vmatprep.subr.bf16.mxu1 %v10071_v21  ;;  %5635 = vmatprep.subr.bf16.mxu0 %v10072_v1  ;;  %v10081_v21 = vld [vmem:[#allocation122_spill] sm:$0xff] }
 0x456   :  { %5573 = vmatpush1.bf16.msra.mxu1 %v10073_v32  ;;  %5637 = vmatpush1.bf16.msra.mxu0 %v10074_v27  ;;  %v10082_v32 = vld [vmem:[#allocation123_spill] sm:$0xff] }
 0x457   :  { %5575 = vmatprep.subr.bf16.mxu1 %v10075_v2  ;;  %5639 = vmatprep.subr.bf16.mxu0 %v10076_v20 }
 0x45a   :  { %5577 = vmatpush1.bf16.msra.mxu1 %v10077_v4  ;;  %5641 = vmatpush1.bf16.msra.mxu0 %v10078_v40 }
 0x45b   :  { %5579 = vmatprep.subr.bf16.mxu1 %v10079_v8  ;;  %5643 = vmatprep.subr.bf16.mxu0 %v10080_v23 }
 0x45e   :  { %5581 = vmatpush1.bf16.msra.mxu1 %v9983_v28  ;;  %5645 = vmatpush1.bf16.msra.mxu0 %v10081_v21 }
 0x45f   :  { %5583 = vmatprep.subr.bf16.mxu1 %v9985_v53  ;;  %5647 = vmatprep.subr.bf16.mxu0 %v10082_v32  ;;  %v10083_v32 = vld [vmem:[#allocation125_spill] sm:$0xff] }
 0x462   :  { %5585 = vmatpush1.bf16.msra.mxu1 %v9987_v45  ;;  %5649 = vmatpush1.bf16.msra.mxu0 %v9988_v43 }
 0x463   :  { %5587 = vmatprep.subr.bf16.mxu1 %v9989_v51  ;;  %5651 = vmatprep.subr.bf16.mxu0 %v9990_v11  ;;  %v10084_v11 = vld [vmem:[#allocation129_spill] sm:$0xff] }
 0x466   :  { %5589 = vmatpush1.bf16.msra.mxu1 %v9991_v7  ;;  %5653 = vmatpush1.bf16.msra.mxu0 %v9992_v39  ;;  %v10085_v7 = vld [vmem:[#allocation139_spill] sm:$0xff]  ;;  %v10086_v39 = vld [vmem:[#allocation132_spill] sm:$0xff] }
 0x467   :  { %5591 = vmatprep.subr.bf16.mxu1 %v9993_v54  ;;  %5655 = vmatprep.subr.bf16.mxu0 %v9897_v0 }
 0x46a   :  { %5593 = vmatpush1.bf16.msra.mxu1 %v9994_v34  ;;  %5657 = vmatpush1.bf16.msra.mxu0 %v9899_v55 }
 0x46b   :  { %5595 = vmatprep.subr.bf16.mxu1 %v10083_v32  ;;  %5659 = vmatprep.subr.bf16.mxu0 %v9901_v60  ;;  %v10087_v60 = vld [vmem:[#allocation137_spill] sm:$0xff] }
 0x46e   :  { %5597 = vmatpush1.bf16.msra.mxu1 %v9902_v62  ;;  %5661 = vmatpush1.bf16.msra.mxu0 %v9903_v29 }
 0x46f   :  { %5599 = vmatprep.subr.bf16.mxu1 %v10084_v11  ;;  %5663 = vmatprep.subr.bf16.mxu0 %v10085_v7  ;;  %v10088_v7 = vld [vmem:[#allocation141_spill] sm:$0xff]  ;;  %v2026_v11 = vld [vmem:[#allocation4 + $0x58] sm:$0xff] }
 0x472   :  { %5601 = vmatpush1.bf16.msra.mxu1 %v10086_v39  ;;  %5665 = vmatpush1.bf16.msra.mxu0 %v7937_v42 }
 0x473   :  { %5603 = vmatprep.subr.bf16.mxu1 %v9907_v24  ;;  %5667 = vmatprep.subr.bf16.mxu0 %v7940_v12 }
 0x476   :  { %5605 = vmatpush1.bf16.msra.mxu1 %v9908_v46  ;;  %5669 = vmatpush1.bf16.msra.mxu0 %v9996_v18 }
 0x477   :  { %5607 = vmatprep.subr.bf16.mxu1 %v10087_v60  ;;  %5671 = vmatprep.subr.bf16.mxu0 %v7952_v16  ;;  %v10093_v16 = vld [vmem:[#allocation152_spill] sm:$0xff] }
 0x478   :  { %v10095_v60 = vld [vmem:[#allocation24_spill] sm:$0xff] }
 0x47a   :  { %5609 = vmatpush1.bf16.msra.mxu1 %v9910_v38  ;;  %5673 = vmatpush1.bf16.msra.mxu0 %v9997_v13  ;;  %v10089_v13 = vld [vmem:[#allocation149_spill] sm:$0xff]  ;;  %v10092_v38 = vld [vmem:[#allocation151_spill] sm:$0xff] }
 0x47b   :  { %5675 = vmatprep.subr.bf16.mxu1 %v10088_v7  ;;  %5707 = vmatprep.subr.bf16.mxu0 %v9999_v26  ;;  %v10090_v7 = vld [vmem:[#allocation21_spill] sm:$0xff]  ;;  %v10091_v26 = vld [vmem:[#allocation22_spill] sm:$0xff] }
 0x47d   :  { %1873 = vmatmul.mubr.f32.vlgmr.msra.gmra.mrb[16].mxu1 %v8403_v48  ;;  %1944 = vmatmul.mubr.f32.vlgmr.msra.gmra.mrb[18].mxu0 %v8403_v48 }
 0x47e   :  { %5677 = vmatpush3.bf16.msra.mxu1 %v7943_v57  ;;  %2014 = vmatprep.mubr.f32.mxu1 %v8410_v15  ;;  %v10094_v57 = vld [vmem:[#allocation23_spill] sm:$0xff] }
 0x47f   :  { %5679 = vmatprep.subr.bf16.mxu1 %v9911_v22  ;;  %5709 = vmatpush1.bf16.msra.mxu0 %v10000_v5  ;;  %v10096_v22 = vld [vmem:[#allocation153_spill] sm:$0xff]  ;;  %v10097_v5 = vld [vmem:[#allocation154_spill] sm:$0xff] }
 0x480   :  { %5711 = vmatprep.subr.bf16.mxu0 %v7568_v9  ;;  %v10098_v9 = vld [vmem:[#allocation27_spill] sm:$0xff] }
 0x482   :  { %5681 = vmatpush3.bf16.msra.mxu1 %v7956_v49  ;;  %v10099_v49 = vld [vmem:[#allocation28_spill] sm:$0xff] }
 0x483   :  { %5683 = vmatprep.subr.bf16.mxu1 %v10089_v13  ;;  %5713 = vmatpush1.bf16.msra.mxu0 %v10090_v7  ;;  %v10100_v13 = vld [vmem:[#allocation155_spill] sm:$0xff]  ;;  %v10101_v7 = vld [vmem:[#allocation156_spill] sm:$0xff] }
 0x484   :  { %5715 = vmatprep.subr.bf16.mxu0 %v10091_v26  ;;  %v10102_v26 = vld [vmem:[#allocation31_spill] sm:$0xff] }
 0x486   :  { %5685 = vmatpush3.bf16.msra.mxu1 %v10092_v38  ;;  %v10103_v38 = vld [vmem:[#allocation33_spill] sm:$0xff] }
 0x487   :  { %5687 = vmatprep.subr.bf16.mxu1 %v10093_v16  ;;  %5717 = vmatpush1.bf16.msra.mxu0 %v10094_v57  ;;  %v10104_v16 = vld [vmem:[#allocation157_spill] sm:$0xff]  ;;  %v10105_v57 = vld [vmem:[#allocation158_spill] sm:$0xff] }
 0x488   :  { %5719 = vmatprep.subr.bf16.mxu0 %v10095_v60  ;;  %v10106_v60 = vld [vmem:[#allocation36_spill] sm:$0xff] }
 0x48a   :  { %5689 = vmatpush3.bf16.msra.mxu1 %v10096_v22  ;;  %v10107_v22 = vld [vmem:[#allocation37_spill] sm:$0xff] }
 0x48b   :  { %5691 = vmatprep.subr.bf16.mxu1 %v10097_v5  ;;  %5721 = vmatpush1.bf16.msra.mxu0 %v10098_v9  ;;  %v10108_v5 = vld [vmem:[#allocation159_spill] sm:$0xff]  ;;  %v10109_v9 = vld [vmem:[#allocation160_spill] sm:$0xff] }
 0x48c   :  { %5723 = vmatprep.subr.bf16.mxu0 %v10099_v49  ;;  %v10110_v49 = vld [vmem:[#allocation40_spill] sm:$0xff] }
 0x48e   :  { %5693 = vmatpush3.bf16.msra.mxu1 %v10100_v13  ;;  %v10111_v13 = vld [vmem:[#allocation41_spill] sm:$0xff] }
 0x48f   :  { %5695 = vmatprep.subr.bf16.mxu1 %v10101_v7  ;;  %5725 = vmatpush1.bf16.msra.mxu0 %v10102_v26  ;;  %v10112_v7 = vld [vmem:[#allocation161_spill] sm:$0xff] }
 0x490   :  { %5727 = vmatprep.subr.bf16.mxu0 %v10103_v38  ;;  %v10113_v26 = vld [vmem:[#allocation25_spill] sm:$0xff]  ;;  %v10114_v38 = vld [vmem:[#allocation44_spill] sm:$0xff] }
 0x492   :  { %5697 = vmatpush3.bf16.msra.mxu1 %v10104_v16  ;;  %v10115_v16 = vld [vmem:[#allocation45_spill] sm:$0xff] }
 0x493   :  { %5699 = vmatprep.subr.bf16.mxu1 %v10105_v57  ;;  %5729 = vmatpush1.bf16.msra.mxu0 %v10106_v60  ;;  %v10116_v60 = vld [vmem:[#allocation26_spill] sm:$0xff]  ;;  %v10126_v57 = vld [vmem:[#allocation56_spill] sm:$0xff] }
 0x494   :  { %5731 = vmatprep.subr.bf16.mxu0 %v10107_v22  ;;  %v10117_v22 = vld [vmem:[#allocation29_spill] sm:$0xff] }
 0x496   :  { %5701 = vmatpush3.bf16.msra.mxu1 %v10108_v5  ;;  %v10118_v5 = vld [vmem:[#allocation48_spill] sm:$0xff] }
 0x497   :  { %5703 = vmatprep.subr.bf16.mxu1 %v10109_v9  ;;  %5733 = vmatpush1.bf16.msra.mxu0 %v10110_v49  ;;  %v10119_v9 = vld [vmem:[#allocation49_spill] sm:$0xff]  ;;  %v10120_v49 = vld [vmem:[#allocation30_spill] sm:$0xff] }
 0x498   :  { %5735 = vmatprep.subr.bf16.mxu0 %v10111_v13  ;;  %v10121_v13 = vld [vmem:[#allocation32_spill] sm:$0xff] }
 0x49a   :  { %5705 = vmatpush3.bf16.msra.mxu1 %v10112_v7  ;;  %v10122_v7 = vld [vmem:[#allocation52_spill] sm:$0xff] }
 0x49b   :  { %5771 = vmatprep.subr.bf16.mxu1 %v10113_v26  ;;  %5737 = vmatpush1.bf16.msra.mxu0 %v10114_v38  ;;  %v10123_v26 = vld [vmem:[#allocation53_spill] sm:$0xff]  ;;  %v10124_v38 = vld [vmem:[#allocation34_spill] sm:$0xff] }
 0x49c   :  { %5739 = vmatprep.subr.bf16.mxu0 %v10115_v16  ;;  %v10125_v16 = vld [vmem:[#allocation35_spill] sm:$0xff] }
 0x49d   :  { %2015 = vmatmul.mubr.f32.vlgmr.msra.gmra.mrb[18].mxu1 %v8403_v48 }
 0x49e   :  { %5773 = vmatpush1.bf16.msra.mxu1 %v10116_v60  ;;  %v10127_v60 = vld [vmem:[#allocation57_spill] sm:$0xff] }
 0x49f   :  { %5775 = vmatprep.subr.bf16.mxu1 %v10117_v22  ;;  %5741 = vmatpush1.bf16.msra.mxu0 %v10118_v5  ;;  %v10128_v22 = vld [vmem:[#allocation38_spill] sm:$0xff]  ;;  %v10129_v5 = vld [vmem:[#allocation39_spill] sm:$0xff] }
 0x4a0   :  { %5743 = vmatprep.subr.bf16.mxu0 %v10119_v9  ;;  %v10130_v9 = vld [vmem:[#allocation60_spill] sm:$0xff] }
 0x4a2   :  { %5777 = vmatpush1.bf16.msra.mxu1 %v10120_v49  ;;  %v10131_v49 = vld [vmem:[#allocation61_spill] sm:$0xff] }
 0x4a3   :  { %5779 = vmatprep.subr.bf16.mxu1 %v10121_v13  ;;  %5745 = vmatpush1.bf16.msra.mxu0 %v10122_v7  ;;  %v10132_v13 = vld [vmem:[#allocation42_spill] sm:$0xff]  ;;  %v10133_v7 = vld [vmem:[#allocation43_spill] sm:$0xff] }
 0x4a4   :  { %5747 = vmatprep.subr.bf16.mxu0 %v10123_v26  ;;  %v10134_v26 = vld [vmem:[#allocation64_spill] sm:$0xff] }
 0x4a6   :  { %5781 = vmatpush1.bf16.msra.mxu1 %v10124_v38  ;;  %v10135_v38 = vld [vmem:[#allocation65_spill] sm:$0xff] }
 0x4a7   :  { %5783 = vmatprep.subr.bf16.mxu1 %v10125_v16  ;;  %5749 = vmatpush1.bf16.msra.mxu0 %v10126_v57  ;;  %v10136_v16 = vld [vmem:[#allocation46_spill] sm:$0xff]  ;;  %v10137_v57 = vld [vmem:[#allocation47_spill] sm:$0xff] }
 0x4a8   :  { %5751 = vmatprep.subr.bf16.mxu0 %v10127_v60  ;;  %v10138_v60 = vld [vmem:[#allocation68_spill] sm:$0xff] }
 0x4aa   :  { %5785 = vmatpush1.bf16.msra.mxu1 %v10128_v22  ;;  %v10139_v22 = vld [vmem:[#allocation69_spill] sm:$0xff] }
 0x4ab   :  { %5787 = vmatprep.subr.bf16.mxu1 %v10129_v5  ;;  %5753 = vmatpush1.bf16.msra.mxu0 %v10130_v9  ;;  %v10140_v5 = vld [vmem:[#allocation50_spill] sm:$0xff]  ;;  %v10141_v9 = vld [vmem:[#allocation51_spill] sm:$0xff] }
 0x4ac   :  { %5755 = vmatprep.subr.bf16.mxu0 %v10131_v49  ;;  %v10142_v49 = vld [vmem:[#allocation72_spill] sm:$0xff] }
 0x4ae   :  { %5789 = vmatpush1.bf16.msra.mxu1 %v10132_v13  ;;  %v10143_v13 = vld [vmem:[#allocation73_spill] sm:$0xff] }
 0x4af   :  { %5791 = vmatprep.subr.bf16.mxu1 %v10133_v7  ;;  %5757 = vmatpush1.bf16.msra.mxu0 %v10134_v26  ;;  %v10144_v7 = vld [vmem:[#allocation54_spill] sm:$0xff]  ;;  %v10145_v26 = vld [vmem:[#allocation55_spill] sm:$0xff] }
 0x4b0   :  { %5759 = vmatprep.subr.bf16.mxu0 %v10135_v38  ;;  %v10146_v38 = vld [vmem:[#allocation76_spill] sm:$0xff] }
 0x4b2   :  { %5793 = vmatpush1.bf16.msra.mxu1 %v10136_v16  ;;  %v10147_v16 = vld [vmem:[#allocation78_spill] sm:$0xff] }
 0x4b3   :  { %5795 = vmatprep.subr.bf16.mxu1 %v10137_v57  ;;  %5761 = vmatpush1.bf16.msra.mxu0 %v10138_v60  ;;  %v10148_v57 = vld [vmem:[#allocation58_spill] sm:$0xff]  ;;  %v10149_v60 = vld [vmem:[#allocation59_spill] sm:$0xff] }
 0x4b4   :  { %5763 = vmatprep.subr.bf16.mxu0 %v10139_v22  ;;  %v10150_v22 = vld [vmem:[#allocation62_spill] sm:$0xff] }
 0x4b6   :  { %5797 = vmatpush1.bf16.msra.mxu1 %v10140_v5  ;;  %v10151_v5 = vld [vmem:[#allocation63_spill] sm:$0xff] }
 0x4b7   :  { %5799 = vmatprep.subr.bf16.mxu1 %v10141_v9  ;;  %5765 = vmatpush1.bf16.msra.mxu0 %v10142_v49  ;;  %v10152_v9 = vld [vmem:[#allocation66_spill] sm:$0xff]  ;;  %v10153_v49 = vld [vmem:[#allocation67_spill] sm:$0xff] }
 0x4b8   :  { %5767 = vmatprep.subr.bf16.mxu0 %v10143_v13  ;;  %v10154_v13 = vld [vmem:[#allocation70_spill] sm:$0xff] }
 0x4ba   :  { %5801 = vmatpush1.bf16.msra.mxu1 %v10144_v7  ;;  %v10155_v7 = vld [vmem:[#allocation71_spill] sm:$0xff] }
 0x4bb   :  { %5803 = vmatprep.subr.bf16.mxu1 %v10145_v26  ;;  %5769 = vmatpush1.bf16.msra.mxu0 %v10146_v38  ;;  %v10156_v26 = vld [vmem:[#allocation74_spill] sm:$0xff]  ;;  %v10157_v38 = vld [vmem:[#allocation75_spill] sm:$0xff] }
 0x4bc   :  { %5835 = vmatprep.subr.bf16.mxu0 %v10147_v16  ;;  %v10158_v16 = vld [vmem:[#allocation77_spill] sm:$0xff] }
 0x4be   :  { %5805 = vmatpush1.bf16.msra.mxu1 %v10148_v57  ;;  %v10159_v57 = vld [vmem:[#allocation79_spill] sm:$0xff] }
 0x4bf   :  { %5807 = vmatprep.subr.bf16.mxu1 %v10149_v60  ;;  %v10160_v60 = vld [vmem:[#allocation81_spill] sm:$0xff] }
 0x4c2   :  { %5809 = vmatpush1.bf16.msra.mxu1 %v10150_v22  ;;  %v10161_v22 = vld [vmem:[#allocation83_spill] sm:$0xff] }
 0x4c3   :  { %5811 = vmatprep.subr.bf16.mxu1 %v10151_v5  ;;  %v10162_v5 = vld [vmem:[#allocation85_spill] sm:$0xff] }
 0x4c6   :  { %5813 = vmatpush1.bf16.msra.mxu1 %v10152_v9  ;;  %v10163_v9 = vld [vmem:[#allocation87_spill] sm:$0xff] }
 0x4c7   :  { %5815 = vmatprep.subr.bf16.mxu1 %v10153_v49  ;;  %v2024_v49 = vld [vmem:[#allocation4 + $0x48] sm:$0xff] }
 0x4ca   :  { %5817 = vmatpush1.bf16.msra.mxu1 %v10154_v13 }
 0x4cb   :  { %5819 = vmatprep.subr.bf16.mxu1 %v10155_v7 }
 0x4ce   :  { %5821 = vmatpush1.bf16.msra.mxu1 %v10156_v26  ;;  %v2025_v26 = vld [vmem:[#allocation4 + $0x50] sm:$0xff] }
 0x4cf   :  { %5823 = vmatprep.subr.bf16.mxu1 %v10157_v38 }
 0x4d2   :  { %5825 = vmatpush1.bf16.msra.mxu1 %v10158_v16 }
 0x4d3   :  { %5827 = vmatprep.subr.bf16.mxu1 %v10159_v57 }
 0x4d6   :  { %5829 = vmatpush1.bf16.msra.mxu1 %v10160_v60 }
 0x4d7   :  { %5831 = vmatprep.subr.bf16.mxu1 %v10161_v22 }
 0x4da   :  { %5833 = vmatpush1.bf16.msra.mxu1 %v10162_v5  ;;  %v8566_v5 = vld [vmem:[#allocation10] ss:$0 sm:$0xff] }
 0x4db   :  { %5899 = vmatprep.subr.bf16.mxu1 %v10163_v9  ;;  %10164 = vst [vmem:[#allocation82_spill] sm:$0xff] %v8566_v5 }
 0x510   :  { %v1732_v13 = vpop.f32.mrb[14].mxu1  ;;  %v1803_v18 = vpop.f32.mrb[16].mxu0 }
 0x511   :  { %v2027_v7 = vadd.f32 %v2024_v49, %v1732_v13  ;;  %v1734_v46 = vpop.f32.mrb[15].mxu1  ;;  %v1805_v12 = vpop.f32.mrb[17].mxu0  ;;  %v2041_v9 = vadd.f32 %v8566_v5, %v1803_v18 }
 0x512   :  { %v2028_v24 = vadd.f32 %v2025_v26, %v1734_v46 }
 0x513   :  { %v4215_v38 = vmul.f32 -1.442695, %v2027_v7 }
 0x514   :  { %v4216_v16 = vmul.f32 -1.442695, %v2028_v24 }
 0x515   :  { %7207 = vpow2.f32 %v4215_v38 }
 0x516   :  { %7209 = vpow2.f32 %v4216_v16 }
 0x51f   :  { %v7208_v57 = vpop.eup %7207 }
 0x520   :  { %v2035_v60 = vadd.f32 1.0, %v7208_v57  ;;  %v7210_v22 = vpop.eup %7209 }
 0x521   :  { %v2036_v42 = vadd.f32 1.0, %v7210_v22  ;;  %v2020_v22 = vadd.f32 %v1805_v12, %v10057_v52 }
 0x522   :  { %7211 = vrcp.f32 %v2035_v60 }
 0x523   :  { %7213 = vrcp.f32 %v2036_v42 }
 0x52c   :  { %v7212_v39 = vpop.eup %7211 }
 0x52d   :  { %v2042_v49 = vmul.f32 %v7212_v39, %v2041_v9  ;;  %v7214_v7 = vpop.eup %7213 }
 0x52e   :  { %v2045_v26 = vsub.f32 1.0, %v7214_v7  ;;  %v2047_v16 = vmul.f32 %v7214_v7, %v8403_v48 }
 0x52f   :  { %v2043_v13 = vadd.f32 %v2042_v49, %v2026_v11 }
 0x531   :  { %7215 = vtanh.f32 %v2043_v13 }
 0x53b   :  { %v7216_v46 = vpop.eup %7215 }
 0x53c   :  { %v2046_v24 = vmul.f32 %v7216_v46, %v2045_v26 }
 0x53e   :  { %v8570_v57 = vadd.f32 %v2047_v16, %v2046_v24 }
 0x550   :  { %v1874_v60 = vpop.f32.mrb[16].mxu1  ;;  %v1945_v38 = vpop.f32.mrb[18].mxu0 }
 0x551   :  { %v2021_v18 = vadd.f32 %v1874_v60, %v10058_v47  ;;  %v2049_v5 = vadd.f32 %v2020_v22, %v1945_v38  ;;  %v1876_v29 = vpop.f32.mrb[17].mxu1  ;;  %v1947_v9 = vpop.f32.mrb[19].mxu0 }
 0x552   :  { %v2022_v22 = vadd.f32 %v1876_v29, %v8241_v50  ;;  %v10166_v29 = vld [vmem:[#allocation107_spill] sm:$0xff] }
 0x553   :  { %v2050_v42 = vadd.f32 %v2021_v18, %v1947_v9  ;;  %v4217_v11 = vmul.f32 -1.442695, %v2049_v5 }
 0x555   :  { %7217 = vpow2.f32 %v4217_v11  ;;  %v4218_v39 = vmul.f32 -1.442695, %v2050_v42 }
 0x557   :  { %7219 = vpow2.f32 %v4218_v39 }
 0x55f   :  { %v7218_v49 = vpop.eup %7217 }
 0x560   :  { %v2057_v13 = vadd.f32 1.0, %v7218_v49  ;;  %v10168_v49 = vld [vmem:[#allocation101_spill] sm:$0xff] }
 0x561   :  { %v7220_v48 = vpop.eup %7219 }
 0x562   :  { %7221 = vrcp.f32 %v2057_v13  ;;  %v2058_v46 = vadd.f32 1.0, %v7220_v48  ;;  %v10169_v13 = vld [vmem:[#allocation104_spill] sm:$0xff]  ;;  %v10170_v48 = vld [vmem:[#allocation123_spill] sm:$0xff] }
 0x564   :  { %7223 = vrcp.f32 %v2058_v46  ;;  %v10173_v46 = vld [vmem:[#allocation130_spill] sm:$0xff] }
 0x56c   :  { %v7222_v16 = vpop.eup %7221 }
 0x56e   :  { %v7224_v5 = vpop.eup %7223 }
 0x56f   :  { %v2067_v18 = vsub.f32 1.0, %v7224_v5  ;;  %v2069_v42 = vmul.f32 %v7224_v5, %v8410_v15  ;;  %v10167_v15 = vld [vmem:[#allocation100_spill] sm:$0xff]  ;;  %v10180_v5 = vld [vmem:[#allocation133_spill] sm:$0xff] }
 0x570   :  { %v4376_v7 = vpop.f32.mrb[18].mxu1 }
 0x571   :  { %v4377_v26 = vpop.f32.mrb[19].mxu1 }
 0x572   :  { %v4378_v12 = vadd.f32 %v4377_v26, %v4376_v7  ;;  %v10171_v7 = vld [vmem:[#allocation127_spill] sm:$0xff]  ;;  %v10172_v26 = vld [vmem:[#allocation120_spill] sm:$0xff] }
 0x574   :  { %v2063_v24 = vadd.f32 %v4378_v12, %v8239_v17  ;;  %v10165_v17 = vld [vmem:[#allocation97_spill] sm:$0xff]  ;;  %v10174_v12 = vld [vmem:[#allocation135_spill] sm:$0xff] }
 0x576   :  { %v2064_v60 = vmul.f32 %v7222_v16, %v2063_v24  ;;  %v10175_v24 = vld [vmem:[#allocation138_spill] sm:$0xff]  ;;  %v10176_v16 = vld [vmem:[#allocation129_spill] sm:$0xff] }
 0x578   :  { %v2065_v38 = vadd.f32 %v2064_v60, %v2022_v22  ;;  %v10177_v22 = vld [vmem:[#allocation139_spill] sm:$0xff]  ;;  %v10178_v60 = vld [vmem:[#allocation132_spill] sm:$0xff] }
 0x57a   :  { %7225 = vtanh.f32 %v2065_v38  ;;  %v10179_v38 = vld [vmem:[#allocation142_spill] sm:$0xff] }
 0x584   :  { %v7226_v9 = vpop.eup %7225 }
 0x585   :  { %v2068_v11 = vmul.f32 %v7226_v9, %v2067_v18  ;;  %v10181_v18 = vld [vmem:[#allocation143_spill] sm:$0xff]  ;;  %v10182_v9 = vld [vmem:[#allocation136_spill] sm:$0xff] }
 0x587   :  { %v8577_v39 = vadd.f32 %v2069_v42, %v2068_v11  ;;  %v10183_v42 = vld [vmem:[#allocation146_spill] sm:$0xff]  ;;  %v10184_v11 = vld [vmem:[#allocation137_spill] sm:$0xff] }
 0x589   :  { %2149 = vmatprep.mubr.f32.mxu0 %v8577_v39  ;;  %2220 = vmatprep.mubr.f32.mxu1 %v8577_v39 }
 0x58a   :  { %2150 = vmatmul.mubr.f32.vlgmr.msra.gmra.mrb[20].mxu0 %v8570_v57  ;;  %2221 = vmatmul.mubr.f32.vlgmr.msra.gmra.mrb[20].mxu1 %v8570_v57 }
 0x58b   :  { %5837 = vmatpush1.bf16.msra.mxu0 %v9854_v41  ;;  %5901 = vmatpush1.bf16.msra.mxu1 %v9855_v44 }
 0x58c   :  { %2291 = vmatprep.mubr.f32.mxu0 %v8577_v39  ;;  %2362 = vmatprep.mubr.f32.mxu1 %v8577_v39 }
 0x58d   :  { %5839 = vmatprep.subr.bf16.mxu0 %v9856_v59  ;;  %5903 = vmatprep.subr.bf16.mxu1 %v9954_v6 }
 0x58f   :  { %5841 = vmatpush1.bf16.msra.mxu0 %v9955_v25  ;;  %5905 = vmatpush1.bf16.msra.mxu1 %v9956_v35 }
 0x590   :  { %5843 = vmatprep.subr.bf16.mxu0 %v9957_v33  ;;  %5907 = vmatprep.subr.bf16.mxu1 %v9958_v37 }
 0x593   :  { %5845 = vmatpush1.bf16.msra.mxu0 %v9959_v31  ;;  %5909 = vmatpush1.bf16.msra.mxu1 %v9960_v10 }
 0x594   :  { %5847 = vmatprep.subr.bf16.mxu0 %v10059_v63  ;;  %5911 = vmatprep.subr.bf16.mxu1 %v10060_v3 }
 0x597   :  { %5849 = vmatpush1.bf16.msra.mxu0 %v10061_v56  ;;  %5913 = vmatpush1.bf16.msra.mxu1 %v10062_v30 }
 0x598   :  { %5851 = vmatprep.subr.bf16.mxu0 %v10063_v58  ;;  %5915 = vmatprep.subr.bf16.mxu1 %v10064_v36 }
 0x59b   :  { %5853 = vmatpush1.bf16.msra.mxu0 %v10065_v19  ;;  %5917 = vmatpush1.bf16.msra.mxu1 %v10066_v14 }
 0x59c   :  { %5855 = vmatprep.subr.bf16.mxu0 %v10165_v17  ;;  %5919 = vmatprep.subr.bf16.mxu1 %v10166_v29 }
 0x59f   :  { %5857 = vmatpush1.bf16.msra.mxu0 %v10167_v15  ;;  %5921 = vmatpush1.bf16.msra.mxu1 %v10070_v61 }
 0x5a0   :  { %5859 = vmatprep.subr.bf16.mxu0 %v10168_v49  ;;  %5923 = vmatprep.subr.bf16.mxu1 %v10072_v1 }
 0x5a3   :  { %5861 = vmatpush1.bf16.msra.mxu0 %v10169_v13  ;;  %5925 = vmatpush1.bf16.msra.mxu1 %v10074_v27 }
 0x5a4   :  { %5863 = vmatprep.subr.bf16.mxu0 %v10075_v2  ;;  %5927 = vmatprep.subr.bf16.mxu1 %v10076_v20 }
 0x5a7   :  { %5865 = vmatpush1.bf16.msra.mxu0 %v10077_v4  ;;  %5929 = vmatpush1.bf16.msra.mxu1 %v10078_v40 }
 0x5a8   :  { %5867 = vmatprep.subr.bf16.mxu0 %v10079_v8  ;;  %5931 = vmatprep.subr.bf16.mxu1 %v10080_v23 }
 0x5ab   :  { %5869 = vmatpush1.bf16.msra.mxu0 %v9983_v28  ;;  %5933 = vmatpush1.bf16.msra.mxu1 %v10081_v21 }
 0x5ac   :  { %5871 = vmatprep.subr.bf16.mxu0 %v9985_v53  ;;  %5935 = vmatprep.subr.bf16.mxu1 %v10170_v48 }
 0x5af   :  { %5873 = vmatpush1.bf16.msra.mxu0 %v9987_v45  ;;  %5937 = vmatpush1.bf16.msra.mxu1 %v9988_v43 }
 0x5b0   :  { %5875 = vmatprep.subr.bf16.mxu0 %v9989_v51  ;;  %5939 = vmatprep.subr.bf16.mxu1 %v10171_v7 }
 0x5b3   :  { %5877 = vmatpush1.bf16.msra.mxu0 %v10172_v26  ;;  %5941 = vmatpush1.bf16.msra.mxu1 %v10173_v46  ;;  %v2445_v46 = vld [vmem:[#allocation4 + $0x70] sm:$0xff] }
 0x5b4   :  { %5879 = vmatprep.subr.bf16.mxu0 %v9993_v54  ;;  %5943 = vmatprep.subr.bf16.mxu1 %v9897_v0 }
 0x5b7   :  { %5881 = vmatpush1.bf16.msra.mxu0 %v9994_v34  ;;  %5945 = vmatpush1.bf16.msra.mxu1 %v9899_v55 }
 0x5b8   :  { %5883 = vmatprep.subr.bf16.mxu0 %v10083_v32  ;;  %5947 = vmatprep.subr.bf16.mxu1 %v10174_v12 }
 0x5bb   :  { %5885 = vmatpush1.bf16.msra.mxu0 %v9902_v62  ;;  %5949 = vmatpush1.bf16.msra.mxu1 %v10175_v24  ;;  %v10185_v62 = vld [vmem:[#allocation147_spill] sm:$0xff]  ;;  %v10186_v24 = vld [vmem:[#allocation140_spill] sm:$0xff] }
 0x5bc   :  { %5887 = vmatprep.subr.bf16.mxu0 %v10176_v16  ;;  %5951 = vmatprep.subr.bf16.mxu1 %v10177_v22  ;;  %v10187_v16 = vld [vmem:[#allocation150_spill] sm:$0xff]  ;;  %v10188_v22 = vld [vmem:[#allocation141_spill] sm:$0xff] }
 0x5bf   :  { %5889 = vmatpush1.bf16.msra.mxu0 %v10178_v60  ;;  %5953 = vmatpush1.bf16.msra.mxu1 %v10179_v38  ;;  %v10189_v60 = vld [vmem:[#allocation18_spill] sm:$0xff]  ;;  %v10201_v38 = vld [vmem:[#allocation24_spill] sm:$0xff] }
 0x5c0   :  { %5891 = vmatprep.subr.bf16.mxu0 %v10180_v5  ;;  %5955 = vmatprep.subr.bf16.mxu1 %v10181_v18  ;;  %v10190_v18 = vld [vmem:[#allocation144_spill] sm:$0xff] }
 0x5c1   :  { %v10199_v5 = vld [vmem:[#allocation152_spill] sm:$0xff] }
 0x5c3   :  { %5893 = vmatpush1.bf16.msra.mxu0 %v10182_v9  ;;  %5957 = vmatpush1.bf16.msra.mxu1 %v10183_v42  ;;  %v10191_v42 = vld [vmem:[#allocation145_spill] sm:$0xff]  ;;  %v10198_v9 = vld [vmem:[#allocation151_spill] sm:$0xff] }
 0x5c4   :  { %5895 = vmatprep.subr.bf16.mxu0 %v10184_v11  ;;  %5959 = vmatprep.subr.bf16.mxu1 %v10185_v62  ;;  %v10192_v11 = vld [vmem:[#allocation19_spill] sm:$0xff]  ;;  %v10193_v62 = vld [vmem:[#allocation20_spill] sm:$0xff] }
 0x5c7   :  { %5897 = vmatpush1.bf16.msra.mxu0 %v10186_v24  ;;  %5961 = vmatpush1.bf16.msra.mxu1 %v10187_v16  ;;  %v10194_v24 = vld [vmem:[#allocation148_spill] sm:$0xff]  ;;  %v10195_v16 = vld [vmem:[#allocation149_spill] sm:$0xff] }
 0x5c8   :  { %5963 = vmatprep.subr.bf16.mxu0 %v10188_v22  ;;  %5995 = vmatprep.subr.bf16.mxu1 %v10189_v60  ;;  %v10196_v22 = vld [vmem:[#allocation21_spill] sm:$0xff]  ;;  %v10197_v60 = vld [vmem:[#allocation22_spill] sm:$0xff] }
 0x5ca   :  { %2292 = vmatmul.mubr.f32.vlgmr.msra.gmra.mrb[22].mxu0 %v8570_v57  ;;  %2363 = vmatmul.mubr.f32.vlgmr.msra.gmra.mrb[22].mxu1 %v8570_v57 }
 0x5cb   :  { %5965 = vmatpush3.bf16.msra.mxu0 %v10190_v18  ;;  %2433 = vmatprep.mubr.f32.mxu0 %v8577_v39  ;;  %v10200_v18 = vld [vmem:[#allocation23_spill] sm:$0xff] }
 0x5cc   :  { %5967 = vmatprep.subr.bf16.mxu0 %v10191_v42  ;;  %5997 = vmatpush1.bf16.msra.mxu1 %v10192_v11  ;;  %v10202_v42 = vld [vmem:[#allocation153_spill] sm:$0xff]  ;;  %v10203_v11 = vld [vmem:[#allocation154_spill] sm:$0xff] }
 0x5cd   :  { %5999 = vmatprep.subr.bf16.mxu1 %v10193_v62  ;;  %v10204_v62 = vld [vmem:[#allocation27_spill] sm:$0xff] }
 0x5cf   :  { %5969 = vmatpush3.bf16.msra.mxu0 %v10194_v24  ;;  %v10205_v24 = vld [vmem:[#allocation28_spill] sm:$0xff] }
 0x5d0   :  { %5971 = vmatprep.subr.bf16.mxu0 %v10195_v16  ;;  %6001 = vmatpush1.bf16.msra.mxu1 %v10196_v22  ;;  %v10206_v16 = vld [vmem:[#allocation155_spill] sm:$0xff]  ;;  %v10207_v22 = vld [vmem:[#allocation156_spill] sm:$0xff] }
 0x5d1   :  { %6003 = vmatprep.subr.bf16.mxu1 %v10197_v60  ;;  %v10208_v60 = vld [vmem:[#allocation31_spill] sm:$0xff] }
 0x5d3   :  { %5973 = vmatpush3.bf16.msra.mxu0 %v10198_v9  ;;  %v10209_v9 = vld [vmem:[#allocation33_spill] sm:$0xff] }
 0x5d4   :  { %5975 = vmatprep.subr.bf16.mxu0 %v10199_v5  ;;  %6005 = vmatpush1.bf16.msra.mxu1 %v10200_v18  ;;  %v10210_v5 = vld [vmem:[#allocation157_spill] sm:$0xff]  ;;  %v10211_v18 = vld [vmem:[#allocation158_spill] sm:$0xff] }
 0x5d5   :  { %6007 = vmatprep.subr.bf16.mxu1 %v10201_v38  ;;  %v10212_v38 = vld [vmem:[#allocation36_spill] sm:$0xff] }
 0x5d7   :  { %5977 = vmatpush3.bf16.msra.mxu0 %v10202_v42  ;;  %v10213_v42 = vld [vmem:[#allocation37_spill] sm:$0xff] }
 0x5d8   :  { %5979 = vmatprep.subr.bf16.mxu0 %v10203_v11  ;;  %6009 = vmatpush1.bf16.msra.mxu1 %v10204_v62  ;;  %v10214_v11 = vld [vmem:[#allocation159_spill] sm:$0xff]  ;;  %v10215_v62 = vld [vmem:[#allocation160_spill] sm:$0xff] }
 0x5d9   :  { %6011 = vmatprep.subr.bf16.mxu1 %v10205_v24  ;;  %v10216_v24 = vld [vmem:[#allocation40_spill] sm:$0xff] }
 0x5db   :  { %5981 = vmatpush3.bf16.msra.mxu0 %v10206_v16  ;;  %v10217_v16 = vld [vmem:[#allocation41_spill] sm:$0xff] }
 0x5dc   :  { %5983 = vmatprep.subr.bf16.mxu0 %v10207_v22  ;;  %6013 = vmatpush1.bf16.msra.mxu1 %v10208_v60  ;;  %v10218_v22 = vld [vmem:[#allocation161_spill] sm:$0xff] }
 0x5dd   :  { %6015 = vmatprep.subr.bf16.mxu1 %v10209_v9  ;;  %v10219_v60 = vld [vmem:[#allocation25_spill] sm:$0xff]  ;;  %v10220_v9 = vld [vmem:[#allocation44_spill] sm:$0xff] }
 0x5df   :  { %5985 = vmatpush3.bf16.msra.mxu0 %v10210_v5  ;;  %v10221_v5 = vld [vmem:[#allocation45_spill] sm:$0xff] }
 0x5e0   :  { %5987 = vmatprep.subr.bf16.mxu0 %v10211_v18  ;;  %6017 = vmatpush1.bf16.msra.mxu1 %v10212_v38  ;;  %v10222_v38 = vld [vmem:[#allocation26_spill] sm:$0xff]  ;;  %v10232_v18 = vld [vmem:[#allocation56_spill] sm:$0xff] }
 0x5e1   :  { %6019 = vmatprep.subr.bf16.mxu1 %v10213_v42  ;;  %v10223_v42 = vld [vmem:[#allocation29_spill] sm:$0xff] }
 0x5e3   :  { %5989 = vmatpush3.bf16.msra.mxu0 %v10214_v11  ;;  %v10224_v11 = vld [vmem:[#allocation48_spill] sm:$0xff] }
 0x5e4   :  { %5991 = vmatprep.subr.bf16.mxu0 %v10215_v62  ;;  %6021 = vmatpush1.bf16.msra.mxu1 %v10216_v24  ;;  %v10225_v62 = vld [vmem:[#allocation49_spill] sm:$0xff]  ;;  %v10226_v24 = vld [vmem:[#allocation30_spill] sm:$0xff] }
 0x5e5   :  { %6023 = vmatprep.subr.bf16.mxu1 %v10217_v16  ;;  %v10227_v16 = vld [vmem:[#allocation32_spill] sm:$0xff] }
 0x5e7   :  { %5993 = vmatpush3.bf16.msra.mxu0 %v10218_v22  ;;  %v10228_v22 = vld [vmem:[#allocation52_spill] sm:$0xff] }
 0x5e8   :  { %6059 = vmatprep.subr.bf16.mxu0 %v10219_v60  ;;  %6025 = vmatpush1.bf16.msra.mxu1 %v10220_v9  ;;  %v10229_v60 = vld [vmem:[#allocation53_spill] sm:$0xff]  ;;  %v10230_v9 = vld [vmem:[#allocation34_spill] sm:$0xff] }
 0x5e9   :  { %6027 = vmatprep.subr.bf16.mxu1 %v10221_v5  ;;  %v10231_v5 = vld [vmem:[#allocation35_spill] sm:$0xff] }
 0x5ea   :  { %2434 = vmatmul.mubr.f32.vlgmr.msra.gmra.mrb[24].mxu0 %v8570_v57 }
 0x5eb   :  { %6061 = vmatpush1.bf16.msra.mxu0 %v10222_v38  ;;  %v10233_v38 = vld [vmem:[#allocation57_spill] sm:$0xff] }
 0x5ec   :  { %6063 = vmatprep.subr.bf16.mxu0 %v10223_v42  ;;  %6029 = vmatpush1.bf16.msra.mxu1 %v10224_v11  ;;  %v10234_v42 = vld [vmem:[#allocation38_spill] sm:$0xff]  ;;  %v10235_v11 = vld [vmem:[#allocation39_spill] sm:$0xff] }
 0x5ed   :  { %6031 = vmatprep.subr.bf16.mxu1 %v10225_v62  ;;  %v10236_v62 = vld [vmem:[#allocation60_spill] sm:$0xff] }
 0x5ef   :  { %6065 = vmatpush1.bf16.msra.mxu0 %v10226_v24  ;;  %v10237_v24 = vld [vmem:[#allocation61_spill] sm:$0xff] }
 0x5f0   :  { %6067 = vmatprep.subr.bf16.mxu0 %v10227_v16  ;;  %6033 = vmatpush1.bf16.msra.mxu1 %v10228_v22  ;;  %v10238_v16 = vld [vmem:[#allocation42_spill] sm:$0xff]  ;;  %v10239_v22 = vld [vmem:[#allocation43_spill] sm:$0xff] }
 0x5f1   :  { %6035 = vmatprep.subr.bf16.mxu1 %v10229_v60  ;;  %v10240_v60 = vld [vmem:[#allocation64_spill] sm:$0xff] }
 0x5f3   :  { %6069 = vmatpush1.bf16.msra.mxu0 %v10230_v9  ;;  %v10241_v9 = vld [vmem:[#allocation65_spill] sm:$0xff] }
 0x5f4   :  { %6071 = vmatprep.subr.bf16.mxu0 %v10231_v5  ;;  %6037 = vmatpush1.bf16.msra.mxu1 %v10232_v18  ;;  %v10242_v5 = vld [vmem:[#allocation46_spill] sm:$0xff]  ;;  %v10243_v18 = vld [vmem:[#allocation47_spill] sm:$0xff] }
 0x5f5   :  { %6039 = vmatprep.subr.bf16.mxu1 %v10233_v38  ;;  %v10244_v38 = vld [vmem:[#allocation68_spill] sm:$0xff] }
 0x5f7   :  { %6073 = vmatpush1.bf16.msra.mxu0 %v10234_v42  ;;  %v10245_v42 = vld [vmem:[#allocation69_spill] sm:$0xff] }
 0x5f8   :  { %6075 = vmatprep.subr.bf16.mxu0 %v10235_v11  ;;  %6041 = vmatpush1.bf16.msra.mxu1 %v10236_v62  ;;  %v10246_v11 = vld [vmem:[#allocation50_spill] sm:$0xff]  ;;  %v10247_v62 = vld [vmem:[#allocation51_spill] sm:$0xff] }
 0x5f9   :  { %6043 = vmatprep.subr.bf16.mxu1 %v10237_v24  ;;  %v10248_v24 = vld [vmem:[#allocation72_spill] sm:$0xff] }
 0x5fb   :  { %6077 = vmatpush1.bf16.msra.mxu0 %v10238_v16  ;;  %v10249_v16 = vld [vmem:[#allocation73_spill] sm:$0xff] }
 0x5fc   :  { %6079 = vmatprep.subr.bf16.mxu0 %v10239_v22  ;;  %6045 = vmatpush1.bf16.msra.mxu1 %v10240_v60  ;;  %v10250_v22 = vld [vmem:[#allocation54_spill] sm:$0xff]  ;;  %v10251_v60 = vld [vmem:[#allocation55_spill] sm:$0xff] }
 0x5fd   :  { %6047 = vmatprep.subr.bf16.mxu1 %v10241_v9  ;;  %v10252_v9 = vld [vmem:[#allocation76_spill] sm:$0xff] }
 0x5ff   :  { %6081 = vmatpush1.bf16.msra.mxu0 %v10242_v5  ;;  %v10253_v5 = vld [vmem:[#allocation78_spill] sm:$0xff] }
 0x600   :  { %6083 = vmatprep.subr.bf16.mxu0 %v10243_v18  ;;  %6049 = vmatpush1.bf16.msra.mxu1 %v10244_v38  ;;  %v10254_v18 = vld [vmem:[#allocation58_spill] sm:$0xff]  ;;  %v10255_v38 = vld [vmem:[#allocation59_spill] sm:$0xff] }
 0x601   :  { %6051 = vmatprep.subr.bf16.mxu1 %v10245_v42  ;;  %v10256_v42 = vld [vmem:[#allocation62_spill] sm:$0xff] }
 0x603   :  { %6085 = vmatpush1.bf16.msra.mxu0 %v10246_v11  ;;  %v10257_v11 = vld [vmem:[#allocation63_spill] sm:$0xff] }
 0x604   :  { %6087 = vmatprep.subr.bf16.mxu0 %v10247_v62  ;;  %6053 = vmatpush1.bf16.msra.mxu1 %v10248_v24  ;;  %v10258_v62 = vld [vmem:[#allocation66_spill] sm:$0xff]  ;;  %v10259_v24 = vld [vmem:[#allocation67_spill] sm:$0xff] }
 0x605   :  { %6055 = vmatprep.subr.bf16.mxu1 %v10249_v16  ;;  %v10260_v16 = vld [vmem:[#allocation70_spill] sm:$0xff] }
 0x607   :  { %6089 = vmatpush1.bf16.msra.mxu0 %v10250_v22  ;;  %v10261_v22 = vld [vmem:[#allocation71_spill] sm:$0xff] }
 0x608   :  { %6091 = vmatprep.subr.bf16.mxu0 %v10251_v60  ;;  %6057 = vmatpush1.bf16.msra.mxu1 %v10252_v9  ;;  %v10262_v60 = vld [vmem:[#allocation74_spill] sm:$0xff]  ;;  %v10263_v9 = vld [vmem:[#allocation75_spill] sm:$0xff] }
 0x609   :  { %6123 = vmatprep.subr.bf16.mxu1 %v10253_v5  ;;  %v10264_v5 = vld [vmem:[#allocation77_spill] sm:$0xff] }
 0x60b   :  { %6093 = vmatpush1.bf16.msra.mxu0 %v10254_v18  ;;  %v10265_v18 = vld [vmem:[#allocation79_spill] sm:$0xff] }
 0x60c   :  { %6095 = vmatprep.subr.bf16.mxu0 %v10255_v38  ;;  %v10266_v38 = vld [vmem:[#allocation81_spill] sm:$0xff] }
 0x60f   :  { %6097 = vmatpush1.bf16.msra.mxu0 %v10256_v42  ;;  %v10267_v42 = vld [vmem:[#allocation83_spill] sm:$0xff] }
 0x610   :  { %6099 = vmatprep.subr.bf16.mxu0 %v10257_v11  ;;  %v10268_v11 = vld [vmem:[#allocation85_spill] sm:$0xff] }
 0x613   :  { %6101 = vmatpush1.bf16.msra.mxu0 %v10258_v62  ;;  %v10269_v62 = vld [vmem:[#allocation87_spill] sm:$0xff] }
 0x614   :  { %6103 = vmatprep.subr.bf16.mxu0 %v10259_v24  ;;  %v2443_v24 = vld [vmem:[#allocation4 + $0x60] sm:$0xff] }
 0x617   :  { %6105 = vmatpush1.bf16.msra.mxu0 %v10260_v16 }
 0x618   :  { %6107 = vmatprep.subr.bf16.mxu0 %v10261_v22 }
 0x61b   :  { %6109 = vmatpush1.bf16.msra.mxu0 %v10262_v60  ;;  %v2444_v60 = vld [vmem:[#allocation4 + $0x68] sm:$0xff] }
 0x61c   :  { %6111 = vmatprep.subr.bf16.mxu0 %v10263_v9 }
 0x61f   :  { %6113 = vmatpush1.bf16.msra.mxu0 %v10264_v5 }
 0x620   :  { %6115 = vmatprep.subr.bf16.mxu0 %v10265_v18 }
 0x623   :  { %6117 = vmatpush1.bf16.msra.mxu0 %v10266_v38 }
 0x624   :  { %6119 = vmatprep.subr.bf16.mxu0 %v10267_v42 }
 0x627   :  { %6121 = vmatpush1.bf16.msra.mxu0 %v10268_v11  ;;  %v10270_v11 = vld [vmem:[#allocation82_spill] sm:$0xff] }
 0x628   :  { %6187 = vmatprep.subr.bf16.mxu0 %v10269_v62 }
 0x65d   :  { %v2151_v16 = vpop.f32.mrb[20].mxu0  ;;  %v2222_v12 = vpop.f32.mrb[20].mxu1 }
 0x65e   :  { %v2446_v22 = vadd.f32 %v2443_v24, %v2151_v16  ;;  %v2153_v32 = vpop.f32.mrb[21].mxu0  ;;  %v2224_v55 = vpop.f32.mrb[21].mxu1  ;;  %v2460_v54 = vadd.f32 %v10270_v11, %v2222_v12 }
 0x65f   :  { %v2447_v34 = vadd.f32 %v2444_v60, %v2153_v32 }
 0x660   :  { %v4219_v9 = vmul.f32 -1.442695, %v2446_v22 }
 0x661   :  { %v4220_v5 = vmul.f32 -1.442695, %v2447_v34 }
 0x662   :  { %7227 = vpow2.f32 %v4219_v9 }
 0x663   :  { %7229 = vpow2.f32 %v4220_v5 }
 0x66c   :  { %v7228_v18 = vpop.eup %7227 }
 0x66d   :  { %v2454_v38 = vadd.f32 1.0, %v7228_v18  ;;  %v7230_v42 = vpop.eup %7229 }
 0x66e   :  { %v2455_v0 = vadd.f32 1.0, %v7230_v42 }
 0x66f   :  { %7231 = vrcp.f32 %v2454_v38  ;;  %v2439_v38 = vadd.f32 %v2224_v55, %v10057_v52 }
 0x670   :  { %7233 = vrcp.f32 %v2455_v0 }
 0x679   :  { %v7232_v62 = vpop.eup %7231 }
 0x67a   :  { %v2461_v26 = vmul.f32 %v7232_v62, %v2460_v54  ;;  %v7234_v16 = vpop.eup %7233 }
 0x67b   :  { %v2464_v7 = vsub.f32 1.0, %v7234_v16  ;;  %v2466_v34 = vmul.f32 %v7234_v16, %v8570_v57 }
 0x67c   :  { %v2462_v24 = vadd.f32 %v2461_v26, %v2445_v46 }
 0x67e   :  { %7235 = vtanh.f32 %v2462_v24 }
 0x688   :  { %v7236_v22 = vpop.eup %7235 }
 0x689   :  { %v2465_v32 = vmul.f32 %v7236_v22, %v2464_v7 }
 0x68b   :  { %v8735_v60 = vadd.f32 %v2466_v34, %v2465_v32  ;;  %v8739_v32 = vld [vmem:[#allocation12] ss:$0 sm:$0xff] }
 0x69d   :  { %v2293_v5 = vpop.f32.mrb[22].mxu0  ;;  %v2364_v18 = vpop.f32.mrb[22].mxu1 }
 0x69e   :  { %v2440_v12 = vadd.f32 %v2293_v5, %v10058_v47  ;;  %v2468_v9 = vadd.f32 %v2439_v38, %v2364_v18  ;;  %v2295_v42 = vpop.f32.mrb[23].mxu0  ;;  %v2366_v62 = vpop.f32.mrb[23].mxu1 }
 0x69f   :  { %v2441_v5 = vadd.f32 %v2295_v42, %v8241_v50  ;;  %v10272_v42 = vld [vmem:[#allocation120_spill] sm:$0xff] }
 0x6a0   :  { %v2469_v0 = vadd.f32 %v2440_v12, %v2366_v62  ;;  %v4221_v54 = vmul.f32 -1.442695, %v2468_v9 }
 0x6a2   :  { %7237 = vpow2.f32 %v4221_v54  ;;  %v4222_v26 = vmul.f32 -1.442695, %v2469_v0 }
 0x6a4   :  { %7239 = vpow2.f32 %v4222_v26 }
 0x6ac   :  { %v7238_v46 = vpop.eup %7237 }
 0x6ad   :  { %v2476_v7 = vadd.f32 1.0, %v7238_v46 }
 0x6ae   :  { %v7240_v57 = vpop.eup %7239 }
 0x6af   :  { %7241 = vrcp.f32 %v2476_v7  ;;  %v2477_v22 = vadd.f32 1.0, %v7240_v57  ;;  %v10273_v7 = vld [vmem:[#allocation130_spill] sm:$0xff]  ;;  %v10274_v57 = vld [vmem:[#allocation121_spill] sm:$0xff] }
 0x6b1   :  { %7243 = vrcp.f32 %v2477_v22  ;;  %v10277_v22 = vld [vmem:[#allocation134_spill] sm:$0xff] }
 0x6b9   :  { %v7242_v38 = vpop.eup %7241 }
 0x6bb   :  { %v7244_v9 = vpop.eup %7243 }
 0x6bc   :  { %v2486_v62 = vsub.f32 1.0, %v7244_v9  ;;  %v2488_v54 = vmul.f32 %v7244_v9, %v8577_v39  ;;  %v10271_v39 = vld [vmem:[#allocation127_spill] sm:$0xff]  ;;  %v10284_v9 = vld [vmem:[#allocation132_spill] sm:$0xff] }
 0x6bd   :  { %v4411_v24 = vpop.f32.mrb[24].mxu0 }
 0x6be   :  { %v4412_v16 = vpop.f32.mrb[25].mxu0 }
 0x6bf   :  { %v4413_v55 = vadd.f32 %v4412_v16, %v4411_v24  ;;  %v10275_v24 = vld [vmem:[#allocation131_spill] sm:$0xff]  ;;  %v10276_v16 = vld [vmem:[#allocation124_spill] sm:$0xff] }
 0x6c1   :  { %v2482_v34 = vadd.f32 %v8739_v32, %v4413_v55  ;;  %v10278_v55 = vld [vmem:[#allocation125_spill] sm:$0xff] }
 0x6c3   :  { %v2483_v18 = vmul.f32 %v7242_v38, %v2482_v34  ;;  %v10279_v34 = vld [vmem:[#allocation135_spill] sm:$0xff]  ;;  %v10280_v38 = vld [vmem:[#allocation128_spill] sm:$0xff] }
 0x6c5   :  { %v2484_v12 = vadd.f32 %v2483_v18, %v2441_v5  ;;  %v10281_v5 = vld [vmem:[#allocation138_spill] sm:$0xff]  ;;  %v10282_v18 = vld [vmem:[#allocation129_spill] sm:$0xff] }
 0x6c7   :  { %7245 = vtanh.f32 %v2484_v12  ;;  %v10283_v12 = vld [vmem:[#allocation139_spill] sm:$0xff] }
 0x6d1   :  { %v7246_v0 = vpop.eup %7245 }
 0x6d2   :  { %v2487_v26 = vmul.f32 %v7246_v0, %v2486_v62  ;;  %v10285_v62 = vld [vmem:[#allocation142_spill] sm:$0xff]  ;;  %v10286_v0 = vld [vmem:[#allocation133_spill] sm:$0xff] }
 0x6d4   :  { %v8744_v46 = vadd.f32 %v2488_v54, %v2487_v26  ;;  %v10287_v54 = vld [vmem:[#allocation143_spill] sm:$0xff]  ;;  %v10288_v26 = vld [vmem:[#allocation136_spill] sm:$0xff] }
 0x6d6   :  { %2568 = vmatprep.mubr.f32.mxu1 %v8744_v46  ;;  %2639 = vmatprep.mubr.f32.mxu0 %v8744_v46 }
 0x6d7   :  { %2569 = vmatmul.mubr.f32.vlgmr.msra.gmra.mrb[24].mxu1 %v8735_v60  ;;  %2640 = vmatmul.mubr.f32.vlgmr.msra.gmra.mrb[26].mxu0 %v8735_v60 }
 0x6d8   :  { %6125 = vmatpush1.bf16.msra.mxu1 %v9854_v41  ;;  %6189 = vmatpush1.bf16.msra.mxu0 %v9855_v44 }
 0x6d9   :  { %2710 = vmatprep.mubr.f32.mxu1 %v8744_v46  ;;  %2781 = vmatprep.mubr.f32.mxu0 %v8744_v46 }
 0x6da   :  { %6127 = vmatprep.subr.bf16.mxu1 %v9856_v59  ;;  %6191 = vmatprep.subr.bf16.mxu0 %v9954_v6 }
 0x6dc   :  { %6129 = vmatpush1.bf16.msra.mxu1 %v9955_v25  ;;  %6193 = vmatpush1.bf16.msra.mxu0 %v9956_v35 }
 0x6dd   :  { %6131 = vmatprep.subr.bf16.mxu1 %v9957_v33  ;;  %6195 = vmatprep.subr.bf16.mxu0 %v9958_v37 }
 0x6e0   :  { %6133 = vmatpush1.bf16.msra.mxu1 %v9959_v31  ;;  %6197 = vmatpush1.bf16.msra.mxu0 %v9960_v10 }
 0x6e1   :  { %6135 = vmatprep.subr.bf16.mxu1 %v10059_v63  ;;  %6199 = vmatprep.subr.bf16.mxu0 %v10060_v3 }
 0x6e4   :  { %6137 = vmatpush1.bf16.msra.mxu1 %v10061_v56  ;;  %6201 = vmatpush1.bf16.msra.mxu0 %v10062_v30 }
 0x6e5   :  { %6139 = vmatprep.subr.bf16.mxu1 %v10063_v58  ;;  %6203 = vmatprep.subr.bf16.mxu0 %v10064_v36 }
 0x6e8   :  { %6141 = vmatpush1.bf16.msra.mxu1 %v10065_v19  ;;  %6205 = vmatpush1.bf16.msra.mxu0 %v10066_v14 }
 0x6e9   :  { %6143 = vmatprep.subr.bf16.mxu1 %v10165_v17  ;;  %6207 = vmatprep.subr.bf16.mxu0 %v10166_v29 }
 0x6ec   :  { %6145 = vmatpush1.bf16.msra.mxu1 %v10167_v15  ;;  %6209 = vmatpush1.bf16.msra.mxu0 %v10070_v61 }
 0x6ed   :  { %6147 = vmatprep.subr.bf16.mxu1 %v10168_v49  ;;  %6211 = vmatprep.subr.bf16.mxu0 %v10072_v1 }
 0x6f0   :  { %6149 = vmatpush1.bf16.msra.mxu1 %v10169_v13  ;;  %6213 = vmatpush1.bf16.msra.mxu0 %v10074_v27 }
 0x6f1   :  { %6151 = vmatprep.subr.bf16.mxu1 %v10075_v2  ;;  %6215 = vmatprep.subr.bf16.mxu0 %v10076_v20 }
 0x6f4   :  { %6153 = vmatpush1.bf16.msra.mxu1 %v10077_v4  ;;  %6217 = vmatpush1.bf16.msra.mxu0 %v10078_v40 }
 0x6f5   :  { %6155 = vmatprep.subr.bf16.mxu1 %v10079_v8  ;;  %6219 = vmatprep.subr.bf16.mxu0 %v10080_v23 }
 0x6f8   :  { %6157 = vmatpush1.bf16.msra.mxu1 %v9983_v28  ;;  %6221 = vmatpush1.bf16.msra.mxu0 %v10081_v21 }
 0x6f9   :  { %6159 = vmatprep.subr.bf16.mxu1 %v9985_v53  ;;  %6223 = vmatprep.subr.bf16.mxu0 %v10170_v48 }
 0x6fc   :  { %6161 = vmatpush1.bf16.msra.mxu1 %v9987_v45  ;;  %6225 = vmatpush1.bf16.msra.mxu0 %v9988_v43 }
 0x6fd   :  { %6163 = vmatprep.subr.bf16.mxu1 %v9989_v51  ;;  %6227 = vmatprep.subr.bf16.mxu0 %v10271_v39 }
 0x700   :  { %6165 = vmatpush1.bf16.msra.mxu1 %v10272_v42  ;;  %6229 = vmatpush1.bf16.msra.mxu0 %v10273_v7  ;;  %v2864_v42 = vld [vmem:[#allocation4 + $0x88] sm:$0xff] }
 0x701   :  { %6167 = vmatprep.subr.bf16.mxu1 %v10274_v57  ;;  %6231 = vmatprep.subr.bf16.mxu0 %v10275_v24 }
 0x704   :  { %6169 = vmatpush1.bf16.msra.mxu1 %v10276_v16  ;;  %6233 = vmatpush1.bf16.msra.mxu0 %v10277_v22 }
 0x705   :  { %6171 = vmatprep.subr.bf16.mxu1 %v10278_v55  ;;  %6235 = vmatprep.subr.bf16.mxu0 %v10279_v34  ;;  %v10289_v55 = vld [vmem:[#allocation146_spill] sm:$0xff]  ;;  %v10290_v34 = vld [vmem:[#allocation137_spill] sm:$0xff] }
 0x708   :  { %6173 = vmatpush1.bf16.msra.mxu1 %v10280_v38  ;;  %6237 = vmatpush1.bf16.msra.mxu0 %v10281_v5  ;;  %v10291_v38 = vld [vmem:[#allocation147_spill] sm:$0xff]  ;;  %v10292_v5 = vld [vmem:[#allocation140_spill] sm:$0xff] }
 0x709   :  { %6175 = vmatprep.subr.bf16.mxu1 %v10282_v18  ;;  %6239 = vmatprep.subr.bf16.mxu0 %v10283_v12  ;;  %v10293_v18 = vld [vmem:[#allocation150_spill] sm:$0xff]  ;;  %v10294_v12 = vld [vmem:[#allocation141_spill] sm:$0xff] }
 0x70c   :  { %6177 = vmatpush1.bf16.msra.mxu1 %v10284_v9  ;;  %6241 = vmatpush1.bf16.msra.mxu0 %v10285_v62  ;;  %v10295_v9 = vld [vmem:[#allocation18_spill] sm:$0xff]  ;;  %v10307_v62 = vld [vmem:[#allocation24_spill] sm:$0xff] }
 0x70d   :  { %6179 = vmatprep.subr.bf16.mxu1 %v10286_v0  ;;  %6243 = vmatprep.subr.bf16.mxu0 %v10287_v54  ;;  %v10296_v54 = vld [vmem:[#allocation144_spill] sm:$0xff] }
 0x70e   :  { %v10305_v0 = vld [vmem:[#allocation152_spill] sm:$0xff] }
 0x710   :  { %6181 = vmatpush1.bf16.msra.mxu1 %v10288_v26  ;;  %6245 = vmatpush1.bf16.msra.mxu0 %v10289_v55  ;;  %v10297_v55 = vld [vmem:[#allocation145_spill] sm:$0xff]  ;;  %v10304_v26 = vld [vmem:[#allocation151_spill] sm:$0xff] }
 0x711   :  { %6183 = vmatprep.subr.bf16.mxu1 %v10290_v34  ;;  %6247 = vmatprep.subr.bf16.mxu0 %v10291_v38  ;;  %v10298_v34 = vld [vmem:[#allocation19_spill] sm:$0xff]  ;;  %v10299_v38 = vld [vmem:[#allocation20_spill] sm:$0xff] }
 0x714   :  { %6185 = vmatpush1.bf16.msra.mxu1 %v10292_v5  ;;  %6249 = vmatpush1.bf16.msra.mxu0 %v10293_v18  ;;  %v10300_v5 = vld [vmem:[#allocation148_spill] sm:$0xff]  ;;  %v10301_v18 = vld [vmem:[#allocation149_spill] sm:$0xff] }
 0x715   :  { %6251 = vmatprep.subr.bf16.mxu1 %v10294_v12  ;;  %6283 = vmatprep.subr.bf16.mxu0 %v10295_v9  ;;  %v10302_v12 = vld [vmem:[#allocation21_spill] sm:$0xff]  ;;  %v10303_v9 = vld [vmem:[#allocation22_spill] sm:$0xff] }
 0x717   :  { %2711 = vmatmul.mubr.f32.vlgmr.msra.gmra.mrb[26].mxu1 %v8735_v60  ;;  %2782 = vmatmul.mubr.f32.vlgmr.msra.gmra.mrb[28].mxu0 %v8735_v60 }
 0x718   :  { %6253 = vmatpush3.bf16.msra.mxu1 %v10296_v54  ;;  %2852 = vmatprep.mubr.f32.mxu1 %v8744_v46  ;;  %v10306_v54 = vld [vmem:[#allocation23_spill] sm:$0xff] }
 0x719   :  { %6255 = vmatprep.subr.bf16.mxu1 %v10297_v55  ;;  %6285 = vmatpush1.bf16.msra.mxu0 %v10298_v34  ;;  %v10308_v55 = vld [vmem:[#allocation153_spill] sm:$0xff]  ;;  %v10309_v34 = vld [vmem:[#allocation154_spill] sm:$0xff] }
 0x71a   :  { %6287 = vmatprep.subr.bf16.mxu0 %v10299_v38  ;;  %v10310_v38 = vld [vmem:[#allocation27_spill] sm:$0xff] }
 0x71c   :  { %6257 = vmatpush3.bf16.msra.mxu1 %v10300_v5  ;;  %v10311_v5 = vld [vmem:[#allocation28_spill] sm:$0xff] }
 0x71d   :  { %6259 = vmatprep.subr.bf16.mxu1 %v10301_v18  ;;  %6289 = vmatpush1.bf16.msra.mxu0 %v10302_v12  ;;  %v10312_v18 = vld [vmem:[#allocation155_spill] sm:$0xff]  ;;  %v10313_v12 = vld [vmem:[#allocation156_spill] sm:$0xff] }
 0x71e   :  { %6291 = vmatprep.subr.bf16.mxu0 %v10303_v9  ;;  %v10314_v9 = vld [vmem:[#allocation31_spill] sm:$0xff] }
 0x720   :  { %6261 = vmatpush3.bf16.msra.mxu1 %v10304_v26  ;;  %v10315_v26 = vld [vmem:[#allocation33_spill] sm:$0xff] }
 0x721   :  { %6263 = vmatprep.subr.bf16.mxu1 %v10305_v0  ;;  %6293 = vmatpush1.bf16.msra.mxu0 %v10306_v54  ;;  %v10316_v0 = vld [vmem:[#allocation157_spill] sm:$0xff]  ;;  %v10317_v54 = vld [vmem:[#allocation158_spill] sm:$0xff] }
 0x722   :  { %6295 = vmatprep.subr.bf16.mxu0 %v10307_v62  ;;  %v10318_v62 = vld [vmem:[#allocation36_spill] sm:$0xff] }
 0x724   :  { %6265 = vmatpush3.bf16.msra.mxu1 %v10308_v55  ;;  %v10319_v55 = vld [vmem:[#allocation37_spill] sm:$0xff] }
 0x725   :  { %6267 = vmatprep.subr.bf16.mxu1 %v10309_v34  ;;  %6297 = vmatpush1.bf16.msra.mxu0 %v10310_v38  ;;  %v10320_v34 = vld [vmem:[#allocation159_spill] sm:$0xff]  ;;  %v10321_v38 = vld [vmem:[#allocation160_spill] sm:$0xff] }
 0x726   :  { %6299 = vmatprep.subr.bf16.mxu0 %v10311_v5  ;;  %v10322_v5 = vld [vmem:[#allocation40_spill] sm:$0xff] }
 0x728   :  { %6269 = vmatpush3.bf16.msra.mxu1 %v10312_v18  ;;  %v10323_v18 = vld [vmem:[#allocation41_spill] sm:$0xff] }
 0x729   :  { %6271 = vmatprep.subr.bf16.mxu1 %v10313_v12  ;;  %6301 = vmatpush1.bf16.msra.mxu0 %v10314_v9  ;;  %v10324_v12 = vld [vmem:[#allocation161_spill] sm:$0xff] }
 0x72a   :  { %6303 = vmatprep.subr.bf16.mxu0 %v10315_v26  ;;  %v10325_v9 = vld [vmem:[#allocation25_spill] sm:$0xff]  ;;  %v10326_v26 = vld [vmem:[#allocation44_spill] sm:$0xff] }
 0x72c   :  { %6273 = vmatpush3.bf16.msra.mxu1 %v10316_v0  ;;  %v10327_v0 = vld [vmem:[#allocation45_spill] sm:$0xff] }
 0x72d   :  { %6275 = vmatprep.subr.bf16.mxu1 %v10317_v54  ;;  %6305 = vmatpush1.bf16.msra.mxu0 %v10318_v62  ;;  %v10328_v62 = vld [vmem:[#allocation26_spill] sm:$0xff]  ;;  %v10338_v54 = vld [vmem:[#allocation56_spill] sm:$0xff] }
 0x72e   :  { %6307 = vmatprep.subr.bf16.mxu0 %v10319_v55  ;;  %v10329_v55 = vld [vmem:[#allocation29_spill] sm:$0xff] }
 0x730   :  { %6277 = vmatpush3.bf16.msra.mxu1 %v10320_v34  ;;  %v10330_v34 = vld [vmem:[#allocation48_spill] sm:$0xff] }
 0x731   :  { %6279 = vmatprep.subr.bf16.mxu1 %v10321_v38  ;;  %6309 = vmatpush1.bf16.msra.mxu0 %v10322_v5  ;;  %v10331_v38 = vld [vmem:[#allocation49_spill] sm:$0xff]  ;;  %v10332_v5 = vld [vmem:[#allocation30_spill] sm:$0xff] }
 0x732   :  { %6311 = vmatprep.subr.bf16.mxu0 %v10323_v18  ;;  %v10333_v18 = vld [vmem:[#allocation32_spill] sm:$0xff] }
 0x734   :  { %6281 = vmatpush3.bf16.msra.mxu1 %v10324_v12  ;;  %v10334_v12 = vld [vmem:[#allocation52_spill] sm:$0xff] }
 0x735   :  { %6347 = vmatprep.subr.bf16.mxu1 %v10325_v9  ;;  %6313 = vmatpush1.bf16.msra.mxu0 %v10326_v26  ;;  %v10335_v9 = vld [vmem:[#allocation53_spill] sm:$0xff]  ;;  %v10336_v26 = vld [vmem:[#allocation34_spill] sm:$0xff] }
 0x736   :  { %6315 = vmatprep.subr.bf16.mxu0 %v10327_v0  ;;  %v10337_v0 = vld [vmem:[#allocation35_spill] sm:$0xff] }
 0x737   :  { %2853 = vmatmul.mubr.f32.vlgmr.msra.gmra.mrb[28].mxu1 %v8735_v60 }
 0x738   :  { %6349 = vmatpush1.bf16.msra.mxu1 %v10328_v62  ;;  %v10339_v62 = vld [vmem:[#allocation57_spill] sm:$0xff] }
 0x739   :  { %6351 = vmatprep.subr.bf16.mxu1 %v10329_v55  ;;  %6317 = vmatpush1.bf16.msra.mxu0 %v10330_v34  ;;  %v10340_v55 = vld [vmem:[#allocation38_spill] sm:$0xff]  ;;  %v10341_v34 = vld [vmem:[#allocation39_spill] sm:$0xff] }
 0x73a   :  { %6319 = vmatprep.subr.bf16.mxu0 %v10331_v38  ;;  %v10342_v38 = vld [vmem:[#allocation60_spill] sm:$0xff] }
 0x73c   :  { %6353 = vmatpush1.bf16.msra.mxu1 %v10332_v5  ;;  %v10343_v5 = vld [vmem:[#allocation61_spill] sm:$0xff] }
 0x73d   :  { %6355 = vmatprep.subr.bf16.mxu1 %v10333_v18  ;;  %6321 = vmatpush1.bf16.msra.mxu0 %v10334_v12  ;;  %v10344_v18 = vld [vmem:[#allocation42_spill] sm:$0xff]  ;;  %v10345_v12 = vld [vmem:[#allocation43_spill] sm:$0xff] }
 0x73e   :  { %6323 = vmatprep.subr.bf16.mxu0 %v10335_v9  ;;  %v10346_v9 = vld [vmem:[#allocation64_spill] sm:$0xff] }
 0x740   :  { %6357 = vmatpush1.bf16.msra.mxu1 %v10336_v26  ;;  %v10347_v26 = vld [vmem:[#allocation65_spill] sm:$0xff] }
 0x741   :  { %6359 = vmatprep.subr.bf16.mxu1 %v10337_v0  ;;  %6325 = vmatpush1.bf16.msra.mxu0 %v10338_v54  ;;  %v10348_v0 = vld [vmem:[#allocation46_spill] sm:$0xff]  ;;  %v10349_v54 = vld [vmem:[#allocation47_spill] sm:$0xff] }
 0x742   :  { %6327 = vmatprep.subr.bf16.mxu0 %v10339_v62  ;;  %v10350_v62 = vld [vmem:[#allocation68_spill] sm:$0xff] }
 0x744   :  { %6361 = vmatpush1.bf16.msra.mxu1 %v10340_v55  ;;  %v10351_v55 = vld [vmem:[#allocation69_spill] sm:$0xff] }
 0x745   :  { %6363 = vmatprep.subr.bf16.mxu1 %v10341_v34  ;;  %6329 = vmatpush1.bf16.msra.mxu0 %v10342_v38  ;;  %v10352_v34 = vld [vmem:[#allocation50_spill] sm:$0xff]  ;;  %v10353_v38 = vld [vmem:[#allocation51_spill] sm:$0xff] }
 0x746   :  { %6331 = vmatprep.subr.bf16.mxu0 %v10343_v5  ;;  %v10354_v5 = vld [vmem:[#allocation72_spill] sm:$0xff] }
 0x748   :  { %6365 = vmatpush1.bf16.msra.mxu1 %v10344_v18  ;;  %v10355_v18 = vld [vmem:[#allocation73_spill] sm:$0xff] }
 0x749   :  { %6367 = vmatprep.subr.bf16.mxu1 %v10345_v12  ;;  %6333 = vmatpush1.bf16.msra.mxu0 %v10346_v9  ;;  %v10356_v12 = vld [vmem:[#allocation54_spill] sm:$0xff]  ;;  %v10357_v9 = vld [vmem:[#allocation55_spill] sm:$0xff] }
 0x74a   :  { %6335 = vmatprep.subr.bf16.mxu0 %v10347_v26  ;;  %v10358_v26 = vld [vmem:[#allocation76_spill] sm:$0xff] }
 0x74c   :  { %6369 = vmatpush1.bf16.msra.mxu1 %v10348_v0  ;;  %v10359_v0 = vld [vmem:[#allocation78_spill] sm:$0xff] }
 0x74d   :  { %6371 = vmatprep.subr.bf16.mxu1 %v10349_v54  ;;  %6337 = vmatpush1.bf16.msra.mxu0 %v10350_v62  ;;  %v10360_v54 = vld [vmem:[#allocation58_spill] sm:$0xff]  ;;  %v10361_v62 = vld [vmem:[#allocation59_spill] sm:$0xff] }
 0x74e   :  { %6339 = vmatprep.subr.bf16.mxu0 %v10351_v55  ;;  %v10362_v55 = vld [vmem:[#allocation62_spill] sm:$0xff] }
 0x750   :  { %6373 = vmatpush1.bf16.msra.mxu1 %v10352_v34  ;;  %v10363_v34 = vld [vmem:[#allocation63_spill] sm:$0xff] }
 0x751   :  { %6375 = vmatprep.subr.bf16.mxu1 %v10353_v38  ;;  %6341 = vmatpush1.bf16.msra.mxu0 %v10354_v5  ;;  %v10364_v38 = vld [vmem:[#allocation66_spill] sm:$0xff]  ;;  %v10365_v5 = vld [vmem:[#allocation67_spill] sm:$0xff] }
 0x752   :  { %6343 = vmatprep.subr.bf16.mxu0 %v10355_v18  ;;  %v10366_v18 = vld [vmem:[#allocation70_spill] sm:$0xff] }
 0x754   :  { %6377 = vmatpush1.bf16.msra.mxu1 %v10356_v12  ;;  %v10367_v12 = vld [vmem:[#allocation71_spill] sm:$0xff] }
 0x755   :  { %6379 = vmatprep.subr.bf16.mxu1 %v10357_v9  ;;  %6345 = vmatpush1.bf16.msra.mxu0 %v10358_v26  ;;  %v10368_v9 = vld [vmem:[#allocation74_spill] sm:$0xff]  ;;  %v10369_v26 = vld [vmem:[#allocation75_spill] sm:$0xff] }
 0x756   :  { %6411 = vmatprep.subr.bf16.mxu0 %v10359_v0  ;;  %v10370_v0 = vld [vmem:[#allocation77_spill] sm:$0xff] }
 0x758   :  { %6381 = vmatpush1.bf16.msra.mxu1 %v10360_v54  ;;  %v10371_v54 = vld [vmem:[#allocation79_spill] sm:$0xff] }
 0x759   :  { %6383 = vmatprep.subr.bf16.mxu1 %v10361_v62  ;;  %v10372_v62 = vld [vmem:[#allocation81_spill] sm:$0xff] }
 0x75c   :  { %6385 = vmatpush1.bf16.msra.mxu1 %v10362_v55  ;;  %v10373_v55 = vld [vmem:[#allocation83_spill] sm:$0xff] }
 0x75d   :  { %6387 = vmatprep.subr.bf16.mxu1 %v10363_v34  ;;  %v10374_v34 = vld [vmem:[#allocation85_spill] sm:$0xff] }
 0x760   :  { %6389 = vmatpush1.bf16.msra.mxu1 %v10364_v38  ;;  %v10375_v38 = vld [vmem:[#allocation87_spill] sm:$0xff] }
 0x761   :  { %6391 = vmatprep.subr.bf16.mxu1 %v10365_v5  ;;  %v2862_v5 = vld [vmem:[#allocation4 + $0x78] sm:$0xff] }
 0x764   :  { %6393 = vmatpush1.bf16.msra.mxu1 %v10366_v18 }
 0x765   :  { %6395 = vmatprep.subr.bf16.mxu1 %v10367_v12 }
 0x768   :  { %6397 = vmatpush1.bf16.msra.mxu1 %v10368_v9  ;;  %v2863_v9 = vld [vmem:[#allocation4 + $0x80] sm:$0xff] }
 0x769   :  { %6399 = vmatprep.subr.bf16.mxu1 %v10369_v26 }
 0x76c   :  { %6401 = vmatpush1.bf16.msra.mxu1 %v10370_v0 }
 0x76d   :  { %6403 = vmatprep.subr.bf16.mxu1 %v10371_v54 }
 0x770   :  { %6405 = vmatpush1.bf16.msra.mxu1 %v10372_v62 }
 0x771   :  { %6407 = vmatprep.subr.bf16.mxu1 %v10373_v55 }
 0x774   :  { %6409 = vmatpush1.bf16.msra.mxu1 %v10374_v34 }
 0x775   :  { %6475 = vmatprep.subr.bf16.mxu1 %v10375_v38 }
 0x7aa   :  { %v2570_v18 = vpop.f32.mrb[24].mxu1  ;;  %v2641_v22 = vpop.f32.mrb[26].mxu0 }
 0x7ab   :  { %v2865_v12 = vadd.f32 %v2862_v5, %v2570_v18  ;;  %v2572_v16 = vpop.f32.mrb[25].mxu1  ;;  %v2643_v24 = vpop.f32.mrb[27].mxu0  ;;  %v2879_v34 = vadd.f32 %v10270_v11, %v2641_v22 }
 0x7ac   :  { %v2866_v57 = vadd.f32 %v2863_v9, %v2572_v16 }
 0x7ad   :  { %v4223_v26 = vmul.f32 -1.442695, %v2865_v12 }
 0x7ae   :  { %v4224_v0 = vmul.f32 -1.442695, %v2866_v57 }
 0x7af   :  { %7247 = vpow2.f32 %v4223_v26 }
 0x7b0   :  { %7249 = vpow2.f32 %v4224_v0 }
 0x7b9   :  { %v7248_v54 = vpop.eup %7247 }
 0x7ba   :  { %v2873_v62 = vadd.f32 1.0, %v7248_v54  ;;  %v7250_v55 = vpop.eup %7249 }
 0x7bb   :  { %v2874_v7 = vadd.f32 1.0, %v7250_v55 }
 0x7bc   :  { %7251 = vrcp.f32 %v2873_v62  ;;  %v2858_v62 = vadd.f32 %v2643_v24, %v10057_v52 }
 0x7bd   :  { %7253 = vrcp.f32 %v2874_v7 }
 0x7c6   :  { %v7252_v38 = vpop.eup %7251 }
 0x7c7   :  { %v2880_v39 = vmul.f32 %v7252_v38, %v2879_v34  ;;  %v7254_v18 = vpop.eup %7253 }
 0x7c8   :  { %v2883_v51 = vsub.f32 1.0, %v7254_v18  ;;  %v2885_v57 = vmul.f32 %v7254_v18, %v8735_v60 }
 0x7c9   :  { %v2881_v5 = vadd.f32 %v2880_v39, %v2864_v42 }
 0x7cb   :  { %7255 = vtanh.f32 %v2881_v5 }
 0x7d5   :  { %v7256_v12 = vpop.eup %7255 }
 0x7d6   :  { %v2884_v16 = vmul.f32 %v7256_v12, %v2883_v51 }
 0x7d8   :  { %v8902_v9 = vadd.f32 %v2885_v57, %v2884_v16 }
 0x7ea   :  { %v2712_v0 = vpop.f32.mrb[26].mxu1  ;;  %v2783_v55 = vpop.f32.mrb[28].mxu0 }
 0x7eb   :  { %v2859_v11 = vadd.f32 %v2712_v0, %v10058_v47  ;;  %v2887_v22 = vadd.f32 %v2858_v62, %v2783_v55  ;;  %v2714_v54 = vpop.f32.mrb[27].mxu1  ;;  %v2785_v34 = vpop.f32.mrb[29].mxu0 }
 0x7ec   :  { %v2860_v57 = vadd.f32 %v2714_v54, %v8241_v50  ;;  %v10377_v54 = vld [vmem:[#allocation127_spill] sm:$0xff] }
 0x7ed   :  { %v2888_v7 = vadd.f32 %v2859_v11, %v2785_v34  ;;  %v4225_v39 = vmul.f32 -1.442695, %v2887_v22 }
 0x7ef   :  { %7257 = vpow2.f32 %v4225_v39  ;;  %v4226_v42 = vmul.f32 -1.442695, %v2888_v7 }
 0x7f1   :  { %7259 = vpow2.f32 %v4226_v42  ;;  %v10378_v42 = vld [vmem:[#allocation120_spill] sm:$0xff] }
 0x7f9   :  { %v7258_v38 = vpop.eup %7257 }
 0x7fa   :  { %v2895_v51 = vadd.f32 1.0, %v7258_v38  ;;  %v10379_v38 = vld [vmem:[#allocation130_spill] sm:$0xff] }
 0x7fb   :  { %v7260_v60 = vpop.eup %7259 }
 0x7fc   :  { %7261 = vrcp.f32 %v2895_v51  ;;  %v2896_v18 = vadd.f32 1.0, %v7260_v60  ;;  %v10380_v51 = vld [vmem:[#allocation121_spill] sm:$0xff]  ;;  %v10381_v60 = vld [vmem:[#allocation131_spill] sm:$0xff] }
 0x7fe   :  { %7263 = vrcp.f32 %v2896_v18  ;;  %v10384_v18 = vld [vmem:[#allocation125_spill] sm:$0xff] }
 0x806   :  { %v7262_v16 = vpop.eup %7261 }
 0x808   :  { %v7264_v55 = vpop.eup %7263 }
 0x809   :  { %v2905_v11 = vsub.f32 1.0, %v7264_v55  ;;  %v2907_v34 = vmul.f32 %v7264_v55, %v8744_v46  ;;  %v10376_v46 = vld [vmem:[#allocation117_spill] sm:$0xff]  ;;  %v10391_v55 = vld [vmem:[#allocation142_spill] sm:$0xff] }
 0x80a   :  { %v4446_v26 = vpop.f32.mrb[28].mxu1 }
 0x80b   :  { %v4447_v5 = vpop.f32.mrb[29].mxu1 }
 0x80c   :  { %v4448_v24 = vadd.f32 %v4447_v5, %v4446_v26  ;;  %v10382_v26 = vld [vmem:[#allocation124_spill] sm:$0xff]  ;;  %v10383_v5 = vld [vmem:[#allocation134_spill] sm:$0xff] }
 0x80e   :  { %v2901_v12 = vadd.f32 %v8739_v32, %v4448_v24  ;;  %v10385_v24 = vld [vmem:[#allocation135_spill] sm:$0xff] }
 0x810   :  { %v2902_v62 = vmul.f32 %v7262_v16, %v2901_v12  ;;  %v10386_v12 = vld [vmem:[#allocation128_spill] sm:$0xff]  ;;  %v10387_v16 = vld [vmem:[#allocation138_spill] sm:$0xff] }
 0x812   :  { %v2903_v0 = vadd.f32 %v2902_v62, %v2860_v57  ;;  %v10388_v57 = vld [vmem:[#allocation129_spill] sm:$0xff]  ;;  %v10389_v62 = vld [vmem:[#allocation139_spill] sm:$0xff] }
 0x814   :  { %7265 = vtanh.f32 %v2903_v0  ;;  %v10390_v0 = vld [vmem:[#allocation132_spill] sm:$0xff] }
 0x81e   :  { %v7266_v22 = vpop.eup %7265 }
 0x81f   :  { %v2906_v7 = vmul.f32 %v7266_v22, %v2905_v11  ;;  %v10392_v11 = vld [vmem:[#allocation133_spill] sm:$0xff]  ;;  %v10393_v22 = vld [vmem:[#allocation143_spill] sm:$0xff] }
 0x821   :  { %v8909_v39 = vadd.f32 %v2907_v34, %v2906_v7  ;;  %v10394_v34 = vld [vmem:[#allocation136_spill] sm:$0xff]  ;;  %v10395_v7 = vld [vmem:[#allocation146_spill] sm:$0xff] }
 0x823   :  { %2987 = vmatprep.mubr.f32.mxu0 %v8909_v39  ;;  %3058 = vmatprep.mubr.f32.mxu1 %v8909_v39 }
 0x824   :  { %2988 = vmatmul.mubr.f32.vlgmr.msra.gmra.mrb[30].mxu0 %v8902_v9  ;;  %3059 = vmatmul.mubr.f32.vlgmr.msra.gmra.mrb[30].mxu1 %v8902_v9 }
 0x825   :  { %6413 = vmatpush1.bf16.msra.mxu0 %v9854_v41  ;;  %6477 = vmatpush1.bf16.msra.mxu1 %v9855_v44 }
 0x826   :  { %3129 = vmatprep.mubr.f32.mxu0 %v8909_v39  ;;  %3200 = vmatprep.mubr.f32.mxu1 %v8909_v39 }
 0x827   :  { %6415 = vmatprep.subr.bf16.mxu0 %v9856_v59  ;;  %6479 = vmatprep.subr.bf16.mxu1 %v9954_v6 }
 0x829   :  { %6417 = vmatpush1.bf16.msra.mxu0 %v9955_v25  ;;  %6481 = vmatpush1.bf16.msra.mxu1 %v9956_v35 }
 0x82a   :  { %6419 = vmatprep.subr.bf16.mxu0 %v9957_v33  ;;  %6483 = vmatprep.subr.bf16.mxu1 %v9958_v37 }
 0x82d   :  { %6421 = vmatpush1.bf16.msra.mxu0 %v9959_v31  ;;  %6485 = vmatpush1.bf16.msra.mxu1 %v9960_v10 }
 0x82e   :  { %6423 = vmatprep.subr.bf16.mxu0 %v10059_v63  ;;  %6487 = vmatprep.subr.bf16.mxu1 %v10060_v3 }
 0x831   :  { %6425 = vmatpush1.bf16.msra.mxu0 %v10061_v56  ;;  %6489 = vmatpush1.bf16.msra.mxu1 %v10062_v30 }
 0x832   :  { %6427 = vmatprep.subr.bf16.mxu0 %v10063_v58  ;;  %6491 = vmatprep.subr.bf16.mxu1 %v10064_v36 }
 0x835   :  { %6429 = vmatpush1.bf16.msra.mxu0 %v10065_v19  ;;  %6493 = vmatpush1.bf16.msra.mxu1 %v10066_v14 }
 0x836   :  { %6431 = vmatprep.subr.bf16.mxu0 %v10165_v17  ;;  %6495 = vmatprep.subr.bf16.mxu1 %v10166_v29 }
 0x839   :  { %6433 = vmatpush1.bf16.msra.mxu0 %v10167_v15  ;;  %6497 = vmatpush1.bf16.msra.mxu1 %v10070_v61 }
 0x83a   :  { %6435 = vmatprep.subr.bf16.mxu0 %v10168_v49  ;;  %6499 = vmatprep.subr.bf16.mxu1 %v10072_v1 }
 0x83d   :  { %6437 = vmatpush1.bf16.msra.mxu0 %v10169_v13  ;;  %6501 = vmatpush1.bf16.msra.mxu1 %v10074_v27 }
 0x83e   :  { %6439 = vmatprep.subr.bf16.mxu0 %v10075_v2  ;;  %6503 = vmatprep.subr.bf16.mxu1 %v10076_v20 }
 0x841   :  { %6441 = vmatpush1.bf16.msra.mxu0 %v10077_v4  ;;  %6505 = vmatpush1.bf16.msra.mxu1 %v10078_v40 }
 0x842   :  { %6443 = vmatprep.subr.bf16.mxu0 %v10079_v8  ;;  %6507 = vmatprep.subr.bf16.mxu1 %v10080_v23 }
 0x845   :  { %6445 = vmatpush1.bf16.msra.mxu0 %v9983_v28  ;;  %6509 = vmatpush1.bf16.msra.mxu1 %v10081_v21 }
 0x846   :  { %6447 = vmatprep.subr.bf16.mxu0 %v9985_v53  ;;  %6511 = vmatprep.subr.bf16.mxu1 %v10170_v48 }
 0x849   :  { %6449 = vmatpush1.bf16.msra.mxu0 %v9987_v45  ;;  %6513 = vmatpush1.bf16.msra.mxu1 %v9988_v43 }
 0x84a   :  { %6451 = vmatprep.subr.bf16.mxu0 %v10376_v46  ;;  %6515 = vmatprep.subr.bf16.mxu1 %v10377_v54 }
 0x84d   :  { %6453 = vmatpush1.bf16.msra.mxu0 %v10378_v42  ;;  %6517 = vmatpush1.bf16.msra.mxu1 %v10379_v38  ;;  %v3283_v42 = vld [vmem:[#allocation4 + $0xa0] sm:$0xff] }
 0x84e   :  { %6455 = vmatprep.subr.bf16.mxu0 %v10380_v51  ;;  %6519 = vmatprep.subr.bf16.mxu1 %v10381_v60 }
 0x851   :  { %6457 = vmatpush1.bf16.msra.mxu0 %v10382_v26  ;;  %6521 = vmatpush1.bf16.msra.mxu1 %v10383_v5 }
 0x852   :  { %6459 = vmatprep.subr.bf16.mxu0 %v10384_v18  ;;  %6523 = vmatprep.subr.bf16.mxu1 %v10385_v24  ;;  %v10396_v24 = vld [vmem:[#allocation137_spill] sm:$0xff] }
 0x855   :  { %6461 = vmatpush1.bf16.msra.mxu0 %v10386_v12  ;;  %6525 = vmatpush1.bf16.msra.mxu1 %v10387_v16  ;;  %v10397_v12 = vld [vmem:[#allocation147_spill] sm:$0xff]  ;;  %v10398_v16 = vld [vmem:[#allocation140_spill] sm:$0xff] }
 0x856   :  { %6463 = vmatprep.subr.bf16.mxu0 %v10388_v57  ;;  %6527 = vmatprep.subr.bf16.mxu1 %v10389_v62  ;;  %v10399_v57 = vld [vmem:[#allocation150_spill] sm:$0xff]  ;;  %v10400_v62 = vld [vmem:[#allocation141_spill] sm:$0xff] }
 0x859   :  { %6465 = vmatpush1.bf16.msra.mxu0 %v10390_v0  ;;  %6529 = vmatpush1.bf16.msra.mxu1 %v10391_v55  ;;  %v10401_v0 = vld [vmem:[#allocation18_spill] sm:$0xff]  ;;  %v10413_v55 = vld [vmem:[#allocation24_spill] sm:$0xff] }
 0x85a   :  { %6467 = vmatprep.subr.bf16.mxu0 %v10392_v11  ;;  %6531 = vmatprep.subr.bf16.mxu1 %v10393_v22  ;;  %v10402_v22 = vld [vmem:[#allocation144_spill] sm:$0xff] }
 0x85b   :  { %v10411_v11 = vld [vmem:[#allocation152_spill] sm:$0xff] }
 0x85d   :  { %6469 = vmatpush1.bf16.msra.mxu0 %v10394_v34  ;;  %6533 = vmatpush1.bf16.msra.mxu1 %v10395_v7  ;;  %v10403_v7 = vld [vmem:[#allocation145_spill] sm:$0xff]  ;;  %v10410_v34 = vld [vmem:[#allocation151_spill] sm:$0xff] }
 0x85e   :  { %6471 = vmatprep.subr.bf16.mxu0 %v10396_v24  ;;  %6535 = vmatprep.subr.bf16.mxu1 %v10397_v12  ;;  %v10404_v24 = vld [vmem:[#allocation19_spill] sm:$0xff]  ;;  %v10405_v12 = vld [vmem:[#allocation20_spill] sm:$0xff] }
 0x861   :  { %6473 = vmatpush1.bf16.msra.mxu0 %v10398_v16  ;;  %6537 = vmatpush1.bf16.msra.mxu1 %v10399_v57  ;;  %v10406_v16 = vld [vmem:[#allocation148_spill] sm:$0xff]  ;;  %v10407_v57 = vld [vmem:[#allocation149_spill] sm:$0xff] }
 0x862   :  { %6539 = vmatprep.subr.bf16.mxu0 %v10400_v62  ;;  %6571 = vmatprep.subr.bf16.mxu1 %v10401_v0  ;;  %v10408_v62 = vld [vmem:[#allocation21_spill] sm:$0xff]  ;;  %v10409_v0 = vld [vmem:[#allocation22_spill] sm:$0xff] }
 0x864   :  { %3130 = vmatmul.mubr.f32.vlgmr.msra.gmra.mrb[32].mxu0 %v8902_v9  ;;  %3201 = vmatmul.mubr.f32.vlgmr.msra.gmra.mrb[32].mxu1 %v8902_v9 }
 0x865   :  { %6541 = vmatpush3.bf16.msra.mxu0 %v10402_v22  ;;  %3271 = vmatprep.mubr.f32.mxu0 %v8909_v39  ;;  %v10412_v22 = vld [vmem:[#allocation23_spill] sm:$0xff] }
 0x866   :  { %6543 = vmatprep.subr.bf16.mxu0 %v10403_v7  ;;  %6573 = vmatpush1.bf16.msra.mxu1 %v10404_v24  ;;  %v10414_v7 = vld [vmem:[#allocation153_spill] sm:$0xff]  ;;  %v10415_v24 = vld [vmem:[#allocation154_spill] sm:$0xff] }
 0x867   :  { %6575 = vmatprep.subr.bf16.mxu1 %v10405_v12  ;;  %v10416_v12 = vld [vmem:[#allocation27_spill] sm:$0xff] }
 0x869   :  { %6545 = vmatpush3.bf16.msra.mxu0 %v10406_v16  ;;  %v10417_v16 = vld [vmem:[#allocation28_spill] sm:$0xff] }
 0x86a   :  { %6547 = vmatprep.subr.bf16.mxu0 %v10407_v57  ;;  %6577 = vmatpush1.bf16.msra.mxu1 %v10408_v62  ;;  %v10418_v57 = vld [vmem:[#allocation155_spill] sm:$0xff]  ;;  %v10419_v62 = vld [vmem:[#allocation156_spill] sm:$0xff] }
 0x86b   :  { %6579 = vmatprep.subr.bf16.mxu1 %v10409_v0  ;;  %v10420_v0 = vld [vmem:[#allocation31_spill] sm:$0xff] }
 0x86d   :  { %6549 = vmatpush3.bf16.msra.mxu0 %v10410_v34  ;;  %v10421_v34 = vld [vmem:[#allocation33_spill] sm:$0xff] }
 0x86e   :  { %6551 = vmatprep.subr.bf16.mxu0 %v10411_v11  ;;  %6581 = vmatpush1.bf16.msra.mxu1 %v10412_v22  ;;  %v10422_v11 = vld [vmem:[#allocation157_spill] sm:$0xff]  ;;  %v10423_v22 = vld [vmem:[#allocation158_spill] sm:$0xff] }
 0x86f   :  { %6583 = vmatprep.subr.bf16.mxu1 %v10413_v55  ;;  %v10424_v55 = vld [vmem:[#allocation36_spill] sm:$0xff] }
 0x871   :  { %6553 = vmatpush3.bf16.msra.mxu0 %v10414_v7  ;;  %v10425_v7 = vld [vmem:[#allocation37_spill] sm:$0xff] }
 0x872   :  { %6555 = vmatprep.subr.bf16.mxu0 %v10415_v24  ;;  %6585 = vmatpush1.bf16.msra.mxu1 %v10416_v12  ;;  %v10426_v24 = vld [vmem:[#allocation159_spill] sm:$0xff]  ;;  %v10427_v12 = vld [vmem:[#allocation160_spill] sm:$0xff] }
 0x873   :  { %6587 = vmatprep.subr.bf16.mxu1 %v10417_v16  ;;  %v10428_v16 = vld [vmem:[#allocation40_spill] sm:$0xff] }
 0x875   :  { %6557 = vmatpush3.bf16.msra.mxu0 %v10418_v57  ;;  %v10429_v57 = vld [vmem:[#allocation41_spill] sm:$0xff] }
 0x876   :  { %6559 = vmatprep.subr.bf16.mxu0 %v10419_v62  ;;  %6589 = vmatpush1.bf16.msra.mxu1 %v10420_v0  ;;  %v10430_v62 = vld [vmem:[#allocation161_spill] sm:$0xff] }
 0x877   :  { %6591 = vmatprep.subr.bf16.mxu1 %v10421_v34  ;;  %v10431_v0 = vld [vmem:[#allocation25_spill] sm:$0xff]  ;;  %v10432_v34 = vld [vmem:[#allocation44_spill] sm:$0xff] }
 0x879   :  { %6561 = vmatpush3.bf16.msra.mxu0 %v10422_v11  ;;  %v10433_v11 = vld [vmem:[#allocation45_spill] sm:$0xff] }
 0x87a   :  { %6563 = vmatprep.subr.bf16.mxu0 %v10423_v22  ;;  %6593 = vmatpush1.bf16.msra.mxu1 %v10424_v55  ;;  %v10434_v55 = vld [vmem:[#allocation26_spill] sm:$0xff]  ;;  %v10444_v22 = vld [vmem:[#allocation56_spill] sm:$0xff] }
 0x87b   :  { %6595 = vmatprep.subr.bf16.mxu1 %v10425_v7  ;;  %v10435_v7 = vld [vmem:[#allocation29_spill] sm:$0xff] }
 0x87d   :  { %6565 = vmatpush3.bf16.msra.mxu0 %v10426_v24  ;;  %v10436_v24 = vld [vmem:[#allocation48_spill] sm:$0xff] }
 0x87e   :  { %6567 = vmatprep.subr.bf16.mxu0 %v10427_v12  ;;  %6597 = vmatpush1.bf16.msra.mxu1 %v10428_v16  ;;  %v10437_v12 = vld [vmem:[#allocation49_spill] sm:$0xff]  ;;  %v10438_v16 = vld [vmem:[#allocation30_spill] sm:$0xff] }
 0x87f   :  { %6599 = vmatprep.subr.bf16.mxu1 %v10429_v57  ;;  %v10439_v57 = vld [vmem:[#allocation32_spill] sm:$0xff] }
 0x881   :  { %6569 = vmatpush3.bf16.msra.mxu0 %v10430_v62  ;;  %v10440_v62 = vld [vmem:[#allocation52_spill] sm:$0xff] }
 0x882   :  { %6635 = vmatprep.subr.bf16.mxu0 %v10431_v0  ;;  %6601 = vmatpush1.bf16.msra.mxu1 %v10432_v34  ;;  %v10441_v0 = vld [vmem:[#allocation53_spill] sm:$0xff]  ;;  %v10442_v34 = vld [vmem:[#allocation34_spill] sm:$0xff] }
 0x883   :  { %6603 = vmatprep.subr.bf16.mxu1 %v10433_v11  ;;  %v10443_v11 = vld [vmem:[#allocation35_spill] sm:$0xff] }
 0x884   :  { %3272 = vmatmul.mubr.f32.vlgmr.msra.gmra.mrb[34].mxu0 %v8902_v9 }
 0x885   :  { %6637 = vmatpush1.bf16.msra.mxu0 %v10434_v55  ;;  %v10445_v55 = vld [vmem:[#allocation57_spill] sm:$0xff] }
 0x886   :  { %6639 = vmatprep.subr.bf16.mxu0 %v10435_v7  ;;  %6605 = vmatpush1.bf16.msra.mxu1 %v10436_v24  ;;  %v10446_v7 = vld [vmem:[#allocation38_spill] sm:$0xff]  ;;  %v10447_v24 = vld [vmem:[#allocation39_spill] sm:$0xff] }
 0x887   :  { %6607 = vmatprep.subr.bf16.mxu1 %v10437_v12  ;;  %v10448_v12 = vld [vmem:[#allocation60_spill] sm:$0xff] }
 0x889   :  { %6641 = vmatpush1.bf16.msra.mxu0 %v10438_v16  ;;  %v10449_v16 = vld [vmem:[#allocation61_spill] sm:$0xff] }
 0x88a   :  { %6643 = vmatprep.subr.bf16.mxu0 %v10439_v57  ;;  %6609 = vmatpush1.bf16.msra.mxu1 %v10440_v62  ;;  %v10450_v57 = vld [vmem:[#allocation42_spill] sm:$0xff]  ;;  %v10451_v62 = vld [vmem:[#allocation43_spill] sm:$0xff] }
 0x88b   :  { %6611 = vmatprep.subr.bf16.mxu1 %v10441_v0  ;;  %v10452_v0 = vld [vmem:[#allocation64_spill] sm:$0xff] }
 0x88d   :  { %6645 = vmatpush1.bf16.msra.mxu0 %v10442_v34  ;;  %v10453_v34 = vld [vmem:[#allocation65_spill] sm:$0xff] }
 0x88e   :  { %6647 = vmatprep.subr.bf16.mxu0 %v10443_v11  ;;  %6613 = vmatpush1.bf16.msra.mxu1 %v10444_v22  ;;  %v10454_v11 = vld [vmem:[#allocation46_spill] sm:$0xff]  ;;  %v10455_v22 = vld [vmem:[#allocation47_spill] sm:$0xff] }
 0x88f   :  { %6615 = vmatprep.subr.bf16.mxu1 %v10445_v55  ;;  %v10456_v55 = vld [vmem:[#allocation68_spill] sm:$0xff] }
 0x891   :  { %6649 = vmatpush1.bf16.msra.mxu0 %v10446_v7  ;;  %v10457_v7 = vld [vmem:[#allocation69_spill] sm:$0xff] }
 0x892   :  { %6651 = vmatprep.subr.bf16.mxu0 %v10447_v24  ;;  %6617 = vmatpush1.bf16.msra.mxu1 %v10448_v12  ;;  %v10458_v24 = vld [vmem:[#allocation50_spill] sm:$0xff]  ;;  %v10459_v12 = vld [vmem:[#allocation51_spill] sm:$0xff] }
 0x893   :  { %6619 = vmatprep.subr.bf16.mxu1 %v10449_v16  ;;  %v10460_v16 = vld [vmem:[#allocation72_spill] sm:$0xff] }
 0x895   :  { %6653 = vmatpush1.bf16.msra.mxu0 %v10450_v57  ;;  %v10461_v57 = vld [vmem:[#allocation73_spill] sm:$0xff] }
 0x896   :  { %6655 = vmatprep.subr.bf16.mxu0 %v10451_v62  ;;  %6621 = vmatpush1.bf16.msra.mxu1 %v10452_v0  ;;  %v10462_v62 = vld [vmem:[#allocation54_spill] sm:$0xff]  ;;  %v10463_v0 = vld [vmem:[#allocation55_spill] sm:$0xff] }
 0x897   :  { %6623 = vmatprep.subr.bf16.mxu1 %v10453_v34  ;;  %v10464_v34 = vld [vmem:[#allocation76_spill] sm:$0xff] }
 0x899   :  { %6657 = vmatpush1.bf16.msra.mxu0 %v10454_v11  ;;  %v10465_v11 = vld [vmem:[#allocation78_spill] sm:$0xff] }
 0x89a   :  { %6659 = vmatprep.subr.bf16.mxu0 %v10455_v22  ;;  %6625 = vmatpush1.bf16.msra.mxu1 %v10456_v55  ;;  %v10466_v22 = vld [vmem:[#allocation58_spill] sm:$0xff]  ;;  %v10467_v55 = vld [vmem:[#allocation59_spill] sm:$0xff] }
 0x89b   :  { %6627 = vmatprep.subr.bf16.mxu1 %v10457_v7  ;;  %v10468_v7 = vld [vmem:[#allocation62_spill] sm:$0xff] }
 0x89d   :  { %6661 = vmatpush1.bf16.msra.mxu0 %v10458_v24  ;;  %v10469_v24 = vld [vmem:[#allocation63_spill] sm:$0xff] }
 0x89e   :  { %6663 = vmatprep.subr.bf16.mxu0 %v10459_v12  ;;  %6629 = vmatpush1.bf16.msra.mxu1 %v10460_v16  ;;  %v10470_v12 = vld [vmem:[#allocation66_spill] sm:$0xff]  ;;  %v10471_v16 = vld [vmem:[#allocation67_spill] sm:$0xff] }
 0x89f   :  { %6631 = vmatprep.subr.bf16.mxu1 %v10461_v57  ;;  %v10472_v57 = vld [vmem:[#allocation70_spill] sm:$0xff] }
 0x8a1   :  { %6665 = vmatpush1.bf16.msra.mxu0 %v10462_v62  ;;  %v10473_v62 = vld [vmem:[#allocation71_spill] sm:$0xff] }
 0x8a2   :  { %6667 = vmatprep.subr.bf16.mxu0 %v10463_v0  ;;  %6633 = vmatpush1.bf16.msra.mxu1 %v10464_v34  ;;  %v10474_v0 = vld [vmem:[#allocation74_spill] sm:$0xff]  ;;  %v10475_v34 = vld [vmem:[#allocation75_spill] sm:$0xff] }
 0x8a3   :  { %6699 = vmatprep.subr.bf16.mxu1 %v10465_v11  ;;  %v10476_v11 = vld [vmem:[#allocation77_spill] sm:$0xff] }
 0x8a5   :  { %6669 = vmatpush1.bf16.msra.mxu0 %v10466_v22  ;;  %v10477_v22 = vld [vmem:[#allocation79_spill] sm:$0xff] }
 0x8a6   :  { %6671 = vmatprep.subr.bf16.mxu0 %v10467_v55  ;;  %v10478_v55 = vld [vmem:[#allocation81_spill] sm:$0xff] }
 0x8a9   :  { %6673 = vmatpush1.bf16.msra.mxu0 %v10468_v7  ;;  %v10479_v7 = vld [vmem:[#allocation83_spill] sm:$0xff] }
 0x8aa   :  { %6675 = vmatprep.subr.bf16.mxu0 %v10469_v24  ;;  %v10480_v24 = vld [vmem:[#allocation85_spill] sm:$0xff] }
 0x8ad   :  { %6677 = vmatpush1.bf16.msra.mxu0 %v10470_v12  ;;  %v10481_v12 = vld [vmem:[#allocation87_spill] sm:$0xff] }
 0x8ae   :  { %6679 = vmatprep.subr.bf16.mxu0 %v10471_v16  ;;  %v3281_v16 = vld [vmem:[#allocation4 + $0x90] sm:$0xff] }
 0x8b1   :  { %6681 = vmatpush1.bf16.msra.mxu0 %v10472_v57 }
 0x8b2   :  { %6683 = vmatprep.subr.bf16.mxu0 %v10473_v62 }
 0x8b5   :  { %6685 = vmatpush1.bf16.msra.mxu0 %v10474_v0  ;;  %v3282_v0 = vld [vmem:[#allocation4 + $0x98] sm:$0xff] }
 0x8b6   :  { %6687 = vmatprep.subr.bf16.mxu0 %v10475_v34 }
 0x8b9   :  { %6689 = vmatpush1.bf16.msra.mxu0 %v10476_v11 }
 0x8ba   :  { %6691 = vmatprep.subr.bf16.mxu0 %v10477_v22 }
 0x8bd   :  { %6693 = vmatpush1.bf16.msra.mxu0 %v10478_v55 }
 0x8be   :  { %6695 = vmatprep.subr.bf16.mxu0 %v10479_v7 }
 0x8c1   :  { %6697 = vmatpush1.bf16.msra.mxu0 %v10480_v24  ;;  %v9065_v24 = vld [vmem:[#allocation10] ss:$0 sm:$0xff] }
 0x8c2   :  { %6763 = vmatprep.subr.bf16.mxu0 %v10481_v12  ;;  %10482 = vst [vmem:[#allocation91_spill] sm:$0xff] %v9065_v24 }
 0x8f7   :  { %v2989_v57 = vpop.f32.mrb[30].mxu0  ;;  %v3060_v18 = vpop.f32.mrb[30].mxu1 }
 0x8f8   :  { %v3284_v62 = vadd.f32 %v3281_v16, %v2989_v57  ;;  %v2991_v5 = vpop.f32.mrb[31].mxu0  ;;  %v3062_v26 = vpop.f32.mrb[31].mxu1  ;;  %v3298_v12 = vadd.f32 %v9065_v24, %v3060_v18 }
 0x8f9   :  { %v3285_v60 = vadd.f32 %v3282_v0, %v2991_v5 }
 0x8fa   :  { %v4227_v34 = vmul.f32 -1.442695, %v3284_v62 }
 0x8fb   :  { %v4228_v11 = vmul.f32 -1.442695, %v3285_v60 }
 0x8fc   :  { %7267 = vpow2.f32 %v4227_v34 }
 0x8fd   :  { %7269 = vpow2.f32 %v4228_v11 }
 0x906   :  { %v7268_v22 = vpop.eup %7267 }
 0x907   :  { %v3292_v55 = vadd.f32 1.0, %v7268_v22  ;;  %v7270_v7 = vpop.eup %7269 }
 0x908   :  { %v3293_v51 = vadd.f32 1.0, %v7270_v7 }
 0x909   :  { %7271 = vrcp.f32 %v3292_v55  ;;  %v3277_v55 = vadd.f32 %v3062_v26, %v10057_v52 }
 0x90a   :  { %7273 = vrcp.f32 %v3293_v51 }
 0x913   :  { %v7272_v38 = vpop.eup %7271 }
 0x914   :  { %v3299_v16 = vmul.f32 %v7272_v38, %v3298_v12  ;;  %v7274_v62 = vpop.eup %7273 }
 0x915   :  { %v3302_v5 = vsub.f32 1.0, %v7274_v62  ;;  %v3304_v11 = vmul.f32 %v7274_v62, %v8902_v9 }
 0x916   :  { %v3300_v57 = vadd.f32 %v3299_v16, %v3283_v42 }
 0x918   :  { %7275 = vtanh.f32 %v3300_v57 }
 0x922   :  { %v7276_v0 = vpop.eup %7275 }
 0x923   :  { %v3303_v60 = vmul.f32 %v7276_v0, %v3302_v5 }
 0x925   :  { %v9069_v22 = vadd.f32 %v3304_v11, %v3303_v60 }
 0x937   :  { %v3131_v34 = vpop.f32.mrb[32].mxu0  ;;  %v3202_v7 = vpop.f32.mrb[32].mxu1 }
 0x938   :  { %v3278_v18 = vadd.f32 %v3131_v34, %v10058_v47  ;;  %v3306_v24 = vadd.f32 %v3277_v55, %v3202_v7  ;;  %v3133_v54 = vpop.f32.mrb[33].mxu0  ;;  %v3204_v38 = vpop.f32.mrb[33].mxu1 }
 0x939   :  { %v3279_v55 = vadd.f32 %v3133_v54, %v8241_v50  ;;  %v10485_v54 = vld [vmem:[#allocation130_spill] sm:$0xff] }
 0x93a   :  { %v3307_v51 = vadd.f32 %v3278_v18, %v3204_v38  ;;  %v4229_v42 = vmul.f32 -1.442695, %v3306_v24 }
 0x93c   :  { %7277 = vpow2.f32 %v4229_v42  ;;  %v4230_v12 = vmul.f32 -1.442695, %v3307_v51 }
 0x93e   :  { %7279 = vpow2.f32 %v4230_v12 }
 0x946   :  { %v7278_v16 = vpop.eup %7277 }
 0x947   :  { %v3314_v57 = vadd.f32 1.0, %v7278_v16  ;;  %v10486_v16 = vld [vmem:[#allocation121_spill] sm:$0xff] }
 0x948   :  { %v7280_v9 = vpop.eup %7279 }
 0x949   :  { %7281 = vrcp.f32 %v3314_v57  ;;  %v3315_v0 = vadd.f32 1.0, %v7280_v9  ;;  %v10487_v57 = vld [vmem:[#allocation131_spill] sm:$0xff]  ;;  %v10488_v9 = vld [vmem:[#allocation124_spill] sm:$0xff] }
 0x94b   :  { %7283 = vrcp.f32 %v3315_v0  ;;  %v10491_v0 = vld [vmem:[#allocation135_spill] sm:$0xff] }
 0x953   :  { %v7282_v11 = vpop.eup %7281 }
 0x955   :  { %v7284_v24 = vpop.eup %7283 }
 0x956   :  { %v3324_v18 = vsub.f32 1.0, %v7284_v24  ;;  %v3326_v51 = vmul.f32 %v7284_v24, %v8909_v39  ;;  %v10484_v39 = vld [vmem:[#allocation120_spill] sm:$0xff]  ;;  %v10498_v24 = vld [vmem:[#allocation133_spill] sm:$0xff] }
 0x957   :  { %v4481_v62 = vpop.f32.mrb[34].mxu0 }
 0x958   :  { %v4482_v5 = vpop.f32.mrb[35].mxu0 }
 0x959   :  { %v4483_v26 = vadd.f32 %v4482_v5, %v4481_v62  ;;  %v10489_v62 = vld [vmem:[#allocation134_spill] sm:$0xff]  ;;  %v10490_v5 = vld [vmem:[#allocation125_spill] sm:$0xff] }
 0x95b   :  { %v3320_v60 = vadd.f32 %v8739_v32, %v4483_v26  ;;  %v10483_v32 = vld [vmem:[#allocation127_spill] sm:$0xff]  ;;  %v10492_v26 = vld [vmem:[#allocation128_spill] sm:$0xff] }
 0x95d   :  { %v3321_v34 = vmul.f32 %v7282_v11, %v3320_v60  ;;  %v10493_v60 = vld [vmem:[#allocation138_spill] sm:$0xff]  ;;  %v10494_v11 = vld [vmem:[#allocation129_spill] sm:$0xff] }
 0x95f   :  { %v3322_v7 = vadd.f32 %v3321_v34, %v3279_v55  ;;  %v10495_v55 = vld [vmem:[#allocation139_spill] sm:$0xff]  ;;  %v10496_v34 = vld [vmem:[#allocation132_spill] sm:$0xff] }
 0x961   :  { %7285 = vtanh.f32 %v3322_v7  ;;  %v10497_v7 = vld [vmem:[#allocation142_spill] sm:$0xff] }
 0x96b   :  { %v7286_v38 = vpop.eup %7285 }
 0x96c   :  { %v3325_v42 = vmul.f32 %v7286_v38, %v3324_v18  ;;  %v10499_v18 = vld [vmem:[#allocation143_spill] sm:$0xff]  ;;  %v10500_v38 = vld [vmem:[#allocation136_spill] sm:$0xff] }
 0x96e   :  { %v9076_v12 = vadd.f32 %v3326_v51, %v3325_v42  ;;  %v10501_v51 = vld [vmem:[#allocation146_spill] sm:$0xff]  ;;  %v10502_v42 = vld [vmem:[#allocation137_spill] sm:$0xff] }
 0x970   :  { %3406 = vmatprep.mubr.f32.mxu1 %v9076_v12  ;;  %3477 = vmatprep.mubr.f32.mxu0 %v9076_v12 }
 0x971   :  { %3407 = vmatmul.mubr.f32.vlgmr.msra.gmra.mrb[34].mxu1 %v9069_v22  ;;  %3478 = vmatmul.mubr.f32.vlgmr.msra.gmra.mrb[36].mxu0 %v9069_v22 }
 0x972   :  { %6701 = vmatpush1.bf16.msra.mxu1 %v9854_v41  ;;  %6765 = vmatpush1.bf16.msra.mxu0 %v9855_v44 }
 0x973   :  { %3548 = vmatprep.mubr.f32.mxu1 %v9076_v12  ;;  %3619 = vmatprep.mubr.f32.mxu0 %v9076_v12 }
 0x974   :  { %6703 = vmatprep.subr.bf16.mxu1 %v9856_v59  ;;  %6767 = vmatprep.subr.bf16.mxu0 %v9954_v6 }
 0x976   :  { %6705 = vmatpush1.bf16.msra.mxu1 %v9955_v25  ;;  %6769 = vmatpush1.bf16.msra.mxu0 %v9956_v35 }
 0x977   :  { %6707 = vmatprep.subr.bf16.mxu1 %v9957_v33  ;;  %6771 = vmatprep.subr.bf16.mxu0 %v9958_v37 }
 0x97a   :  { %6709 = vmatpush1.bf16.msra.mxu1 %v9959_v31  ;;  %6773 = vmatpush1.bf16.msra.mxu0 %v9960_v10 }
 0x97b   :  { %6711 = vmatprep.subr.bf16.mxu1 %v10059_v63  ;;  %6775 = vmatprep.subr.bf16.mxu0 %v10060_v3 }
 0x97e   :  { %6713 = vmatpush1.bf16.msra.mxu1 %v10061_v56  ;;  %6777 = vmatpush1.bf16.msra.mxu0 %v10062_v30 }
 0x97f   :  { %6715 = vmatprep.subr.bf16.mxu1 %v10063_v58  ;;  %6779 = vmatprep.subr.bf16.mxu0 %v10064_v36 }
 0x982   :  { %6717 = vmatpush1.bf16.msra.mxu1 %v10065_v19  ;;  %6781 = vmatpush1.bf16.msra.mxu0 %v10066_v14 }
 0x983   :  { %6719 = vmatprep.subr.bf16.mxu1 %v10165_v17  ;;  %6783 = vmatprep.subr.bf16.mxu0 %v10166_v29 }
 0x986   :  { %6721 = vmatpush1.bf16.msra.mxu1 %v10167_v15  ;;  %6785 = vmatpush1.bf16.msra.mxu0 %v10070_v61 }
 0x987   :  { %6723 = vmatprep.subr.bf16.mxu1 %v10168_v49  ;;  %6787 = vmatprep.subr.bf16.mxu0 %v10072_v1 }
 0x98a   :  { %6725 = vmatpush1.bf16.msra.mxu1 %v10169_v13  ;;  %6789 = vmatpush1.bf16.msra.mxu0 %v10074_v27 }
 0x98b   :  { %6727 = vmatprep.subr.bf16.mxu1 %v10075_v2  ;;  %6791 = vmatprep.subr.bf16.mxu0 %v10076_v20 }
 0x98e   :  { %6729 = vmatpush1.bf16.msra.mxu1 %v10077_v4  ;;  %6793 = vmatpush1.bf16.msra.mxu0 %v10078_v40 }
 0x98f   :  { %6731 = vmatprep.subr.bf16.mxu1 %v10079_v8  ;;  %6795 = vmatprep.subr.bf16.mxu0 %v10080_v23 }
 0x992   :  { %6733 = vmatpush1.bf16.msra.mxu1 %v9983_v28  ;;  %6797 = vmatpush1.bf16.msra.mxu0 %v10081_v21 }
 0x993   :  { %6735 = vmatprep.subr.bf16.mxu1 %v9985_v53  ;;  %6799 = vmatprep.subr.bf16.mxu0 %v10170_v48 }
 0x996   :  { %6737 = vmatpush1.bf16.msra.mxu1 %v9987_v45  ;;  %6801 = vmatpush1.bf16.msra.mxu0 %v9988_v43 }
 0x997   :  { %6739 = vmatprep.subr.bf16.mxu1 %v10376_v46  ;;  %6803 = vmatprep.subr.bf16.mxu0 %v10483_v32 }
 0x99a   :  { %6741 = vmatpush1.bf16.msra.mxu1 %v10484_v39  ;;  %6805 = vmatpush1.bf16.msra.mxu0 %v10485_v54  ;;  %v3702_v54 = vld [vmem:[#allocation4 + $0xb8] sm:$0xff] }
 0x99b   :  { %6743 = vmatprep.subr.bf16.mxu1 %v10486_v16  ;;  %6807 = vmatprep.subr.bf16.mxu0 %v10487_v57 }
 0x99e   :  { %6745 = vmatpush1.bf16.msra.mxu1 %v10488_v9  ;;  %6809 = vmatpush1.bf16.msra.mxu0 %v10489_v62 }
 0x99f   :  { %6747 = vmatprep.subr.bf16.mxu1 %v10490_v5  ;;  %6811 = vmatprep.subr.bf16.mxu0 %v10491_v0 }
 0x9a2   :  { %6749 = vmatpush1.bf16.msra.mxu1 %v10492_v26  ;;  %6813 = vmatpush1.bf16.msra.mxu0 %v10493_v60  ;;  %v10503_v26 = vld [vmem:[#allocation147_spill] sm:$0xff]  ;;  %v10504_v60 = vld [vmem:[#allocation140_spill] sm:$0xff] }
 0x9a3   :  { %6751 = vmatprep.subr.bf16.mxu1 %v10494_v11  ;;  %6815 = vmatprep.subr.bf16.mxu0 %v10495_v55  ;;  %v10505_v11 = vld [vmem:[#allocation150_spill] sm:$0xff]  ;;  %v10506_v55 = vld [vmem:[#allocation141_spill] sm:$0xff] }
 0x9a6   :  { %6753 = vmatpush1.bf16.msra.mxu1 %v10496_v34  ;;  %6817 = vmatpush1.bf16.msra.mxu0 %v10497_v7  ;;  %v10507_v34 = vld [vmem:[#allocation18_spill] sm:$0xff]  ;;  %v10519_v7 = vld [vmem:[#allocation24_spill] sm:$0xff] }
 0x9a7   :  { %6755 = vmatprep.subr.bf16.mxu1 %v10498_v24  ;;  %6819 = vmatprep.subr.bf16.mxu0 %v10499_v18  ;;  %v10508_v18 = vld [vmem:[#allocation144_spill] sm:$0xff] }
 0x9a8   :  { %v10517_v24 = vld [vmem:[#allocation152_spill] sm:$0xff] }
 0x9aa   :  { %6757 = vmatpush1.bf16.msra.mxu1 %v10500_v38  ;;  %6821 = vmatpush1.bf16.msra.mxu0 %v10501_v51  ;;  %v10509_v51 = vld [vmem:[#allocation145_spill] sm:$0xff]  ;;  %v10516_v38 = vld [vmem:[#allocation151_spill] sm:$0xff] }
 0x9ab   :  { %6759 = vmatprep.subr.bf16.mxu1 %v10502_v42  ;;  %6823 = vmatprep.subr.bf16.mxu0 %v10503_v26  ;;  %v10510_v42 = vld [vmem:[#allocation19_spill] sm:$0xff]  ;;  %v10511_v26 = vld [vmem:[#allocation20_spill] sm:$0xff] }
 0x9ae   :  { %6761 = vmatpush1.bf16.msra.mxu1 %v10504_v60  ;;  %6825 = vmatpush1.bf16.msra.mxu0 %v10505_v11  ;;  %v10512_v60 = vld [vmem:[#allocation148_spill] sm:$0xff]  ;;  %v10513_v11 = vld [vmem:[#allocation149_spill] sm:$0xff] }
 0x9af   :  { %6827 = vmatprep.subr.bf16.mxu1 %v10506_v55  ;;  %6859 = vmatprep.subr.bf16.mxu0 %v10507_v34  ;;  %v10514_v55 = vld [vmem:[#allocation21_spill] sm:$0xff]  ;;  %v10515_v34 = vld [vmem:[#allocation22_spill] sm:$0xff] }
 0x9b1   :  { %3549 = vmatmul.mubr.f32.vlgmr.msra.gmra.mrb[36].mxu1 %v9069_v22  ;;  %3620 = vmatmul.mubr.f32.vlgmr.msra.gmra.mrb[38].mxu0 %v9069_v22 }
 0x9b2   :  { %6829 = vmatpush3.bf16.msra.mxu1 %v10508_v18  ;;  %3690 = vmatprep.mubr.f32.mxu1 %v9076_v12  ;;  %v10518_v18 = vld [vmem:[#allocation23_spill] sm:$0xff] }
 0x9b3   :  { %6831 = vmatprep.subr.bf16.mxu1 %v10509_v51  ;;  %6861 = vmatpush1.bf16.msra.mxu0 %v10510_v42  ;;  %v10520_v51 = vld [vmem:[#allocation153_spill] sm:$0xff]  ;;  %v10521_v42 = vld [vmem:[#allocation154_spill] sm:$0xff] }
 0x9b4   :  { %6863 = vmatprep.subr.bf16.mxu0 %v10511_v26  ;;  %v10522_v26 = vld [vmem:[#allocation27_spill] sm:$0xff] }
 0x9b6   :  { %6833 = vmatpush3.bf16.msra.mxu1 %v10512_v60  ;;  %v10523_v60 = vld [vmem:[#allocation28_spill] sm:$0xff] }
 0x9b7   :  { %6835 = vmatprep.subr.bf16.mxu1 %v10513_v11  ;;  %6865 = vmatpush1.bf16.msra.mxu0 %v10514_v55  ;;  %v10524_v11 = vld [vmem:[#allocation155_spill] sm:$0xff]  ;;  %v10525_v55 = vld [vmem:[#allocation156_spill] sm:$0xff] }
 0x9b8   :  { %6867 = vmatprep.subr.bf16.mxu0 %v10515_v34  ;;  %v10526_v34 = vld [vmem:[#allocation31_spill] sm:$0xff] }
 0x9ba   :  { %6837 = vmatpush3.bf16.msra.mxu1 %v10516_v38  ;;  %v10527_v38 = vld [vmem:[#allocation33_spill] sm:$0xff] }
 0x9bb   :  { %6839 = vmatprep.subr.bf16.mxu1 %v10517_v24  ;;  %6869 = vmatpush1.bf16.msra.mxu0 %v10518_v18  ;;  %v10528_v24 = vld [vmem:[#allocation157_spill] sm:$0xff]  ;;  %v10529_v18 = vld [vmem:[#allocation158_spill] sm:$0xff] }
 0x9bc   :  { %6871 = vmatprep.subr.bf16.mxu0 %v10519_v7  ;;  %v10530_v7 = vld [vmem:[#allocation36_spill] sm:$0xff] }
 0x9be   :  { %6841 = vmatpush3.bf16.msra.mxu1 %v10520_v51  ;;  %v10531_v51 = vld [vmem:[#allocation37_spill] sm:$0xff] }
 0x9bf   :  { %6843 = vmatprep.subr.bf16.mxu1 %v10521_v42  ;;  %6873 = vmatpush1.bf16.msra.mxu0 %v10522_v26  ;;  %v10532_v42 = vld [vmem:[#allocation159_spill] sm:$0xff]  ;;  %v10533_v26 = vld [vmem:[#allocation160_spill] sm:$0xff] }
 0x9c0   :  { %6875 = vmatprep.subr.bf16.mxu0 %v10523_v60  ;;  %v10534_v60 = vld [vmem:[#allocation40_spill] sm:$0xff] }
 0x9c2   :  { %6845 = vmatpush3.bf16.msra.mxu1 %v10524_v11  ;;  %v10535_v11 = vld [vmem:[#allocation41_spill] sm:$0xff] }
 0x9c3   :  { %6847 = vmatprep.subr.bf16.mxu1 %v10525_v55  ;;  %6877 = vmatpush1.bf16.msra.mxu0 %v10526_v34  ;;  %v10536_v55 = vld [vmem:[#allocation161_spill] sm:$0xff] }
 0x9c4   :  { %6879 = vmatprep.subr.bf16.mxu0 %v10527_v38  ;;  %v10537_v34 = vld [vmem:[#allocation25_spill] sm:$0xff]  ;;  %v10538_v38 = vld [vmem:[#allocation44_spill] sm:$0xff] }
 0x9c6   :  { %6849 = vmatpush3.bf16.msra.mxu1 %v10528_v24  ;;  %v10539_v24 = vld [vmem:[#allocation45_spill] sm:$0xff] }
 0x9c7   :  { %6851 = vmatprep.subr.bf16.mxu1 %v10529_v18  ;;  %6881 = vmatpush1.bf16.msra.mxu0 %v10530_v7  ;;  %v10540_v7 = vld [vmem:[#allocation26_spill] sm:$0xff]  ;;  %v10550_v18 = vld [vmem:[#allocation56_spill] sm:$0xff] }
 0x9c8   :  { %6883 = vmatprep.subr.bf16.mxu0 %v10531_v51  ;;  %v10541_v51 = vld [vmem:[#allocation29_spill] sm:$0xff] }
 0x9ca   :  { %6853 = vmatpush3.bf16.msra.mxu1 %v10532_v42  ;;  %v10542_v42 = vld [vmem:[#allocation48_spill] sm:$0xff] }
 0x9cb   :  { %6855 = vmatprep.subr.bf16.mxu1 %v10533_v26  ;;  %6885 = vmatpush1.bf16.msra.mxu0 %v10534_v60  ;;  %v10543_v26 = vld [vmem:[#allocation49_spill] sm:$0xff]  ;;  %v10544_v60 = vld [vmem:[#allocation30_spill] sm:$0xff] }
 0x9cc   :  { %6887 = vmatprep.subr.bf16.mxu0 %v10535_v11  ;;  %v10545_v11 = vld [vmem:[#allocation32_spill] sm:$0xff] }
 0x9ce   :  { %6857 = vmatpush3.bf16.msra.mxu1 %v10536_v55  ;;  %v10546_v55 = vld [vmem:[#allocation52_spill] sm:$0xff] }
 0x9cf   :  { %6923 = vmatprep.subr.bf16.mxu1 %v10537_v34  ;;  %6889 = vmatpush1.bf16.msra.mxu0 %v10538_v38  ;;  %v10547_v34 = vld [vmem:[#allocation53_spill] sm:$0xff]  ;;  %v10548_v38 = vld [vmem:[#allocation34_spill] sm:$0xff] }
 0x9d0   :  { %6891 = vmatprep.subr.bf16.mxu0 %v10539_v24  ;;  %v10549_v24 = vld [vmem:[#allocation35_spill] sm:$0xff] }
 0x9d1   :  { %3691 = vmatmul.mubr.f32.vlgmr.msra.gmra.mrb[38].mxu1 %v9069_v22 }
 0x9d2   :  { %6925 = vmatpush1.bf16.msra.mxu1 %v10540_v7  ;;  %v10551_v7 = vld [vmem:[#allocation57_spill] sm:$0xff] }
 0x9d3   :  { %6927 = vmatprep.subr.bf16.mxu1 %v10541_v51  ;;  %6893 = vmatpush1.bf16.msra.mxu0 %v10542_v42  ;;  %v10552_v51 = vld [vmem:[#allocation38_spill] sm:$0xff]  ;;  %v10553_v42 = vld [vmem:[#allocation39_spill] sm:$0xff] }
 0x9d4   :  { %6895 = vmatprep.subr.bf16.mxu0 %v10543_v26  ;;  %v10554_v26 = vld [vmem:[#allocation60_spill] sm:$0xff] }
 0x9d6   :  { %6929 = vmatpush1.bf16.msra.mxu1 %v10544_v60  ;;  %v10555_v60 = vld [vmem:[#allocation61_spill] sm:$0xff] }
 0x9d7   :  { %6931 = vmatprep.subr.bf16.mxu1 %v10545_v11  ;;  %6897 = vmatpush1.bf16.msra.mxu0 %v10546_v55  ;;  %v10556_v11 = vld [vmem:[#allocation42_spill] sm:$0xff]  ;;  %v10557_v55 = vld [vmem:[#allocation43_spill] sm:$0xff] }
 0x9d8   :  { %6899 = vmatprep.subr.bf16.mxu0 %v10547_v34  ;;  %v10558_v34 = vld [vmem:[#allocation64_spill] sm:$0xff] }
 0x9da   :  { %6933 = vmatpush1.bf16.msra.mxu1 %v10548_v38  ;;  %v10559_v38 = vld [vmem:[#allocation65_spill] sm:$0xff] }
 0x9db   :  { %6935 = vmatprep.subr.bf16.mxu1 %v10549_v24  ;;  %6901 = vmatpush1.bf16.msra.mxu0 %v10550_v18  ;;  %v10560_v24 = vld [vmem:[#allocation46_spill] sm:$0xff]  ;;  %v10561_v18 = vld [vmem:[#allocation47_spill] sm:$0xff] }
 0x9dc   :  { %6903 = vmatprep.subr.bf16.mxu0 %v10551_v7  ;;  %v10562_v7 = vld [vmem:[#allocation68_spill] sm:$0xff] }
 0x9de   :  { %6937 = vmatpush1.bf16.msra.mxu1 %v10552_v51  ;;  %v10563_v51 = vld [vmem:[#allocation69_spill] sm:$0xff] }
 0x9df   :  { %6939 = vmatprep.subr.bf16.mxu1 %v10553_v42  ;;  %6905 = vmatpush1.bf16.msra.mxu0 %v10554_v26  ;;  %v10564_v42 = vld [vmem:[#allocation50_spill] sm:$0xff]  ;;  %v10565_v26 = vld [vmem:[#allocation51_spill] sm:$0xff] }
 0x9e0   :  { %6907 = vmatprep.subr.bf16.mxu0 %v10555_v60  ;;  %v10566_v60 = vld [vmem:[#allocation72_spill] sm:$0xff] }
 0x9e2   :  { %6941 = vmatpush1.bf16.msra.mxu1 %v10556_v11  ;;  %v10567_v11 = vld [vmem:[#allocation73_spill] sm:$0xff] }
 0x9e3   :  { %6943 = vmatprep.subr.bf16.mxu1 %v10557_v55  ;;  %6909 = vmatpush1.bf16.msra.mxu0 %v10558_v34  ;;  %v10568_v55 = vld [vmem:[#allocation54_spill] sm:$0xff]  ;;  %v10569_v34 = vld [vmem:[#allocation55_spill] sm:$0xff] }
 0x9e4   :  { %6911 = vmatprep.subr.bf16.mxu0 %v10559_v38  ;;  %v10570_v38 = vld [vmem:[#allocation76_spill] sm:$0xff] }
 0x9e6   :  { %6945 = vmatpush1.bf16.msra.mxu1 %v10560_v24  ;;  %v10571_v24 = vld [vmem:[#allocation78_spill] sm:$0xff] }
 0x9e7   :  { %6947 = vmatprep.subr.bf16.mxu1 %v10561_v18  ;;  %6913 = vmatpush1.bf16.msra.mxu0 %v10562_v7  ;;  %v10572_v18 = vld [vmem:[#allocation58_spill] sm:$0xff]  ;;  %v10573_v7 = vld [vmem:[#allocation59_spill] sm:$0xff] }
 0x9e8   :  { %6915 = vmatprep.subr.bf16.mxu0 %v10563_v51  ;;  %v10574_v51 = vld [vmem:[#allocation62_spill] sm:$0xff] }
 0x9ea   :  { %6949 = vmatpush1.bf16.msra.mxu1 %v10564_v42  ;;  %v10575_v42 = vld [vmem:[#allocation63_spill] sm:$0xff] }
 0x9eb   :  { %6951 = vmatprep.subr.bf16.mxu1 %v10565_v26  ;;  %6917 = vmatpush1.bf16.msra.mxu0 %v10566_v60  ;;  %v10576_v26 = vld [vmem:[#allocation66_spill] sm:$0xff]  ;;  %v10577_v60 = vld [vmem:[#allocation67_spill] sm:$0xff] }
 0x9ec   :  { %6919 = vmatprep.subr.bf16.mxu0 %v10567_v11  ;;  %v10578_v11 = vld [vmem:[#allocation70_spill] sm:$0xff] }
 0x9ee   :  { %6953 = vmatpush1.bf16.msra.mxu1 %v10568_v55  ;;  %v10579_v55 = vld [vmem:[#allocation71_spill] sm:$0xff] }
 0x9ef   :  { %6955 = vmatprep.subr.bf16.mxu1 %v10569_v34  ;;  %6921 = vmatpush1.bf16.msra.mxu0 %v10570_v38  ;;  %v10580_v34 = vld [vmem:[#allocation74_spill] sm:$0xff]  ;;  %v10581_v38 = vld [vmem:[#allocation75_spill] sm:$0xff] }
 0x9f0   :  { %6987 = vmatprep.subr.bf16.mxu0 %v10571_v24  ;;  %v10582_v24 = vld [vmem:[#allocation77_spill] sm:$0xff] }
 0x9f2   :  { %6957 = vmatpush1.bf16.msra.mxu1 %v10572_v18  ;;  %v10583_v18 = vld [vmem:[#allocation79_spill] sm:$0xff] }
 0x9f3   :  { %6959 = vmatprep.subr.bf16.mxu1 %v10573_v7  ;;  %v10584_v7 = vld [vmem:[#allocation81_spill] sm:$0xff] }
 0x9f6   :  { %6961 = vmatpush1.bf16.msra.mxu1 %v10574_v51  ;;  %v10585_v51 = vld [vmem:[#allocation83_spill] sm:$0xff] }
 0x9f7   :  { %6963 = vmatprep.subr.bf16.mxu1 %v10575_v42  ;;  %v10586_v42 = vld [vmem:[#allocation85_spill] sm:$0xff] }
 0x9fa   :  { %6965 = vmatpush1.bf16.msra.mxu1 %v10576_v26  ;;  %v10587_v26 = vld [vmem:[#allocation87_spill] sm:$0xff] }
 0x9fb   :  { %6967 = vmatprep.subr.bf16.mxu1 %v10577_v60  ;;  %v3700_v60 = vld [vmem:[#allocation4 + $0xa8] sm:$0xff] }
 0x9fe   :  { %6969 = vmatpush1.bf16.msra.mxu1 %v10578_v11 }
 0x9ff   :  { %6971 = vmatprep.subr.bf16.mxu1 %v10579_v55 }
 0xa02   :  { %6973 = vmatpush1.bf16.msra.mxu1 %v10580_v34  ;;  %v3701_v34 = vld [vmem:[#allocation4 + $0xb0] sm:$0xff] }
 0xa03   :  { %6975 = vmatprep.subr.bf16.mxu1 %v10581_v38 }
 0xa06   :  { %6977 = vmatpush1.bf16.msra.mxu1 %v10582_v24 }
 0xa07   :  { %6979 = vmatprep.subr.bf16.mxu1 %v10583_v18 }
 0xa0a   :  { %6981 = vmatpush1.bf16.msra.mxu1 %v10584_v7 }
 0xa0b   :  { %6983 = vmatprep.subr.bf16.mxu1 %v10585_v51 }
 0xa0e   :  { %6985 = vmatpush1.bf16.msra.mxu1 %v10586_v42  ;;  %v10588_v42 = vld [vmem:[#allocation91_spill] sm:$0xff] }
 0xa0f   :  { %7051 = vmatprep.subr.bf16.mxu1 %v10587_v26 }
 0xa44   :  { %v3408_v11 = vpop.f32.mrb[34].mxu1  ;;  %v3479_v0 = vpop.f32.mrb[36].mxu0 }
 0xa45   :  { %v3703_v55 = vadd.f32 %v3700_v60, %v3408_v11  ;;  %v3410_v5 = vpop.f32.mrb[35].mxu1  ;;  %v3481_v62 = vpop.f32.mrb[37].mxu0  ;;  %v3717_v16 = vadd.f32 %v10588_v42, %v3479_v0 }
 0xa46   :  { %v3704_v9 = vadd.f32 %v3701_v34, %v3410_v5 }
 0xa47   :  { %v4231_v38 = vmul.f32 -1.442695, %v3703_v55 }
 0xa48   :  { %v4232_v24 = vmul.f32 -1.442695, %v3704_v9 }
 0xa49   :  { %7287 = vpow2.f32 %v4231_v38  ;;  %v3696_v38 = vadd.f32 %v3481_v62, %v10057_v52 }
 0xa4a   :  { %7289 = vpow2.f32 %v4232_v24 }
 0xa53   :  { %v7288_v18 = vpop.eup %7287 }
 0xa54   :  { %v3711_v7 = vadd.f32 1.0, %v7288_v18  ;;  %v7290_v51 = vpop.eup %7289 }
 0xa55   :  { %v3712_v57 = vadd.f32 1.0, %v7290_v51 }
 0xa56   :  { %7291 = vrcp.f32 %v3711_v7 }
 0xa57   :  { %7293 = vrcp.f32 %v3712_v57 }
 0xa60   :  { %v7292_v26 = vpop.eup %7291 }
 0xa61   :  { %v3718_v39 = vmul.f32 %v7292_v26, %v3717_v16  ;;  %v7294_v11 = vpop.eup %7293 }
 0xa62   :  { %v3721_v32 = vsub.f32 1.0, %v7294_v11  ;;  %v3723_v9 = vmul.f32 %v7294_v11, %v9069_v22 }
 0xa63   :  { %v3719_v60 = vadd.f32 %v3718_v39, %v3702_v54 }
 0xa65   :  { %7295 = vtanh.f32 %v3719_v60 }
 0xa6f   :  { %v7296_v55 = vpop.eup %7295 }
 0xa70   :  { %v3722_v5 = vmul.f32 %v7296_v55, %v3721_v32  ;;  %v9238_v55 = vld [vmem:[#allocation12] ss:$0 sm:$0xff] }
 0xa72   :  { %v9234_v34 = vadd.f32 %v3723_v9, %v3722_v5 }
 0xa84   :  { %v3550_v24 = vpop.f32.mrb[36].mxu1  ;;  %v3621_v18 = vpop.f32.mrb[38].mxu0 }
 0xa85   :  { %v3697_v0 = vadd.f32 %v3550_v24, %v10058_v47  ;;  %v3725_v7 = vadd.f32 %v3696_v38, %v3621_v18  ;;  %v3552_v51 = vpop.f32.mrb[37].mxu1  ;;  %v3623_v16 = vpop.f32.mrb[39].mxu0 }
 0xa86   :  { %v3698_v38 = vadd.f32 %v3552_v51, %v8241_v50 }
 0xa87   :  { %v3726_v57 = vadd.f32 %v3697_v0, %v3623_v16  ;;  %v4233_v39 = vmul.f32 -1.442695, %v3725_v7 }
 0xa89   :  { %7297 = vpow2.f32 %v4233_v39  ;;  %v4234_v54 = vmul.f32 -1.442695, %v3726_v57 }
 0xa8b   :  { %7299 = vpow2.f32 %v4234_v54 }
 0xa93   :  { %v7298_v42 = vpop.eup %7297 }
 0xa94   :  { %v3733_v32 = vadd.f32 1.0, %v7298_v42 }
 0xa95   :  { %v7300_v22 = vpop.eup %7299 }
 0xa96   :  { %7301 = vrcp.f32 %v3733_v32  ;;  %v3734_v11 = vadd.f32 1.0, %v7300_v22 }
 0xa98   :  { %7303 = vrcp.f32 %v3734_v11 }
 0xaa0   :  { %v7302_v9 = vpop.eup %7301 }
 0xaa2   :  { %v7304_v0 = vpop.eup %7303 }
 0xaa3   :  { %v3743_v7 = vsub.f32 1.0, %v7304_v0  ;;  %v3745_v57 = vmul.f32 %v7304_v0, %v9076_v12 }
 0xaa4   :  { %v4516_v26 = vpop.f32.mrb[38].mxu1 }
 0xaa5   :  { %v4517_v60 = vpop.f32.mrb[39].mxu1 }
 0xaa6   :  { %v4518_v62 = vadd.f32 %v4517_v60, %v4516_v26 }
 0xaa8   :  { %v3739_v5 = vadd.f32 %v9238_v55, %v4518_v62 }
 0xaaa   :  { %v3740_v24 = vmul.f32 %v7302_v9, %v3739_v5 }
 0xaac   :  { %v3741_v18 = vadd.f32 %v3740_v24, %v3698_v38 }
 0xaae   :  { %7305 = vtanh.f32 %v3741_v18 }
 0xab8   :  { %v7306_v16 = vpop.eup %7305 }
 0xab9   :  { %v3744_v39 = vmul.f32 %v7306_v16, %v3743_v7 }
 0xabb   :  { %v9243_v54 = vadd.f32 %v3745_v57, %v3744_v39 }
 0xabd   :  { %3825 = vmatprep.mubr.f32.mxu0 %v9243_v54  ;;  %3896 = vmatprep.mubr.f32.mxu1 %v9243_v54 }
 0xabe   :  { %3826 = vmatmul.mubr.f32.vlgmr.msra.gmra.mrb[40].mxu0 %v9234_v34  ;;  %3897 = vmatmul.mubr.f32.vlgmr.msra.gmra.mrb[40].mxu1 %v9234_v34 }
 0xabf   :  { %6989 = vmatpush1.bf16.msra.mxu0 %v9854_v41  ;;  %7053 = vmatpush1.bf16.msra.mxu1 %v9855_v44  ;;  %v10589_v41 = vld [vmem:[#allocation127_spill] sm:$0xff]  ;;  %v10590_v44 = vld [vmem:[#allocation120_spill] sm:$0xff] }
 0xac0   :  { %3967 = vmatprep.mubr.f32.mxu0 %v9243_v54  ;;  %4038 = vmatprep.mubr.f32.mxu1 %v9243_v54 }
 0xac1   :  { %6991 = vmatprep.subr.bf16.mxu0 %v9856_v59  ;;  %7055 = vmatprep.subr.bf16.mxu1 %v9954_v6  ;;  %v10591_v59 = vld [vmem:[#allocation130_spill] sm:$0xff]  ;;  %v10592_v6 = vld [vmem:[#allocation121_spill] sm:$0xff] }
 0xac3   :  { %6993 = vmatpush1.bf16.msra.mxu0 %v9955_v25  ;;  %7057 = vmatpush1.bf16.msra.mxu1 %v9956_v35  ;;  %v10593_v25 = vld [vmem:[#allocation131_spill] sm:$0xff]  ;;  %v10594_v35 = vld [vmem:[#allocation124_spill] sm:$0xff] }
 0xac4   :  { %6995 = vmatprep.subr.bf16.mxu0 %v9957_v33  ;;  %7059 = vmatprep.subr.bf16.mxu1 %v9958_v37  ;;  %v10595_v33 = vld [vmem:[#allocation134_spill] sm:$0xff]  ;;  %v10596_v37 = vld [vmem:[#allocation125_spill] sm:$0xff] }
 0xac7   :  { %6997 = vmatpush1.bf16.msra.mxu0 %v9959_v31  ;;  %7061 = vmatpush1.bf16.msra.mxu1 %v9960_v10  ;;  %v10597_v31 = vld [vmem:[#allocation135_spill] sm:$0xff]  ;;  %v10598_v10 = vld [vmem:[#allocation128_spill] sm:$0xff] }
 0xac8   :  { %6999 = vmatprep.subr.bf16.mxu0 %v10059_v63  ;;  %7063 = vmatprep.subr.bf16.mxu1 %v10060_v3  ;;  %v10603_v63 = vld [vmem:[#allocation142_spill] sm:$0xff]  ;;  %v10604_v3 = vld [vmem:[#allocation133_spill] sm:$0xff] }
 0xacb   :  { %7001 = vmatpush1.bf16.msra.mxu0 %v10061_v56  ;;  %7065 = vmatpush1.bf16.msra.mxu1 %v10062_v30  ;;  %v10605_v56 = vld [vmem:[#allocation143_spill] sm:$0xff]  ;;  %v10606_v30 = vld [vmem:[#allocation136_spill] sm:$0xff] }
 0xacc   :  { %7003 = vmatprep.subr.bf16.mxu0 %v10063_v58  ;;  %7067 = vmatprep.subr.bf16.mxu1 %v10064_v36  ;;  %v10607_v58 = vld [vmem:[#allocation146_spill] sm:$0xff]  ;;  %v10608_v36 = vld [vmem:[#allocation137_spill] sm:$0xff] }
 0xacf   :  { %7005 = vmatpush1.bf16.msra.mxu0 %v10065_v19  ;;  %7069 = vmatpush1.bf16.msra.mxu1 %v10066_v14  ;;  %v10609_v19 = vld [vmem:[#allocation147_spill] sm:$0xff]  ;;  %v10610_v14 = vld [vmem:[#allocation140_spill] sm:$0xff] }
 0xad0   :  { %7007 = vmatprep.subr.bf16.mxu0 %v10165_v17  ;;  %7071 = vmatprep.subr.bf16.mxu1 %v10166_v29  ;;  %v10621_v17 = vld [vmem:[#allocation155_spill] sm:$0xff]  ;;  %v10622_v29 = vld [vmem:[#allocation156_spill] sm:$0xff] }
 0xad3   :  { %7009 = vmatpush1.bf16.msra.mxu0 %v10167_v15  ;;  %7073 = vmatpush1.bf16.msra.mxu1 %v10070_v61  ;;  %v10614_v61 = vld [vmem:[#allocation145_spill] sm:$0xff] }
 0xad4   :  { %7011 = vmatprep.subr.bf16.mxu0 %v10168_v49  ;;  %7075 = vmatprep.subr.bf16.mxu1 %v10072_v1  ;;  %v10616_v1 = vld [vmem:[#allocation149_spill] sm:$0xff]  ;;  %v10624_v49 = vld [vmem:[#allocation158_spill] sm:$0xff] }
 0xad5   :  { %v10623_v15 = vld [vmem:[#allocation157_spill] sm:$0xff] }
 0xad7   :  { %7013 = vmatpush1.bf16.msra.mxu0 %v10169_v13  ;;  %7077 = vmatpush1.bf16.msra.mxu1 %v10074_v27  ;;  %v10617_v27 = vld [vmem:[#allocation151_spill] sm:$0xff] }
 0xad8   :  { %7015 = vmatprep.subr.bf16.mxu0 %v10075_v2  ;;  %7079 = vmatprep.subr.bf16.mxu1 %v10076_v20  ;;  %v10618_v2 = vld [vmem:[#allocation152_spill] sm:$0xff]  ;;  %v10619_v20 = vld [vmem:[#allocation153_spill] sm:$0xff]  ;;  %v10625_v13 = vld [vmem:[#allocation159_spill] sm:$0xff] }
 0xadb   :  { %7017 = vmatpush1.bf16.msra.mxu0 %v10077_v4  ;;  %7081 = vmatpush1.bf16.msra.mxu1 %v10078_v40  ;;  %v10611_v40 = vld [vmem:[#allocation150_spill] sm:$0xff] }
 0xadc   :  { %7019 = vmatprep.subr.bf16.mxu0 %v10079_v8  ;;  %7083 = vmatprep.subr.bf16.mxu1 %v10080_v23  ;;  %v10612_v8 = vld [vmem:[#allocation141_spill] sm:$0xff]  ;;  %v10613_v23 = vld [vmem:[#allocation144_spill] sm:$0xff]  ;;  %v10620_v4 = vld [vmem:[#allocation154_spill] sm:$0xff] }
 0xadf   :  { %7021 = vmatpush1.bf16.msra.mxu0 %v9983_v28  ;;  %7085 = vmatpush1.bf16.msra.mxu1 %v10081_v21  ;;  %v10599_v28 = vld [vmem:[#allocation138_spill] sm:$0xff]  ;;  %v10615_v21 = vld [vmem:[#allocation148_spill] sm:$0xff] }
 0xae0   :  { %7023 = vmatprep.subr.bf16.mxu0 %v9985_v53  ;;  %7087 = vmatprep.subr.bf16.mxu1 %v10170_v48  ;;  %v10600_v53 = vld [vmem:[#allocation129_spill] sm:$0xff]  ;;  %v10626_v48 = vld [vmem:[#allocation160_spill] sm:$0xff] }
 0xae3   :  { %7025 = vmatpush1.bf16.msra.mxu0 %v9987_v45  ;;  %7089 = vmatpush1.bf16.msra.mxu1 %v9988_v43  ;;  %v10601_v45 = vld [vmem:[#allocation139_spill] sm:$0xff]  ;;  %v10602_v43 = vld [vmem:[#allocation132_spill] sm:$0xff] }
 0xae4   :  { %7027 = vmatprep.subr.bf16.mxu0 %v10376_v46  ;;  %7091 = vmatprep.subr.bf16.mxu1 %v10589_v41  ;;  %v10627_v46 = vld [vmem:[#allocation161_spill] sm:$0xff] }
 0xae7   :  { %7029 = vmatpush1.bf16.msra.mxu0 %v10590_v44  ;;  %7093 = vmatpush1.bf16.msra.mxu1 %v10591_v59 }
 0xae8   :  { %7031 = vmatprep.subr.bf16.mxu0 %v10592_v6  ;;  %7095 = vmatprep.subr.bf16.mxu1 %v10593_v25 }
 0xaeb   :  { %7033 = vmatpush1.bf16.msra.mxu0 %v10594_v35  ;;  %7097 = vmatpush1.bf16.msra.mxu1 %v10595_v33 }
 0xaec   :  { %7035 = vmatprep.subr.bf16.mxu0 %v10596_v37  ;;  %7099 = vmatprep.subr.bf16.mxu1 %v10597_v31 }
 0xaef   :  { %7037 = vmatpush1.bf16.msra.mxu0 %v10598_v10  ;;  %7101 = vmatpush1.bf16.msra.mxu1 %v10599_v28 }
 0xaf0   :  { %7039 = vmatprep.subr.bf16.mxu0 %v10600_v53  ;;  %7103 = vmatprep.subr.bf16.mxu1 %v10601_v45 }
 0xaf3   :  { %7041 = vmatpush1.bf16.msra.mxu0 %v10602_v43  ;;  %7105 = vmatpush1.bf16.msra.mxu1 %v10603_v63 }
 0xaf4   :  { %7043 = vmatprep.subr.bf16.mxu0 %v10604_v3  ;;  %7107 = vmatprep.subr.bf16.mxu1 %v10605_v56 }
 0xaf7   :  { %7045 = vmatpush1.bf16.msra.mxu0 %v10606_v30  ;;  %7109 = vmatpush1.bf16.msra.mxu1 %v10607_v58 }
 0xaf8   :  { %7047 = vmatprep.subr.bf16.mxu0 %v10608_v36  ;;  %7111 = vmatprep.subr.bf16.mxu1 %v10609_v19 }
 0xafb   :  { %7049 = vmatpush1.bf16.msra.mxu0 %v10610_v14  ;;  %7113 = vmatpush1.bf16.msra.mxu1 %v10611_v40 }
 0xafc   :  { %7115 = vmatprep.subr.bf16.mxu0 %v10612_v8 }
 0xafe   :  { %3968 = vmatmul.mubr.f32.vlgmr.msra.gmra.mrb[42].mxu0 %v9234_v34  ;;  %4039 = vmatmul.mubr.f32.vlgmr.msra.gmra.mrb[42].mxu1 %v9234_v34 }
 0xaff   :  { %7117 = vmatpush3.bf16.msra.mxu0 %v10613_v23  ;;  %4109 = vmatprep.mubr.f32.mxu0 %v9243_v54 }
 0xb00   :  { %7119 = vmatprep.subr.bf16.mxu0 %v10614_v61 }
 0xb03   :  { %7121 = vmatpush3.bf16.msra.mxu0 %v10615_v21 }
 0xb04   :  { %7123 = vmatprep.subr.bf16.mxu0 %v10616_v1 }
 0xb07   :  { %7125 = vmatpush3.bf16.msra.mxu0 %v10617_v27 }
 0xb08   :  { %7127 = vmatprep.subr.bf16.mxu0 %v10618_v2 }
 0xb0b   :  { %7129 = vmatpush3.bf16.msra.mxu0 %v10619_v20 }
 0xb0c   :  { %7131 = vmatprep.subr.bf16.mxu0 %v10620_v4 }
 0xb0f   :  { %7133 = vmatpush3.bf16.msra.mxu0 %v10621_v17 }
 0xb10   :  { %7135 = vmatprep.subr.bf16.mxu0 %v10622_v29 }
 0xb13   :  { %7137 = vmatpush3.bf16.msra.mxu0 %v10623_v15 }
 0xb14   :  { %7139 = vmatprep.subr.bf16.mxu0 %v10624_v49 }
 0xb17   :  { %7141 = vmatpush3.bf16.msra.mxu0 %v10625_v13 }
 0xb18   :  { %7143 = vmatprep.subr.bf16.mxu0 %v10626_v48 }
 0xb1b   :  { %7145 = vmatpush3.bf16.msra.mxu0 %v10627_v46 }
 0xb1e   :  { %4110 = vmatmul.mubr.f32.vlgmr.msra.gmra.mrb[44].mxu0 %v9234_v34 }
 0xb91   :  { %v3827_v12 = vpop.f32.mrb[40].mxu0  ;;  %v3898_v51 = vpop.f32.mrb[40].mxu1 }
 0xb92   :  { %v3829_v42 = vpop.f32.mrb[41].mxu0  ;;  %v3900_v32 = vpop.f32.mrb[41].mxu1 }
 0xb93   :  { %v4115_v22 = vadd.f32 %v3900_v32, %v10057_v52 }
 0xbd1   :  { %v3969_v26 = vpop.f32.mrb[42].mxu0  ;;  %v4040_v60 = vpop.f32.mrb[42].mxu1 }
 0xbd2   :  { %v4116_v11 = vadd.f32 %v3969_v26, %v10058_v47  ;;  %v4144_v62 = vadd.f32 %v4115_v22, %v4040_v60  ;;  %v3971_v5 = vpop.f32.mrb[43].mxu0  ;;  %v4042_v9 = vpop.f32.mrb[43].mxu1 }
 0xbd3   :  { %v4117_v47 = vadd.f32 %v3971_v5, %v8241_v50 }
 0xbd4   :  { %v4145_v38 = vadd.f32 %v4116_v11, %v4042_v9  ;;  %v4237_v24 = vmul.f32 -1.442695, %v4144_v62 }
 0xbd6   :  { %7307 = vpow2.f32 %v4237_v24  ;;  %v4238_v18 = vmul.f32 -1.442695, %v4145_v38 }
 0xbd8   :  { %7309 = vpow2.f32 %v4238_v18 }
 0xbe0   :  { %v7308_v0 = vpop.eup %7307 }
 0xbe1   :  { %v4152_v34 = vadd.f32 1.0, %v7308_v0 }
 0xbe2   :  { %v7310_v7 = vpop.eup %7309 }
 0xbe3   :  { %7311 = vrcp.f32 %v4152_v34  ;;  %v4153_v39 = vadd.f32 1.0, %v7310_v7 }
 0xbe5   :  { %7313 = vrcp.f32 %v4153_v39 }
 0xbed   :  { %v7312_v44 = vpop.eup %7311 }
 0xbef   :  { %v7314_v25 = vpop.eup %7313 }
 0xbf0   :  { %v4162_v35 = vsub.f32 1.0, %v7314_v25  ;;  %v4164_v31 = vmul.f32 %v7314_v25, %v9243_v54 }
 0xbf1   :  { %v4551_v16 = vpop.f32.mrb[44].mxu0 }
 0xbf2   :  { %v4552_v57 = vpop.f32.mrb[45].mxu0 }
 0xbf3   :  { %v4553_v52 = vadd.f32 %v4552_v57, %v4551_v16 }
 0xbf5   :  { %v4158_v41 = vadd.f32 %v9238_v55, %v4553_v52 }
 0xbf7   :  { %v4159_v59 = vmul.f32 %v7312_v44, %v4158_v41 }
 0xbf9   :  { %v4160_v6 = vadd.f32 %v4159_v59, %v4117_v47 }
 0xbfb   :  { %7315 = vtanh.f32 %v4160_v6 }
 0xc05   :  { %v7316_v33 = vpop.eup %7315 }
 0xc06   :  { %v4163_v37 = vmul.f32 %v7316_v33, %v4162_v35 }
 0xc08   :  { %v4165_v10 = vadd.f32 %v4164_v31, %v4163_v37 }
 0xc0a   :  { %4183 = vst [vmem:[#allocation13] sm:$0xff] %v4165_v10 }
 0xc0b   :  { %7442 = shalt.err (!%p7439_p2)
}
 0xc0c   :  { %s7443_s8 = scalar_lea.hbm %s9355_s5, 128 }
 0xc0d   :  { %p7444_p3 = scmp.ne.s32.totalorder %s9355_s5, %s7443_s8  ;;  %p7447_p4 = scmp.lt.u32.totalorder %s7443_s8, %s9355_s5 }
 0xc0f   :  { %p7449_p5 = pnand %p7447_p4, %p7444_p3 }
 0xc11   :  { %7452 = shalt.err (!%p7449_p5)
}
 0xc12   :  { %4193 = dma.vmem_to_hbm [thread:$0]  %s4191_s29, 128, %s9355_s5, [#allocation6]  }
 0xc13   :  { %7459 = dma.done.wait [#allocation6], 128  }
 0xc14   :  { %7460 = vsyncadd [#allocation6], 4294967168 }
 0xc15   :  { %4197 = vsyncpa [#allocation5], 1 }
 0xc16   :  { %4198 = vsyncpa [#allocation8], 1 }
 0xc17   :  { %4199 = vsyncpa [#allocation11], 1 }
 0xc18   :  { %4200 = vsyncpa [#allocation6], 1 }

</bundles_post_ra>
